<compile_context>
chip_gen: v6e
topology: v6e:2x2x1
jax: 0.10.0
libtpu: 0.0.40
codegen_flags: <defaults>
</compile_context>

<pallas_src>
import math
import functools

import jax
import jax.numpy as jnp
from jax.experimental import pallas as pl
from jax.experimental.pallas import tpu as pltpu


def _timestep_embedder_kernel(t_ref, freqs_ref, w1_ref, b1_ref, w2_ref,
                              b2_ref, out_ref):
    # t_ref:     (tm, 1)    f32
    # freqs_ref: (1, F//2)  f32
    # w1_ref:    (F, H)     bf16  (rows 0..F/2 multiply cos, F/2..F sin,
    #                              matching torch.cat([cos, sin], dim=-1))
    # b1_ref:    (1, H)     f32
    # w2_ref:    (H, H)     bf16
    # b2_ref:    (1, H)     f32
    # out_ref:   (tm, H)    f32 or bf16
    args = t_ref[...] * freqs_ref[...]                      # (tm, F//2) f32

    # [cos | sin] along lanes. Both halves are multiples of 128 lanes for the
    # DiT default F=256, so this lowers to full-lane writes (no shuffle) and
    # feeds one K=F matmul that fills the 256-deep MXU on v6e/v7x.
    sin_cos = jnp.concatenate(
        [jnp.cos(args), jnp.sin(args)], axis=-1).astype(w1_ref.dtype)

    # Linear(F -> H): single fused dot, f32 accumulation, f32 bias add.
    h = jnp.dot(sin_cos, w1_ref[...],
                preferred_element_type=jnp.float32) + b1_ref[...]

    # SiLU in f32 (EUP sigmoid, VPU mul).
    h = h * jax.nn.sigmoid(h)

    # Linear(H -> H), bf16 MXU inputs, f32 accumulation.
    out = jnp.dot(h.astype(w2_ref.dtype), w2_ref[...],
                  preferred_element_type=jnp.float32) + b2_ref[...]
    out_ref[...] = out.astype(out_ref.dtype)


def _round_up(x, m):
    return ((x + m - 1) // m) * m


_HAS_BUFFERED = hasattr(pl, "Buffered")


def _resident_spec(shape):
    """Grid-invariant operand: constant index_map keeps it VMEM-resident.

    A single pipeline buffer (Buffered(1)) avoids wasting a second VMEM copy
    on data whose block never changes across the grid.
    """
    if _HAS_BUFFERED:
        return pl.BlockSpec(shape, lambda i: (0, 0),
                            pipeline_mode=pl.Buffered(1))
    return pl.BlockSpec(shape, lambda i: (0, 0))


@functools.partial(
    jax.jit,
    static_argnames=("frequency_embedding_size", "max_period", "block_n",
                     "out_dtype"))
def timestep_embedder_forward(t, w1, b1, w2, b2, *,
                              frequency_embedding_size=256,
                              max_period=10000,
                              block_n=512,
                              out_dtype=jnp.float32):
    """Pallas forward: sinusoidal timestep embedding + MLP (Linear, SiLU, Linear).

    t:  (N,)   float timesteps
    w1: (F, H) first linear weight, stored (in, out) for x @ W
               (i.e. torch ``mlp[0].weight.T``), rows ordered for the
               torch.cat([cos, sin], dim=-1) feature layout.
    b1: (H,)
    w2: (H, H) second linear weight, (in, out) layout.
    b2: (H,)
    Returns (N, H) in out_dtype (default f32), matching PyTorch TimestepEmbedder.
    """
    n = t.shape[0]
    f = frequency_embedding_size
    if f % 2:
        raise NotImplementedError(
            "odd frequency_embedding_size not supported (PyTorch zero-pads)")
    half = f // 2
    hid = w1.shape[1]
    assert w1.shape == (f, hid), w1.shape
    assert w2.shape == (hid, hid), w2.shape

    # Derive freqs here so max_period and the embedding can never disagree.
    freqs = jnp.exp(
        -math.log(max_period) * jnp.arange(half, dtype=jnp.float32) / half
    ).reshape(1, half)

    # Tile the batch axis. Target >= 2 tiles so the "parallel" grid axis can
    # shard across both v7x TensorCores, but never split finer than that:
    # the weights are VMEM-resident, so extra grid steps only add overhead.
    n_rows = _round_up(n, 8)
    tm = min(block_n, max(8, _round_up(-(-n_rows // 2), 8)))
    n_pad = _round_up(n_rows, tm)

    t2d = t.astype(jnp.float32).reshape(n, 1)
    if n_pad != n:
        t2d = jnp.pad(t2d, ((0, n_pad - n), (0, 0)))

    # bf16 MXU operands; biases stay f32.
    w1b = w1.astype(jnp.bfloat16)
    w2b = w2.astype(jnp.bfloat16)
    b1_2d = b1.astype(jnp.float32).reshape(1, hid)
    b2_2d = b2.astype(jnp.float32).reshape(1, hid)

    grid_n = n_pad // tm
    out_bytes = jnp.dtype(out_dtype).itemsize
    cost = pl.CostEstimate(
        flops=2 * n_pad * (f * hid + hid * hid),
        transcendentals=n_pad * (f + hid),              # cos + sin + sigmoid
        bytes_accessed=((f * hid + hid * hid) * 2       # bf16 weights
                        + 2 * hid * 4                   # biases
                        + half * 4                      # freqs
                        + n_pad * 4                     # t
                        + n_pad * hid * out_bytes),     # out
    )

    out = pl.pallas_call(
        _timestep_embedder_kernel,
        out_shape=jax.ShapeDtypeStruct((n_pad, hid), out_dtype),
        grid=(grid_n,),
        in_specs=[
            pl.BlockSpec((tm, 1), lambda i: (i, 0)),    # t tile (pipelined)
            _resident_spec((1, half)),                  # freqs
            _resident_spec((f, hid)),                   # w1 (full, fused K=F)
            _resident_spec((1, hid)),                   # b1
            _resident_spec((hid, hid)),                 # w2
            _resident_spec((1, hid)),                   # b2
        ],
        out_specs=pl.BlockSpec((tm, hid), lambda i: (i, 0)),
        compiler_params=pltpu.CompilerParams(
            dimension_semantics=("parallel",),
            vmem_limit_bytes=32 * 1024 * 1024),
        cost_estimate=cost,
    )(t2d, freqs, w1b, b1_2d, w2b, b2_2d)

    return out[:n] if n_pad != n else out


def reference_forward(t, w1, b1, w2, b2, frequency_embedding_size,
                      max_period=10000):
    """Pure-JAX f32 reference mirroring the PyTorch module semantics."""
    half = frequency_embedding_size // 2
    freqs = jnp.exp(
        -math.log(max_period) * jnp.arange(half, dtype=jnp.float32) / half)
    args = t.astype(jnp.float32)[:, None] * freqs[None]
    emb = jnp.concatenate([jnp.cos(args), jnp.sin(args)], axis=-1)
    hid = emb @ w1 + b1
    hid = hid * jax.nn.sigmoid(hid)
    return hid @ w2 + b2


if __name__ == "__main__":
    # Small shapes consistent with the module: N timesteps, F=256, hidden=128.
    # N=300 exercises the 2-tile grid (tm=152), the pad path and the slice.
    N = 300
    FREQ_EMB = 256
    HIDDEN = 128

    key = jax.random.PRNGKey(0)
    k_t, k_w1, k_b1, k_w2, k_b2 = jax.random.split(key, 5)

    t = jax.random.uniform(k_t, (N,), jnp.float32, 0.0, 1000.0)
    w1 = jax.random.normal(k_w1, (FREQ_EMB, HIDDEN), jnp.float32) * 0.02
    b1 = jax.random.normal(k_b1, (HIDDEN,), jnp.float32) * 0.02
    w2 = jax.random.normal(k_w2, (HIDDEN, HIDDEN), jnp.float32) * 0.02
    b2 = jax.random.normal(k_b2, (HIDDEN,), jnp.float32) * 0.02

    out = timestep_embedder_forward(
        t, w1, b1, w2, b2, frequency_embedding_size=FREQ_EMB)
    out = jax.block_until_ready(out)

    ref = reference_forward(t, w1, b1, w2, b2, FREQ_EMB)
    assert out.shape == (N, HIDDEN)
    # bf16 MXU inputs with f32 accumulation -> loosened tolerance vs f32 ref.
    max_err = float(jnp.max(jnp.abs(out - ref)))
    assert jnp.allclose(out, ref, atol=1e-2, rtol=1e-2), (
        f"mismatch vs reference, max_err={max_err}")

    print("KERNEL_OK")
</pallas_src>

<mosaic_0001>
module attributes {stable_mosaic.version = 11 : i64} {
  func.func @_timestep_embedder_kernel(%arg0: i32, %arg1: memref<152x1xf32, #tpu.memory_space<vmem>>, %arg2: memref<1x128xf32, #tpu.memory_space<vmem>>, %arg3: memref<256x128xbf16, #tpu.memory_space<vmem>>, %arg4: memref<1x128xf32, #tpu.memory_space<vmem>>, %arg5: memref<128x128xbf16, #tpu.memory_space<vmem>>, %arg6: memref<1x128xf32, #tpu.memory_space<vmem>>, %arg7: memref<152x128xf32, #tpu.memory_space<vmem>>) attributes {dimension_semantics = [#tpu.dimension_semantics<parallel>], iteration_bounds = array<i64: 2>, scalar_prefetch = 0 : i64, scratch_operands = 0 : i64, tpu.core_type = #tpu.core_type<tc>, window_params = [{transform_indices = @transform_0, window_bounds = array<i64: 152, 1>}, {pipeline_mode = #tpu.pipeline_mode<synchronous>, transform_indices = @transform_1, window_bounds = array<i64: 1, 128>}, {pipeline_mode = #tpu.pipeline_mode<synchronous>, transform_indices = @transform_2, window_bounds = array<i64: 256, 128>}, {pipeline_mode = #tpu.pipeline_mode<synchronous>, transform_indices = @transform_3, window_bounds = array<i64: 1, 128>}, {pipeline_mode = #tpu.pipeline_mode<synchronous>, transform_indices = @transform_4, window_bounds = array<i64: 128, 128>}, {pipeline_mode = #tpu.pipeline_mode<synchronous>, transform_indices = @transform_5, window_bounds = array<i64: 1, 128>}, {transform_indices = @transform_6, window_bounds = array<i64: 152, 128>}]} {
    %c0 = arith.constant 0 : index
    %c0_0 = arith.constant 0 : index
    %0 = vector.load %arg1[%c0, %c0_0] : memref<152x1xf32, #tpu.memory_space<vmem>>, vector<152x1xf32>
    %c0_1 = arith.constant 0 : index
    %c0_2 = arith.constant 0 : index
    %1 = vector.load %arg2[%c0_1, %c0_2] : memref<1x128xf32, #tpu.memory_space<vmem>>, vector<1x128xf32>
    %2 = vector.broadcast %0 : vector<152x1xf32> to vector<152x128xf32>
    %3 = vector.broadcast %1 : vector<1x128xf32> to vector<152x128xf32>
    %4 = arith.mulf %2, %3 : vector<152x128xf32>
    %5 = math.cos %4 : vector<152x128xf32>
    %6 = math.sin %4 : vector<152x128xf32>
    %7 = tpu.concatenate %5, %6 in 1 : vector<152x128xf32>, vector<152x128xf32> -> vector<152x256xf32>
    %8 = arith.truncf %7 : vector<152x256xf32> to vector<152x256xbf16>
    %c0_3 = arith.constant 0 : index
    %c0_4 = arith.constant 0 : index
    %9 = vector.load %arg3[%c0_3, %c0_4] : memref<256x128xbf16, #tpu.memory_space<vmem>>, vector<256x128xbf16>
    %cst = arith.constant dense<0.000000e+00> : vector<152x128xf32>
    %10 = tpu.matmul %8, %9, %cst {dimension_numbers = #tpu.dot_dimension_numbers<[1], [0], [0], [1], [0, 0, 1, 1], [], []>} : vector<152x256xbf16>, vector<256x128xbf16>, vector<152x128xf32> -> vector<152x128xf32>
    %c0_5 = arith.constant 0 : index
    %c0_6 = arith.constant 0 : index
    %11 = vector.load %arg4[%c0_5, %c0_6] : memref<1x128xf32, #tpu.memory_space<vmem>>, vector<1x128xf32>
    %12 = vector.broadcast %11 : vector<1x128xf32> to vector<152x128xf32>
    %13 = arith.addf %10, %12 : vector<152x128xf32>
    %14 = arith.negf %13 : vector<152x128xf32>
    %15 = math.exp %14 : vector<152x128xf32>
    %cst_7 = arith.constant 1.000000e+00 : f32
    %16 = vector.broadcast %cst_7 : f32 to vector<152x128xf32>
    %17 = arith.addf %16, %15 : vector<152x128xf32>
    %18 = arith.divf %16, %17 : vector<152x128xf32>
    %19 = arith.mulf %13, %18 : vector<152x128xf32>
    %20 = arith.truncf %19 : vector<152x128xf32> to vector<152x128xbf16>
    %c0_8 = arith.constant 0 : index
    %c0_9 = arith.constant 0 : index
    %21 = vector.load %arg5[%c0_8, %c0_9] : memref<128x128xbf16, #tpu.memory_space<vmem>>, vector<128x128xbf16>
    %cst_10 = arith.constant dense<0.000000e+00> : vector<152x128xf32>
    %22 = tpu.matmul %20, %21, %cst_10 {dimension_numbers = #tpu.dot_dimension_numbers<[1], [0], [0], [1], [0, 0, 1, 1], [], []>} : vector<152x128xbf16>, vector<128x128xbf16>, vector<152x128xf32> -> vector<152x128xf32>
    %c0_11 = arith.constant 0 : index
    %c0_12 = arith.constant 0 : index
    %23 = vector.load %arg6[%c0_11, %c0_12] : memref<1x128xf32, #tpu.memory_space<vmem>>, vector<1x128xf32>
    %24 = vector.broadcast %23 : vector<1x128xf32> to vector<152x128xf32>
    %25 = arith.addf %22, %24 : vector<152x128xf32>
    %c0_13 = arith.constant 0 : index
    %c0_14 = arith.constant 0 : index
    %26 = vector.load %arg7[%c0_13, %c0_14] : memref<152x128xf32, #tpu.memory_space<vmem>>, vector<152x128xf32>
    tpu.vector_store %arg7[%c0_13, %c0_14], %25 {strides = array<i32>} : memref<152x128xf32, #tpu.memory_space<vmem>>, vector<152x128xf32>,
    return
  }
  func.func @transform_0(%arg0: i32) -> (i32, i32) {
    %c0_i32 = arith.constant 0 : i32
    %c0_i32_0 = arith.constant 0 : i32
    return %arg0, %c0_i32 : i32, i32
  }
  func.func @transform_1(%arg0: i32) -> (i32, i32) {
    %c0_i32 = arith.constant 0 : i32
    %c0_i32_0 = arith.constant 0 : i32
    %c0_i32_1 = arith.constant 0 : i32
    return %c0_i32, %c0_i32_0 : i32, i32
  }
  func.func @transform_2(%arg0: i32) -> (i32, i32) {
    %c0_i32 = arith.constant 0 : i32
    %c0_i32_0 = arith.constant 0 : i32
    %c0_i32_1 = arith.constant 0 : i32
    return %c0_i32, %c0_i32_0 : i32, i32
  }
  func.func @transform_3(%arg0: i32) -> (i32, i32) {
    %c0_i32 = arith.constant 0 : i32
    %c0_i32_0 = arith.constant 0 : i32
    %c0_i32_1 = arith.constant 0 : i32
    return %c0_i32, %c0_i32_0 : i32, i32
  }
  func.func @transform_4(%arg0: i32) -> (i32, i32) {
    %c0_i32 = arith.constant 0 : i32
    %c0_i32_0 = arith.constant 0 : i32
    %c0_i32_1 = arith.constant 0 : i32
    return %c0_i32, %c0_i32_0 : i32, i32
  }
  func.func @transform_5(%arg0: i32) -> (i32, i32) {
    %c0_i32 = arith.constant 0 : i32
    %c0_i32_0 = arith.constant 0 : i32
    %c0_i32_1 = arith.constant 0 : i32
    return %c0_i32, %c0_i32_0 : i32, i32
  }
  func.func @transform_6(%arg0: i32) -> (i32, i32) {
    %c0_i32 = arith.constant 0 : i32
    %c0_i32_0 = arith.constant 0 : i32
    return %arg0, %c0_i32 : i32, i32
  }
}

</mosaic_0001>

<bundles_post_ra>
// kernel: timestep_embedder_forward.1
= control target key start
LH: loop header
LB: loop body
LE: loop exit
PB: predicated region body
PF: predicated region fallthrough
CT: control target
= control target key end

     0   :  { %11 = vsyncpa [#allocation3], 0  ;;  %s7965_s0 = inlined_call_operand.vmem [shape: f32[304,1], index: 0, kind: input, shape index: {}]   ;;  %s7966_s1 = inlined_call_operand.vmem [shape: f32[1,128], index: 1, kind: input, shape index: {}]   ;;  %s7967_s2 = inlined_call_operand.vmem [shape: bf16[256,128], index: 2, kind: input, shape index: {}]   ;;  %s7968_s3 = inlined_call_operand.vmem [shape: f32[1,128], index: 3, kind: input, shape index: {}]   ;;  %s7969_s4 = inlined_call_operand.vmem [shape: bf16[128,128], index: 4, kind: input, shape index: {}]   ;;  %s7970_s5 = inlined_call_operand.vmem [shape: f32[1,128], index: 5, kind: input, shape index: {}]   ;;  %s7971_s6 = inlined_call_operand.hbm [shape: f32[304,128], index: 6, kind: output, shape index: {}]  }
   0x1   :  { %13 = vsyncpa [#allocation3 + $0x1], 0  ;;  %s5764_s21 = smov 0   ;;  %s5766_s22 = smov 0  }
   0x2   :  { %s5768_s23 = smov 0   ;;  %s5770_s24 = smov 0  }
   0x3 LB: > { %s5785_s25 = sadd.s32 4294967295, %s5717_s24   ;;  %s5015_s26 = sadd.s32 4294967294, %s5717_s24   ;;  %s5717_s24 = sphi %s5770_s24, %s8300_s24   ;;  %s5713_s23 = sphi %s5768_s23, %s8299_s23   ;;  %s5709_s22 = sphi %s5766_s22, %s8298_s22   ;;  %s5705_s21 = sphi %s5764_s21, %s8297_s21  }
   0x4   : > { %s5789_s27 = sadd.s32 1, %s5717_s24   ;;  %s157_s28 = sadd.s32 1, %s5713_s23 }
   0x5   : > { %s154_s29 = ssub.s32 %s5717_s24, %s5789_s27  ;;  %p167_p0 = scmp.ne.s32.totalorder %s5713_s23, %s5709_s22 }
   0x6   : > { %p155_p1 = scmp.eq.s32.totalorder %s154_s29, 0  ;;  %p168_p2 = scmp.eq.s32.totalorder %s5785_s25, 1 }
   0x7   : > { %p173_p3 = scmp.ne.s32.totalorder %s5709_s22, %s5705_s21  ;;  %p174_p4 = scmp.eq.s32.totalorder %s5015_s26, 1 }
   0x8   : > { %s5800_s30 = scalar_select %p155_p1, %s5713_s23, %s157_s28  }
   0x9   : > { %p5802_p5 = por %p168_p2, %p167_p0  ;;  %p5806_p6 = por %p174_p4, %p173_p3 }
   0xa   : > { %p5018_p7 = scmp.ge.s32.totalorder %s5717_s24, 1  ;;  %p216_p8 = scmp.lt.s32.totalorder %s5717_s24, 3 }
   0xc   : > { %p217_p9 = pnand %p5018_p7, %p216_p8 }
   0xe   : > { %220 = sbr.rel (%p217_p9) target bundleno = 1144 (0x478), region = 44 }
  0x13   : > { %s246_s9 = smul.u32 19, %s5785_s25  ;;  %v5719_v0 = vmov 0   ;;  %v5840_v20 = vld [vmem:[%s7966_s1] ss:$0 sm:$0xff]  ;;  %v7989_v58 = vmov 683565275  }
  0x14   : > { %5478 = vset.pattern.permute.xlu1 %v5719_v0  ;;  %5477 = vset.pattern.permute.xlu0 %v5719_v0  ;;  %v7979_v60 = vmov 2475754826   ;;  %v7981_v62 = vmov 2131351028   ;;  %v7987_v0 = vmov 2102212464  }
  0x15   : > { %p247_p10 = scmp.lt.s32.totalorder %s246_s9, 37  ;;  %s5221_s15 = smul.u32 2432, %s5785_s25 }
  0x16   : > { %s5726_s26 = smov [#allocation2]  }
  0x17   : > { %s8302_s9 = smov (!%p247_p10, %s246_s9), 37  ;;  %s7920_s19 = scalar_lea.hbm %s7971_s6, %s5221_s15 }
  0x18   : > { %s5019_s10 = sshll.u32 %s8302_s9, 3  ;;  %s5661_s28 = sshll.u32 %s5726_s26, 4  ;;  %s5662_s28 = int_to_ptr.vmem [resolvable:$false] %s5661_s28 }
  0x19   : > { %s5816_s13 = scalar_lea.vmem %s7965_s0, %s5019_s10  ;;  %s243_s10 = sand.u32 1, %s5709_s22  }
  0x1a   : > { %v256_v1 = vld [vmem:[%s5816_s13 + $0x10] sm:$0xff]  ;;  %v254_v2 = vld [vmem:[%s5816_s13] sm:$0xff]  ;;  %v257_v3 = vld [vmem:[%s5816_s13 + $0x18] sm:$0xff]  ;;  %s5352_s11 = smul.u32 152, %s243_s10  ;;  %s7925_s20 = scalar_lea.sflag [#allocation3], %s243_s10 }
  0x1b   : > { %286 = vperm.xlu1 %5478, %v256_v1   ;;  %276 = vperm.xlu0 %5477, %v254_v2   ;;  %v255_v4 = vld [vmem:[%s5816_s13 + $0x8] sm:$0xff]  ;;  %v258_v6 = vld [vmem:[%s5816_s13 + $0x20] sm:$0xff]  ;;  %v261_v7 = vld [vmem:[%s5816_s13 + $0x38] sm:$0xff]  ;;  %v7993_v2 = vmov 920167782   ;;  %s5663_s29 = scalar_lea.vmem %s5662_s28, 4864 }
  0x1c   : > { %v259_v5 = vld [vmem:[%s5816_s13 + $0x28] sm:$0xff]  ;;  %v260_v8 = vld [vmem:[%s5816_s13 + $0x30] sm:$0xff]  ;;  %v262_v10 = vld [vmem:[%s5816_s13 + $0x40] sm:$0xff]  ;;  %s7893_s14 = scalar_lea.vmem [#allocation2], %s5352_s11 }
  0x1d   : > { %v263_v9 = vld [vmem:[%s5816_s13 + $0x48] sm:$0xff]  ;;  %v265_v11 = vld [vmem:[%s5816_s13 + $0x58] sm:$0xff]  ;;  %v264_v12 = vld [vmem:[%s5816_s13 + $0x50] sm:$0xff]  ;;  %s4953_s16 = sshll.u32 %s7893_s14, 4  ;;  %s7915_s16 = int_to_ptr.vmem [resolvable:$true] %s4953_s16 }
  0x1e   : > { %v267_v13 = vld [vmem:[%s5816_s13 + $0x68] sm:$0xff]  ;;  %v266_v14 = vld [vmem:[%s5816_s13 + $0x60] sm:$0xff]  ;;  %v269_v15 = vld [vmem:[%s5816_s13 + $0x78] sm:$0xff]  ;;  %s5657_s25 = scalar_lea.vmem %s7915_s16, 2432  ;;  %p5664_p0 = scmp.lt.s32.totalorder %s7915_s16, %s5662_s28 }
  0x1f   : > { %291 = vperm.xlu1 %5478, %v257_v3   ;;  %281 = vperm.xlu0 %5477, %v255_v4   ;;  %v268_v16 = vld [vmem:[%s5816_s13 + $0x70] sm:$0xff]  ;;  %v271_v17 = vld [vmem:[%s5816_s13 + $0x88] sm:$0xff]  ;;  %v270_v18 = vld [vmem:[%s5816_s13 + $0x80] sm:$0xff]  ;;  %p5658_p11 = scmp.ne.s32.totalorder %s7915_s16, %s5657_s25  ;;  %p5665_p1 = scmp.lt.s32.totalorder %s5663_s29, %s5657_s25 }
  0x20   : > { %v272_v19 = vld [vmem:[%s5816_s13 + $0x90] sm:$0xff] }
  0x21   : > { %p5659_p12 = pnand %p5658_p11, %p5802_p5  ;;  %p5666_p2 = por %p5665_p1, %p5664_p0 }
  0x23   : > { %301 = vperm.xlu1 %5478, %v259_v5   ;;  %296 = vperm.xlu0 %5477, %v258_v6   ;;  %p5660_p13 = pneg %p5659_p12 }
  0x25   : > { %p5667_p3 = pnand %p5666_p2, %p5660_p13 }
  0x27   : > { %311 = vperm.xlu1 %5478, %v261_v7   ;;  %306 = vperm.xlu0 %5477, %v260_v8  }
  0x2b   : > { %321 = vperm.xlu1 %5478, %v263_v9   ;;  %316 = vperm.xlu0 %5477, %v262_v10   ;;  %v7983_v10 = vmov 1326507024  }
  0x2f   : > { %331 = vperm.xlu1 %5478, %v265_v11   ;;  %326 = vperm.xlu0 %5477, %v264_v12  }
  0x33   : > { %341 = vperm.xlu1 %5478, %v267_v13   ;;  %336 = vperm.xlu0 %5477, %v266_v14  }
  0x37   : > { %351 = vperm.xlu1 %5478, %v269_v15   ;;  %346 = vperm.xlu0 %5477, %v268_v16  }
  0x3b   : > { %361 = vperm.xlu1 %5478, %v271_v17   ;;  %356 = vperm.xlu0 %5477, %v270_v18  }
  0x3f   : > { %366 = vperm.xlu0 %5477, %v272_v19  }
  0x96   : > { %v287_v21 = vpop.permute.xlu1 %286  ;;  %v277_v22 = vpop.permute.xlu0 %276 }
  0x97   : > { %v5843_v23 = vmul.f32 %v5840_v20, %v287_v21  ;;  %v5846_v24 = vmul.f32 %v5840_v20, %v277_v22 }
  0x99   : > { %v600_v25 = vand.u32 2147483647, %v5843_v23  ;;  %v603_v26 = vand.u32 2139095040, %v5843_v23  ;;  %v7973_v27 = vand.u32 2147483647, %v5846_v24  ;;  %v397_v28 = vand.u32 2139095040, %v5846_v24 }
  0x9a   : > { %v292_v29 = vpop.permute.xlu1 %291  ;;  %v282_v37 = vpop.permute.xlu0 %281 }
  0x9b   : > { %v604_v30 = vshrl.u32 %v603_v26, 23  ;;  %v607_v31 = vand.u32 8388607, %v600_v25  ;;  %v5855_v32 = vmul.f32 %v5840_v20, %v292_v29  ;;  %v398_v33 = vshrl.u32 %v397_v28, 23 }
  0x9c   : > { %v401_v34 = vand.u32 8388607, %v7973_v27  ;;  %v5866_v46 = vmul.f32 %v5840_v20, %v282_v37 }
  0x9d   : > { %v5029_v35 = vadd.s32 4294967169, %v604_v30  ;;  %v703_v36 = vand.u32 2147483647, %v5855_v32  ;;  %v608_v38 = vor.u32 8388608, %v607_v31  ;;  %v5021_v39 = vadd.s32 4294967169, %v398_v33 }
  0x9e   : > { %v706_v40 = vand.u32 2139095040, %v5855_v32  ;;  %v402_v42 = vor.u32 8388608, %v401_v34  ;;  %v500_v56 = vand.u32 2139095040, %v5866_v46 }
  0x9f   : > { %v610_v41 = vadd.s32 1, %v5029_v35  ;;  %v404_v43 = vadd.s32 1, %v5021_v39  ;;  %v5863_v45 = vand.u32 8388607, %v703_v36  ;;  %v5868_v48 = vshll.u32 %v608_v38, 8 }
  0xa0   : > { %v707_v44 = vshrl.u32 %v706_v40, 23  ;;  %v5870_v52 = vshll.u32 %v402_v42, 8 }
  0xa1   : > { %vm611_vm0 = vcmp.gt.s32.totalorder %v610_v41, 0  ;;  %vm405_vm1 = vcmp.gt.s32.totalorder %v404_v43, 0  ;;  %v711_v55 = vor.u32 8388608, %v5863_v45 }
  0xa2   : > { %v612_v47 = vsel %vm611_vm0, %v610_v41, 0  ;;  %v406_v51 = vsel %vm405_vm1, %v404_v43, 0  ;;  %v5033_v54 = vadd.s32 4294967169, %v707_v44 }
  0xa3   : > { %v613_v49 = vshrl.u32 %v612_v47, 5  ;;  %v614_v50 = vand.u32 31, %v612_v47  ;;  %v5872_v53 = vand.u32 31, %v406_v51  ;;  %v5881_v4 = vshrl.u32 %v406_v51, 5 }
  0xa4   : > { %v713_v18 = vadd.s32 1, %v5033_v54 }
  0xa5   : > { %v615_v57 = vsub.s32 32, %v614_v50  ;;  %v617_v59 = vshll.u32 %v7989_v58, %v614_v50  ;;  %v620_v61 = vshll.u32 %v7979_v60, %v614_v50  ;;  %v623_v63 = vshll.u32 %v7981_v62, %v614_v50 }
  0xa6   : > { %v626_v1 = vshll.u32 %v7987_v0, %v614_v50  ;;  %v629_v3 = vshll.u32 %v7993_v2, %v614_v50  ;;  %vm632_vm2 = vcmp.lt.s32.totalorder %v613_v49, 1  ;;  %vm634_vm3 = vcmp.lt.s32.totalorder %v613_v49, 3 }
  0xa7   : > { %v616_v5 = vshrl.u32 %v7989_v58, %v615_v57  ;;  %v618_v6 = vshrl.u32 %v7979_v60, %v615_v57  ;;  %v621_v7 = vshrl.u32 %v7981_v62, %v615_v57  ;;  %v624_v8 = vshrl.u32 %v7987_v0, %v615_v57 }
  0xa8   : > { %v627_v9 = vshrl.u32 %v7993_v2, %v615_v57  ;;  %v630_v11 = vshrl.u32 %v7983_v10, %v615_v57  ;;  %vm635_vm4 = vcmp.lt.s32.totalorder %v613_v49, 4  ;;  %v409_v15 = vsub.s32 32, %v5872_v53 }
  0xa9   : > { %v619_v12 = vor.u32 %v618_v6, %v617_v59  ;;  %v622_v13 = vor.u32 %v621_v7, %v620_v61  ;;  %v625_v14 = vor.u32 %v624_v8, %v623_v63  ;;  %vm633_vm5 = vcmp.lt.s32.totalorder %v613_v49, 2 }
  0xaa   : > { %v628_v16 = vor.u32 %v627_v9, %v626_v1  ;;  %v631_v17 = vor.u32 %v630_v11, %v629_v3  ;;  %v411_v31 = vshll.u32 %v7989_v58, %v5872_v53  ;;  %v412_v35 = vshrl.u32 %v7979_v60, %v409_v15 }
  0xab   : > { %v636_v19 = vsel %vm632_vm2, %v616_v5, %v619_v12  ;;  %v637_v21 = vsel %vm635_vm4, %v625_v14, 2102212464  ;;  %v640_v22 = vsel %vm632_vm2, %v619_v12, %v622_v13  ;;  %v644_v26 = vsel %vm632_vm2, %v622_v13, %v625_v14 }
  0xac   : > { %v638_v28 = vsel %vm634_vm3, %v622_v13, %v637_v21  ;;  %v641_v29 = vsel %vm635_vm4, %v628_v16, 920167782  ;;  %v645_v30 = vsel %vm635_vm4, %v631_v17, 1326507024  ;;  %v414_v37 = vshll.u32 %v7979_v60, %v5872_v53 }
  0xad   : > { %v642_v33 = vsel %vm634_vm3, %v625_v14, %v641_v29  ;;  %v646_v34 = vsel %vm634_vm3, %v628_v16, %v645_v30  ;;  %v639_v38 = vsel %vm633_vm5, %v636_v19, %v638_v28  ;;  %v415_v41 = vshrl.u32 %v7981_v62, %v409_v15 }
  0xae   : > { %v643_v39 = vsel %vm633_vm5, %v640_v22, %v642_v33  ;;  %v647_v40 = vsel %vm633_vm5, %v644_v26, %v646_v34  ;;  %v413_v50 = vor.u32 %v412_v35, %v411_v31  ;;  %v417_v54 = vshll.u32 %v7981_v62, %v5872_v53 }
  0xaf   : > { %v5906_v42 = vmul.u32.u64.low %v5868_v48, %v647_v40  ;;  %v5907_v43 = vmul.u32.u64.high %v5868_v48, %v647_v40, %v5906_v42  ;;  %v5910_v44 = vmul.u32.u64.low %v5868_v48, %v643_v39  ;;  %v5911_v47 = vmul.u32.u64.high %v5868_v48, %v643_v39, %v5910_v44 }
  0xb0   : > { %v416_v51 = vor.u32 %v415_v41, %v414_v37  ;;  %v418_v57 = vshrl.u32 %v7987_v0, %v409_v15  ;;  %v410_v49 = vshrl.u32 %v7989_v58, %v409_v15  ;;  %v420_v59 = vshll.u32 %v7987_v0, %v5872_v53 }
  0xb1   : > { %v421_v61 = vshrl.u32 %v7993_v2, %v409_v15  ;;  %v424_v63 = vshrl.u32 %v7983_v10, %v409_v15  ;;  %v655_v1 = vmul.u32 %v5868_v48, %v639_v38  ;;  %v423_v5 = vshll.u32 %v7993_v2, %v5872_v53 }
  0xb2   : > { %v419_v3 = vor.u32 %v418_v57, %v417_v54  ;;  %vm426_vm6 = vcmp.lt.s32.totalorder %v5881_v4, 1  ;;  %vm657_vm7 = vc.u32 %v5907_v43, %v5910_v44  ;;  %v658_v6 = vadd.s32 1, %v5911_v47 }
  0xb3   : > { %v422_v7 = vor.u32 %v421_v61, %v420_v59  ;;  %vm427_vm8 = vcmp.lt.s32.totalorder %v5881_v4, 2  ;;  %v425_v8 = vor.u32 %v424_v63, %v423_v5  ;;  %vm428_vm9 = vcmp.lt.s32.totalorder %v5881_v4, 3 }
  0xb4   : > { %vm429_vm10 = vcmp.lt.s32.totalorder %v5881_v4, 4  ;;  %v434_v48 = vsel %vm426_vm6, %v413_v50, %v416_v51  ;;  %v659_v9 = vsel %vm657_vm7, %v658_v6, %v5911_v47  ;;  %v438_v12 = vsel %vm426_vm6, %v416_v51, %v419_v3 }
  0xb5   : > { %v431_v11 = vsel %vm429_vm10, %v419_v3, 2102212464  ;;  %v435_v53 = vsel %vm429_vm10, %v422_v7, 920167782  ;;  %v660_v13 = vadd.s32 %v659_v9, %v655_v1  ;;  %v430_v14 = vsel %vm426_vm6, %v410_v49, %v413_v50 }
  0xb6   : > { %v436_v15 = vsel %vm428_vm9, %v419_v3, %v435_v53  ;;  %v439_v16 = vsel %vm429_vm10, %v425_v8, 1326507024  ;;  %v432_v17 = vsel %vm428_vm9, %v416_v51, %v431_v11  ;;  %vm714_vm11 = vcmp.gt.s32.totalorder %v713_v18, 0 }
  0xb7   : > { %v437_v19 = vsel %vm427_vm8, %v434_v48, %v436_v15  ;;  %v440_v21 = vsel %vm428_vm9, %v422_v7, %v439_v16  ;;  %v661_v22 = vadd.s32 536870912, %v660_v13  ;;  %v715_v33 = vsel %vm714_vm11, %v713_v18, 0 }
  0xb8   : > { %v441_v26 = vsel %vm427_vm8, %v438_v12, %v440_v21  ;;  %v5938_v28 = vmul.u32.u64.low %v5870_v52, %v437_v19  ;;  %v5939_v29 = vmul.u32.u64.high %v5870_v52, %v437_v19, %v5938_v28  ;;  %v433_v35 = vsel %vm427_vm8, %v430_v14, %v432_v17 }
  0xb9   : > { %v5943_v30 = vmul.u32.u64.low %v5870_v52, %v441_v26  ;;  %v5944_v31 = vmul.u32.u64.high %v5870_v52, %v441_v26, %v5943_v30  ;;  %v5946_v34 = vshrl.u32 %v661_v22, 30  ;;  %v717_v37 = vand.u32 31, %v715_v33 }
  0xba   : > { %v5952_v38 = vshll.u32 %v711_v55, 8  ;;  %v501_v39 = vshrl.u32 %v500_v56, 23  ;;  %v452_v41 = vadd.s32 1, %v5939_v29  ;;  %v449_v47 = vmul.u32 %v5870_v52, %v433_v35 }
  0xbb   : > { %v663_v40 = vshll.u32 %v5946_v34, 30  ;;  %v718_v42 = vsub.s32 32, %v717_v37  ;;  %v720_v18 = vshll.u32 %v7989_v58, %v717_v37  ;;  %vm451_vm12 = vc.u32 %v5944_v31, %v5938_v28 }
  0xbc   : > { %v723_v4 = vshll.u32 %v7979_v60, %v717_v37  ;;  %v726_v45 = vshll.u32 %v7981_v62, %v717_v37  ;;  %v453_v56 = vsel %vm451_vm12, %v452_v41, %v5939_v29  ;;  %v716_v50 = vshrl.u32 %v715_v33, 5 }
  0xbd   : > { %v5964_v55 = vsub.s32 %v660_v13, %v663_v40  ;;  %v721_v51 = vshrl.u32 %v7979_v60, %v718_v42  ;;  %v454_v54 = vadd.s32 %v453_v56, %v449_v47  ;;  %v724_v57 = vshrl.u32 %v7981_v62, %v718_v42 }
  0xbe   : > { %v727_v49 = vshrl.u32 %v7987_v0, %v718_v42  ;;  %v729_v52 = vshll.u32 %v7987_v0, %v717_v37  ;;  %v730_v63 = vshrl.u32 %v7993_v2, %v718_v42  ;;  %v732_v1 = vshll.u32 %v7993_v2, %v717_v37 }
  0xbf   : > { %v666_v59 = vsub.s32 0, %v5964_v55  ;;  %v722_v61 = vor.u32 %v721_v51, %v720_v18  ;;  %v455_v3 = vadd.s32 536870912, %v454_v54  ;;  %v725_v5 = vor.u32 %v724_v57, %v723_v4 }
  0xc0   : > { %v728_v6 = vor.u32 %v727_v49, %v726_v45  ;;  %v733_v7 = vshrl.u32 %v7983_v10, %v718_v42  ;;  %v719_v48 = vshrl.u32 %v7989_v58, %v718_v42  ;;  %v731_v9 = vor.u32 %v730_v63, %v729_v52  ;;  %v302_v45 = vpop.permute.xlu1 %301 }
  0xc1   : > { %v5030_v8 = vmin.u32 %v666_v59, %v5964_v55  ;;  %v5025_v11 = vadd.s32 4294967169, %v501_v39  ;;  %v5977_v53 = vshrl.u32 %v455_v3, 30  ;;  %vm735_vm13 = vcmp.lt.s32.totalorder %v716_v50, 1 }
  0xc2   : > { %v734_v12 = vor.u32 %v733_v7, %v732_v1  ;;  %vm738_vm14 = vcmp.lt.s32.totalorder %v716_v50, 4  ;;  %vm736_vm15 = vcmp.lt.s32.totalorder %v716_v50, 2  ;;  %v743_v15 = vsel %vm735_vm13, %v722_v61, %v725_v5 }
  0xc3   : > { %v668_v13 = vclz %v5030_v8  ;;  %v740_v14 = vsel %vm738_vm14, %v728_v6, 2102212464  ;;  %v457_v16 = vshll.u32 %v5977_v53, 30  ;;  %vm737_vm0 = vcmp.lt.s32.totalorder %v716_v50, 3 }
  0xc4   : > { %v744_v17 = vsel %vm738_vm14, %v731_v9, 920167782  ;;  %v747_v19 = vsel %vm735_vm13, %v725_v5, %v728_v6  ;;  %v739_v22 = vsel %vm735_vm13, %v719_v48, %v722_v61  ;;  %v748_v29 = vsel %vm738_vm14, %v734_v12, 1326507024 }
  0xc5   : > { %v5031_v21 = vadd.s32 4294967294, %v668_v13  ;;  %v745_v26 = vsel %vm737_vm0, %v728_v6, %v744_v17  ;;  %v5980_v30 = vsub.s32 %v454_v54, %v457_v16  ;;  %v741_v33 = vsel %vm737_vm0, %v725_v5, %v740_v14 }
  0xc6   : > { %v746_v35 = vsel %vm736_vm15, %v743_v15, %v745_v26  ;;  %v749_v37 = vsel %vm737_vm0, %v731_v9, %v748_v29  ;;  %v742_v51 = vsel %vm736_vm15, %v739_v22, %v741_v33  ;;  %v7972_v54 = vand.u32 2147483647, %v5866_v46 }
  0xc7   : > { %vm5032_vm1 = vcmp.lt.s32.totalorder %v5031_v21, 0  ;;  %v750_v39 = vsel %vm736_vm15, %v747_v19, %v749_v37  ;;  %v5985_v40 = vmul.u32.u64.low %v5952_v38, %v746_v35  ;;  %v5986_v41 = vmul.u32.u64.high %v5952_v38, %v746_v35, %v5985_v40 }
  0xc8   : > { %v671_v42 = vsel %vm5032_vm1, 0, %v5031_v21  ;;  %v460_v18 = vsub.s32 0, %v5980_v30  ;;  %v5991_v47 = vmul.u32.u64.low %v5952_v38, %v750_v39  ;;  %v5992_v4 = vmul.u32.u64.high %v5952_v38, %v750_v39, %v5991_v47 }
  0xc9   : > { %v676_v56 = vsub.s32 4294967266, %v671_v42  ;;  %v507_v57 = vadd.s32 1, %v5025_v11  ;;  %v672_v52 = vsub.s32 32, %v671_v42  ;;  %v761_v59 = vadd.s32 1, %v5986_v41 }
  0xca   : > { %v5022_v49 = vmin.u32 %v460_v18, %v5980_v30  ;;  %v5999_v61 = vmul.f32 %v5840_v20, %v302_v45  ;;  %v758_v1 = vmul.u32 %v5952_v38, %v742_v51  ;;  %vm760_vm3 = vc.u32 %v5992_v4, %v5985_v40 }
  0xcb   : > { %vm508_vm2 = vcmp.gt.s32.totalorder %v507_v57, 0  ;;  %v656_v3 = vadd.s32 %v5910_v44, %v5907_v43  ;;  %v677_v5 = vadd.s32 127, %v676_v56  ;;  %v762_v6 = vsel %vm760_vm3, %v761_v59, %v5986_v41 }
  0xcc   : > { %8090 = vst [vmem:[#allocation5_spill] sm:$0xff] %v5999_v61  ;;  %v462_v63 = vclz %v5022_v49  ;;  %v509_v50 = vsel %vm508_vm2, %v507_v57, 0  ;;  %v504_v7 = vand.u32 8388607, %v7972_v54  ;;  %v763_v48 = vadd.s32 %v762_v6, %v758_v1 }
  0xcd   : > { %v511_v9 = vand.u32 31, %v509_v50  ;;  %v674_v11 = vshrl.u32 %v656_v3, %v672_v52  ;;  %v912_v12 = vand.u32 2139095040, %v5999_v61  ;;  %v673_v14 = vshll.u32 %v5964_v55, %v671_v42 }
  0xce   : > { %v5023_v8 = vadd.s32 4294967294, %v462_v63  ;;  %v764_v38 = vadd.s32 536870912, %v763_v48  ;;  %v678_v15 = vshll.u32 %v677_v5, 23  ;;  %v505_v16 = vor.u32 8388608, %v504_v7 }
  0xcf   : > { %v512_v13 = vsub.s32 32, %v511_v9  ;;  %v6013_v43 = vadd.s32 %v5938_v28, %v5944_v31  ;;  %v7976_v17 = vand.u32 2147483647, %v5999_v61  ;;  %v675_v19 = vor.u32 %v674_v11, %v673_v14 }
  0xd0   : > { %vm5024_vm4 = vcmp.lt.s32.totalorder %v5023_v8, 0  ;;  %v6015_v44 = vshrl.u32 %v764_v38, 30  ;;  %v913_v26 = vshrl.u32 %v912_v12, 23  ;;  %v514_v55 = vshll.u32 %v7989_v58, %v511_v9 }
  0xd1   : > { %v515_v21 = vshrl.u32 %v7979_v60, %v512_v13  ;;  %v518_v22 = vshrl.u32 %v7981_v62, %v512_v13  ;;  %v517_v33 = vshll.u32 %v7979_v60, %v511_v9  ;;  %v521_v28 = vshrl.u32 %v7987_v0, %v512_v13 }
  0xd2   : > { %v766_v29 = vshll.u32 %v6015_v44, 30  ;;  %v679_v31 = vor.u32 4788187, %v678_v15  ;;  %v6024_v35 = vsel %vm5024_vm4, 0, %v5023_v8  ;;  %v510_v37 = vshrl.u32 %v509_v50, 5 }
  0xd3   : > { %v520_v39 = vshll.u32 %v7981_v62, %v511_v9  ;;  %v516_v42 = vor.u32 %v515_v21, %v514_v55  ;;  %v519_v18 = vor.u32 %v518_v22, %v517_v33  ;;  %v523_v47 = vshll.u32 %v7987_v0, %v511_v9 }
  0xd4   : > { %v6027_v41 = vsub.s32 %v763_v48, %v766_v29  ;;  %v524_v56 = vshrl.u32 %v7993_v2, %v512_v13  ;;  %v526_v51 = vshll.u32 %v7993_v2, %v511_v9  ;;  %v527_v57 = vshrl.u32 %v7983_v10, %v512_v13 }
  0xd5   : > { %v522_v45 = vor.u32 %v521_v28, %v520_v39  ;;  %v682_v49 = vcvt.s32.f32 %v675_v19  ;;  %v545_v59 = vshll.u32 %v505_v16, 8  ;;  %v5041_v63 = vadd.s32 4294967169, %v913_v26 }
  0xd6   : > { %v769_v52 = vsub.s32 0, %v6027_v41  ;;  %v680_v1 = vand.u32 2147483647, %v679_v31  ;;  %v525_v50 = vor.u32 %v524_v56, %v523_v47  ;;  %v528_v3 = vor.u32 %v527_v57, %v526_v51  ;;  %v297_v51 = vpop.permute.xlu0 %296 }
  0xd7   : > { %vm529_vm5 = vcmp.lt.s32.totalorder %v510_v37, 1  ;;  %v470_v5 = vsub.s32 4294967266, %v6024_v35  ;;  %vm530_vm6 = vcmp.lt.s32.totalorder %v510_v37, 2  ;;  %vm532_vm7 = vcmp.lt.s32.totalorder %v510_v37, 4 }
  0xd8   : > { %v5034_v6 = vmin.u32 %v769_v52, %v6027_v41  ;;  %vm531_vm8 = vcmp.lt.s32.totalorder %v510_v37, 3  ;;  %v534_v7 = vsel %vm532_vm7, %v522_v45, 2102212464  ;;  %v537_v8 = vsel %vm529_vm5, %v516_v42, %v519_v18 }
  0xd9   : > { %v538_v48 = vsel %vm532_vm7, %v525_v50, 920167782  ;;  %v466_v9 = vsub.s32 32, %v6024_v35  ;;  %v513_v12 = vshrl.u32 %v7989_v58, %v512_v13  ;;  %v683_v14 = vmul.f32 %v682_v49, %v680_v1 }
  0xda   : > { %v771_v11 = vclz %v5034_v6  ;;  %v539_v38 = vsel %vm531_vm8, %v522_v45, %v538_v48  ;;  %v541_v16 = vsel %vm529_vm5, %v519_v18, %v522_v45  ;;  %v542_v19 = vsel %vm532_vm7, %v528_v3, 1326507024 }
  0xdb   : > { %v540_v15 = vsel %vm530_vm6, %v537_v8, %v539_v38  ;;  %v533_v22 = vsel %vm529_vm5, %v513_v12, %v516_v42  ;;  %v535_v26 = vsel %vm531_vm8, %v519_v18, %v534_v7  ;;  %v543_v29 = vsel %vm531_vm8, %v525_v50, %v542_v19 }
  0xdc   : > { %v5035_v21 = vadd.s32 4294967294, %v771_v11  ;;  %v471_v55 = vadd.s32 127, %v470_v5  ;;  %v544_v33 = vsel %vm530_vm6, %v541_v16, %v543_v29  ;;  %v916_v47 = vand.u32 8388607, %v7976_v17 }
  0xdd   : > { %v6043_v28 = vmul.u32.u64.low %v545_v59, %v540_v15  ;;  %v6044_v31 = vmul.u32.u64.high %v545_v59, %v540_v15, %v6043_v28  ;;  %v6047_v13 = vmul.u32.u64.low %v545_v59, %v544_v33  ;;  %v6048_v39 = vmul.u32.u64.high %v545_v59, %v544_v33, %v6047_v13 }
  0xde   : > { %vm5036_vm9 = vcmp.lt.s32.totalorder %v5035_v21, 0  ;;  %v759_v45 = vadd.s32 %v5985_v40, %v5992_v4  ;;  %v536_v18 = vsel %vm530_vm6, %v533_v22, %v535_v26  ;;  %v919_v56 = vadd.s32 1, %v5041_v63 }
  0xdf   : > { %v774_v42 = vsel %vm5036_vm9, 0, %v5035_v21  ;;  %v467_v57 = vshll.u32 %v5980_v30, %v6024_v35  ;;  %v468_v49 = vshrl.u32 %v6013_v43, %v466_v9  ;;  %v684_v50 = vxor.u32 2147483648, %v683_v14  ;;  %v312_v35 = vpop.permute.xlu1 %311 }
  0xe0   : > { %v775_v52 = vsub.s32 32, %v774_v42  ;;  %v779_v1 = vsub.s32 4294967266, %v774_v42  ;;  %v472_v3 = vshll.u32 %v471_v55, 23  ;;  %v555_v5 = vadd.s32 1, %v6044_v31 }
  0xe1   : > { %vm920_vm10 = vcmp.gt.s32.totalorder %v919_v56, 0  ;;  %v552_v6 = vmul.u32 %v545_v59, %v536_v18  ;;  %vm554_vm11 = vc.u32 %v6048_v39, %v6043_v28  ;;  %v917_v40 = vor.u32 8388608, %v916_v47 }
  0xe2   : > { %v6062_v4 = vmul.f32 %v5840_v20, %v297_v51  ;;  %v777_v37 = vshrl.u32 %v759_v45, %v775_v52  ;;  %v780_v63 = vadd.s32 127, %v779_v1  ;;  %v556_v30 = vsel %vm554_vm11, %v555_v5, %v6044_v31 }
  0xe3   : > { %v921_v43 = vsel %vm920_vm10, %v919_v56, 0  ;;  %vm8056_vm12 = vcmp.lt.s32.totalorder %v5843_v23, 0  ;;  %v557_v7 = vadd.s32 %v556_v30, %v552_v6  ;;  %v6070_v59 = vor.u32 %v468_v49, %v467_v57 }
  0xe4   : > { %8091 = vst [vmem:[#allocation6_spill] sm:$0xff] %v6062_v4  ;;  %v6068_v8 = vsel %vm8056_vm12, %v684_v50, %v683_v14  ;;  %v776_v48 = vshll.u32 %v6027_v41, %v774_v42  ;;  %v923_v9 = vand.u32 31, %v921_v43  ;;  %v6073_v11 = vor.u32 4788187, %v472_v3 }
  0xe5   : > { %v558_v12 = vadd.s32 536870912, %v557_v7  ;;  %v6075_v38 = vshll.u32 %v917_v40, 8  ;;  %v6078_v15 = vmul.f32 %v5840_v20, %v312_v35  ;;  %v781_v19 = vshll.u32 %v780_v63, 23 }
  0xe6   : > { %v778_v16 = vor.u32 %v777_v37, %v776_v48  ;;  %v924_v21 = vsub.s32 32, %v923_v9  ;;  %v7975_v22 = vand.u32 2147483647, %v6062_v4  ;;  %v922_v26 = vshrl.u32 %v921_v43, 5 }
  0xe7   : > { %8092 = vst [vmem:[#allocation7_spill] sm:$0xff] %v6078_v15  ;;  %v6081_v14 = vshrl.u32 %v558_v12, 30  ;;  %v926_v29 = vshll.u32 %v7989_v58, %v923_v9  ;;  %v929_v41 = vshll.u32 %v7979_v60, %v923_v9  ;;  %v932_v31 = vshll.u32 %v7981_v62, %v923_v9 }
  0xe8   : > { %v927_v55 = vshrl.u32 %v7979_v60, %v924_v21  ;;  %v930_v33 = vshrl.u32 %v7981_v62, %v924_v21  ;;  %v933_v13 = vshrl.u32 %v7987_v0, %v924_v21  ;;  %v935_v45 = vshll.u32 %v7987_v0, %v923_v9 }
  0xe9   : > { %v560_v47 = vshll.u32 %v6081_v14, 30  ;;  %v936_v42 = vshrl.u32 %v7993_v2, %v924_v21  ;;  %v939_v18 = vshrl.u32 %v7983_v10, %v924_v21  ;;  %v938_v49 = vshll.u32 %v7993_v2, %v923_v9 }
  0xea   : > { %v928_v56 = vor.u32 %v927_v55, %v926_v29  ;;  %v931_v51 = vor.u32 %v930_v33, %v929_v41  ;;  %v934_v57 = vor.u32 %v933_v13, %v932_v31  ;;  %v782_v52 = vor.u32 4788187, %v781_v19 }
  0xeb   : > { %v6094_v1 = vsub.s32 %v557_v7, %v560_v47  ;;  %v937_v50 = vor.u32 %v936_v42, %v935_v45  ;;  %vm941_vm13 = vcmp.lt.s32.totalorder %v922_v26, 1  ;;  %v940_v3 = vor.u32 %v939_v18, %v938_v49 }
  0xec   : > { %vm944_vm14 = vcmp.lt.s32.totalorder %v922_v26, 4  ;;  %v949_v5 = vsel %vm941_vm13, %v928_v56, %v931_v51  ;;  %v809_v6 = vand.u32 2139095040, %v6062_v4  ;;  %v785_v40 = vcvt.s32.f32 %v778_v16 }
  0xed   : > { %v563_v37 = vsub.s32 0, %v6094_v1  ;;  %vm943_vm15 = vcmp.lt.s32.totalorder %v922_v26, 3  ;;  %v950_v63 = vsel %vm944_vm14, %v937_v50, 920167782  ;;  %v925_v30 = vshrl.u32 %v7989_v58, %v924_v21 }
  0xee   : > { %vm942_vm0 = vcmp.lt.s32.totalorder %v922_v26, 2  ;;  %v946_v43 = vsel %vm944_vm14, %v934_v57, 2102212464  ;;  %v951_v35 = vsel %vm943_vm15, %v934_v57, %v950_v63  ;;  %v783_v7 = vand.u32 2147483647, %v782_v52 }
  0xef   : > { %v5026_v48 = vmin.u32 %v563_v37, %v6094_v1  ;;  %v952_v9 = vsel %vm942_vm0, %v949_v5, %v951_v35  ;;  %v953_v12 = vsel %vm941_vm13, %v931_v51, %v934_v57  ;;  %v945_v16 = vsel %vm941_vm13, %v925_v30, %v928_v56 }
  0xf0   : > { %v954_v19 = vsel %vm944_vm14, %v940_v3, 1326507024  ;;  %v6108_v29 = vmul.u32.u64.low %v6075_v38, %v952_v9  ;;  %v6109_v41 = vmul.u32.u64.high %v6075_v38, %v952_v9, %v6108_v29  ;;  %v947_v55 = vsel %vm943_vm15, %v931_v51, %v946_v43 }
  0xf1   : > { %v565_v21 = vclz %v5026_v48  ;;  %v955_v33 = vsel %vm943_vm15, %v937_v50, %v954_v19  ;;  %v810_v31 = vshrl.u32 %v809_v6, 23  ;;  %vm6114_vm1 = vcmp.le.f32.partialorder %v600_v25, 0.7853982 }
  0xf2   : > { %v474_v47 = vand.u32 2147483647, %v6073_v11  ;;  %v956_v45 = vsel %vm942_vm0, %v953_v12, %v955_v33  ;;  %v813_v42 = vand.u32 8388607, %v7975_v22  ;;  %v786_v18 = vmul.f32 %v785_v40, %v783_v7 }
  0xf3   : > { %v6123_v56 = vmul.u32.u64.low %v6075_v38, %v956_v45  ;;  %v6124_v57 = vmul.u32.u64.high %v6075_v38, %v956_v45, %v6123_v56  ;;  %v5037_v51 = vadd.s32 4294967169, %v810_v31  ;;  %v688_v25 = vsel %vm6114_vm1, %v5843_v23, %v6068_v8 }
  0xf4   : > { %v476_v49 = vcvt.s32.f32 %v6070_v59  ;;  %v948_v11 = vsel %vm942_vm0, %v945_v16, %v947_v55  ;;  %v5027_v52 = vadd.s32 4294967294, %v565_v21  ;;  %v967_v50 = vadd.s32 1, %v6109_v41 }
  0xf5   : > { %v816_v3 = vadd.s32 1, %v5037_v51  ;;  %v1118_v5 = vand.u32 2139095040, %v6078_v15  ;;  %5503 = vcosq.f32 %v688_v25  ;;  %v787_v40 = vxor.u32 2147483648, %v786_v18 }
  0xf6   : > { %v6134_v6 = vmul.f32 %v476_v49, %v474_v47  ;;  %v814_v37 = vor.u32 8388608, %v813_v42  ;;  %v964_v63 = vmul.u32 %v6075_v38, %v948_v11  ;;  %vm966_vm2 = vc.u32 %v6124_v57, %v6108_v29 }
  0xf7   : > { %vm817_vm3 = vcmp.gt.s32.totalorder %v816_v3, 0  ;;  %v7974_v8 = vand.u32 2147483647, %v6078_v15  ;;  %vm5028_vm4 = vcmp.lt.s32.totalorder %v5027_v52, 0  ;;  %v968_v59 = vsel %vm966_vm2, %v967_v50, %v6109_v41 }
  0xf8   : > { %v818_v26 = vsel %vm817_vm3, %v816_v3, 0  ;;  %v1119_v30 = vshrl.u32 %v1118_v5, 23  ;;  %5505 = vsinq.f32 %v688_v25  ;;  %vm8039_vm5 = vcmp.lt.s32.totalorder %v5855_v32, 0 }
  0xf9   : > { %v969_v43 = vadd.s32 %v968_v59, %v964_v63  ;;  %v820_v35 = vand.u32 31, %v818_v26  ;;  %v478_v7 = vxor.u32 2147483648, %v6134_v6  ;;  %v788_v38 = vsel %vm8039_vm5, %v787_v40, %v786_v18 }
  0xfa   : > { %v6147_v48 = vadd.s32 %v6043_v28, %v6048_v39  ;;  %v6149_v9 = vshll.u32 %v814_v37, 8  ;;  %v6151_v12 = vsel %vm5028_vm4, 0, %v5027_v52  ;;  %v6155_v41 = vand.u32 8388607, %v7974_v8 }
  0xfb   : > { %v970_v16 = vadd.s32 536870912, %v969_v43  ;;  %v821_v19 = vsub.s32 32, %v820_v35  ;;  %v819_v21 = vshrl.u32 %v818_v26, 5  ;;  %v823_v55 = vshll.u32 %v7989_v58, %v820_v35 }
  0xfc   : > { %v826_v33 = vshll.u32 %v7979_v60, %v820_v35  ;;  %v5049_v31 = vadd.s32 4294967169, %v1119_v30  ;;  %v829_v45 = vshll.u32 %v7981_v62, %v820_v35  ;;  %v832_v18 = vshll.u32 %v7987_v0, %v820_v35 }
  0xfd   : > { %v6159_v47 = vshrl.u32 %v970_v16, 30  ;;  %v824_v28 = vshrl.u32 %v7979_v60, %v821_v19  ;;  %v827_v39 = vshrl.u32 %v7981_v62, %v821_v19  ;;  %v830_v42 = vshrl.u32 %v7987_v0, %v821_v19 }
  0xfe   : > { %v833_v56 = vshrl.u32 %v7993_v2, %v821_v19  ;;  %v835_v51 = vshll.u32 %v7993_v2, %v820_v35  ;;  %vm6170_vm6 = vcmp.le.f32.partialorder %v703_v36, 0.7853982  ;;  %v836_v50 = vshrl.u32 %v7983_v10, %v821_v19 }
  0xff   : > { %8095 = vst [vmem:[#allocation8_spill] sm:$0xff] %v6159_v47  ;;  %v972_v49 = vshll.u32 %v6159_v47, 30  ;;  %v825_v11 = vor.u32 %v824_v28, %v823_v55  ;;  %v828_v52 = vor.u32 %v827_v39, %v826_v33  ;;  %v569_v3 = vsub.s32 32, %v6151_v12 }
 0x100   : > { %v831_v5 = vor.u32 %v830_v42, %v829_v45  ;;  %v834_v40 = vor.u32 %v833_v56, %v832_v18  ;;  %v1123_v37 = vor.u32 8388608, %v6155_v41  ;;  %v837_v59 = vor.u32 %v836_v50, %v835_v51  ;;  %v307_v18 = vpop.permute.xlu0 %306 }
 0x101   : > { %v6178_v63 = vsub.s32 %v969_v43, %v972_v49  ;;  %vm838_vm7 = vcmp.lt.s32.totalorder %v819_v21, 1  ;;  %v1125_v36 = vadd.s32 1, %v5049_v31  ;;  %v822_v26 = vshrl.u32 %v7989_v58, %v821_v19 }
 0x102   : > { %vm840_vm8 = vcmp.lt.s32.totalorder %v819_v21, 3  ;;  %vm841_vm9 = vcmp.lt.s32.totalorder %v819_v21, 4  ;;  %v846_v30 = vsel %vm838_vm7, %v825_v11, %v828_v52  ;;  %v6181_v35 = vpop.eup %5503  ;;  %v850_v28 = vsel %vm838_vm7, %v828_v52, %v831_v5 }
 0x103   : > { %v975_v16 = vsub.s32 0, %v6178_v63  ;;  %v843_v55 = vsel %vm841_vm9, %v831_v5, 2102212464  ;;  %v847_v33 = vsel %vm841_vm9, %v834_v40, 920167782  ;;  %vm839_vm10 = vcmp.lt.s32.totalorder %v819_v21, 2 }
 0x104   : > { %v842_v39 = vsel %vm838_vm7, %v822_v26, %v825_v11  ;;  %v848_v41 = vsel %vm840_vm8, %v831_v5, %v847_v33  ;;  %v851_v43 = vsel %vm841_vm9, %v837_v59, 1326507024  ;;  %v844_v42 = vsel %vm840_vm8, %v828_v52, %v843_v55  ;;  %v322_v11 = vpop.permute.xlu1 %321 }
 0x105   : > { %v5042_v45 = vmin.u32 %v975_v16, %v6178_v63  ;;  %v849_v31 = vsel %vm839_vm10, %v846_v30, %v848_v41  ;;  %v852_v19 = vsel %vm840_vm8, %v834_v40, %v851_v43  ;;  %v6186_v56 = vpop.eup %5505  ;;  %v573_v51 = vsub.s32 4294967266, %v6151_v12 }
 0x106   : > { %v853_v49 = vsel %vm839_vm10, %v850_v28, %v852_v19  ;;  %v6191_v50 = vmul.u32.u64.low %v6149_v9, %v849_v31  ;;  %v6192_v54 = vmul.u32.u64.high %v6149_v9, %v849_v31, %v6191_v50  ;;  %vm1126_vm11 = vcmp.gt.s32.totalorder %v1125_v36, 0 }
 0x107   : > { %v977_v5 = vclz %v5042_v45  ;;  %v6196_v59 = vmul.u32.u64.low %v6149_v9, %v853_v49  ;;  %v6197_v52 = vmul.u32.u64.high %v6149_v9, %v853_v49, %v6196_v59  ;;  %v6202_v40 = vsel %vm6170_vm6, %v5855_v32, %v788_v38 }
 0x108   : > { %v845_v26 = vsel %vm839_vm10, %v842_v39, %v844_v42  ;;  %v1127_v30 = vsel %vm1126_vm11, %v1125_v36, 0  ;;  %v6206_v16 = vmul.f32 %v5840_v20, %v307_v18  ;;  %v965_v55 = vadd.s32 %v6108_v29, %v6124_v57 }
 0x109   : > { %v5043_v33 = vadd.s32 4294967294, %v977_v5  ;;  %v1129_v28 = vand.u32 31, %v1127_v30  ;;  %v6211_v41 = vmul.f32 %v5840_v20, %v322_v11  ;;  %v6214_v43 = vshrl.u32 %v6147_v48, %v569_v3 }
 0x10a   : > { %8098 = vst [vmem:[#allocation9_spill] sm:$0xff] %v6206_v16  ;;  %v6216_v45 = vadd.s32 127, %v573_v51  ;;  %v864_v38 = vadd.s32 1, %v6192_v54  ;;  %v6219_v21 = vshll.u32 %v1123_v37, 8  ;;  %v861_v36 = vmul.u32 %v6149_v9, %v845_v26 }
 0x10b   : > { %8099 = vst [vmem:[#allocation10_spill] sm:$0xff] %v6211_v41  ;;  %vm5044_vm13 = vcmp.lt.s32.totalorder %v5043_v33, 0  ;;  %vm863_vm14 = vc.u32 %v6197_v52, %v6191_v50  ;;  %v1130_v29 = vsub.s32 32, %v1129_v28  ;;  %v7977_v39 = vand.u32 2147483647, %v6206_v16 }
 0x10c   : > { %v980_v57 = vsel %vm5044_vm13, 0, %v5043_v33  ;;  %v865_v20 = vsel %vm863_vm14, %v864_v38, %v6192_v54  ;;  %v1015_v48 = vand.u32 2139095040, %v6206_v16  ;;  %v1128_v19 = vshrl.u32 %v1127_v30, 5 }
 0x10d   : > { %v981_v3 = vsub.s32 32, %v980_v57  ;;  %v985_v42 = vsub.s32 4294967266, %v980_v57  ;;  %v866_v31 = vadd.s32 %v865_v20, %v861_v36  ;;  %v1132_v37 = vshll.u32 %v7989_v58, %v1129_v28 }
 0x10e   : > { %v1133_v18 = vshrl.u32 %v7979_v60, %v1130_v29  ;;  %v1135_v9 = vshll.u32 %v7979_v60, %v1129_v28  ;;  %v1136_v51 = vshrl.u32 %v7981_v62, %v1130_v29  ;;  %v1139_v54 = vshrl.u32 %v7987_v0, %v1130_v29 }
 0x10f   : > { %v983_v49 = vshrl.u32 %v965_v55, %v981_v3  ;;  %v986_v11 = vadd.s32 127, %v985_v42  ;;  %v867_v5 = vadd.s32 536870912, %v866_v31  ;;  %v982_v59 = vshll.u32 %v6178_v63, %v980_v57 }
 0x110   : > { %v1138_v26 = vshll.u32 %v7981_v62, %v1129_v28  ;;  %v1141_v33 = vshll.u32 %v7987_v0, %v1129_v28  ;;  %v1142_v30 = vshrl.u32 %v7993_v2, %v1130_v29  ;;  %v1134_v20 = vor.u32 %v1133_v18, %v1132_v37 }
 0x111   : > { %v987_v38 = vshll.u32 %v986_v11, 23  ;;  %v6236_v36 = vshrl.u32 %v867_v5, 30  ;;  %v1137_v27 = vor.u32 %v1136_v51, %v1135_v9  ;;  %vm8058_vm15 = vcmp.lt.s32.totalorder %v5846_v24, 0 }
 0x112   : > { %v1140_v55 = vor.u32 %v1139_v54, %v1138_v26  ;;  %v1143_v3 = vor.u32 %v1142_v30, %v1141_v33  ;;  %v1144_v42 = vshll.u32 %v7993_v2, %v1129_v28  ;;  %v1145_v8 = vshrl.u32 %v7983_v10, %v1130_v29 }
 0x113   : > { %8100 = vst [vmem:[#allocation11_spill] sm:$0xff] %v6236_v36  ;;  %v984_v63 = vor.u32 %v983_v49, %v982_v59  ;;  %v869_v57 = vshll.u32 %v6236_v36, 30  ;;  %v1016_v22 = vshrl.u32 %v1015_v48, 23  ;;  %v1019_v17 = vand.u32 8388607, %v7977_v39 }
 0x114   : > { %v988_v11 = vor.u32 4788187, %v987_v38  ;;  %v1131_v5 = vshrl.u32 %v7989_v58, %v1130_v29  ;;  %v1146_v37 = vor.u32 %v1145_v8, %v1144_v42  ;;  %vm1147_vm0 = vcmp.lt.s32.totalorder %v1128_v19, 1 }
 0x115   : > { %v6245_v18 = vsub.s32 %v866_v31, %v869_v57  ;;  %vm1149_vm2 = vcmp.lt.s32.totalorder %v1128_v19, 3  ;;  %vm1150_vm3 = vcmp.lt.s32.totalorder %v1128_v19, 4  ;;  %v1155_v28 = vsel %vm1147_vm0, %v1134_v20, %v1137_v27 }
 0x116   : > { %v1152_v9 = vsel %vm1150_vm3, %v1140_v55, 2102212464  ;;  %v1156_v51 = vsel %vm1150_vm3, %v1143_v3, 920167782  ;;  %v1159_v49 = vsel %vm1147_vm0, %v1137_v27, %v1140_v55  ;;  %v1160_v54 = vsel %vm1150_vm3, %v1146_v37, 1326507024 }
 0x117   : > { %v991_v48 = vcvt.s32.f32 %v984_v63  ;;  %v872_v59 = vsub.s32 0, %v6245_v18  ;;  %vm1148_vm4 = vcmp.lt.s32.totalorder %v1128_v19, 2  ;;  %v1157_v26 = vsel %vm1149_vm2, %v1140_v55, %v1156_v51  ;;  %v317_v63 = vpop.permute.xlu0 %316 }
 0x118   : > { %v989_v29 = vand.u32 2147483647, %v988_v11  ;;  %v1158_v8 = vsel %vm1148_vm4, %v1155_v28, %v1157_v26  ;;  %v1161_v31 = vsel %vm1149_vm2, %v1143_v3, %v1160_v54  ;;  %v5045_v33 = vadd.s32 4294967169, %v1016_v22 }
 0x119   : > { %v5038_v30 = vmin.u32 %v872_v59, %v6245_v18  ;;  %v1151_v38 = vsel %vm1147_vm0, %v1131_v5, %v1134_v20  ;;  %v1153_v42 = vsel %vm1149_vm2, %v1137_v27, %v1152_v9  ;;  %v1162_v57 = vsel %vm1148_vm4, %v1159_v49, %v1161_v31  ;;  %v6282_v9 = vld [vmem:[%s7966_s1] ss:$0 sm:$0xff] }
 0x11a   : > { %v6258_v37 = vmul.u32.u64.low %v6219_v21, %v1162_v57  ;;  %v6259_v39 = vmul.u32.u64.high %v6219_v21, %v1162_v57, %v6258_v37  ;;  %v6262_v55 = vmul.u32.u64.low %v6219_v21, %v1158_v8  ;;  %v6263_v11 = vmul.u32.u64.high %v6219_v21, %v1158_v8, %v6262_v55 }
 0x11b   : > { %v6271_v22 = vsel %vm8058_vm15, %v478_v7, %v6134_v6  ;;  %v570_v27 = vshll.u32 %v6094_v1, %v6151_v12  ;;  %v874_v20 = vclz %v5038_v30  ;;  %v1022_v3 = vadd.s32 1, %v5045_v33 }
 0x11c   : > { %5507 = vcosq.f32 %v6202_v40  ;;  %v6276_v5 = vmul.f32 %v991_v48, %v989_v29  ;;  %v1154_v28 = vsel %vm1148_vm4, %v1151_v38, %v1153_v42  ;;  %v6285_v51 = vmul.f32 %v6282_v9, %v317_v63 }
 0x11d   : > { %v6288_v6 = vor.u32 %v6214_v43, %v570_v27  ;;  %v5039_v1 = vadd.s32 4294967294, %v874_v20  ;;  %v1020_v7 = vor.u32 8388608, %v1019_v17  ;;  %vm1023_vm7 = vcmp.gt.s32.totalorder %v1022_v3, 0 }
 0x11e   : > { %8101 = vst [vmem:[#allocation12_spill] sm:$0xff] %v6285_v51  ;;  %vm1172_vm8 = vc.u32 %v6259_v39, %v6262_v55  ;;  %v1173_v19 = vadd.s32 1, %v6263_v11  ;;  %v7978_v49 = vand.u32 2147483647, %v6211_v41  ;;  %v862_v54 = vadd.s32 %v6191_v50, %v6197_v52 }
 0x11f   : > { %vm5040_vm9 = vcmp.lt.s32.totalorder %v5039_v1, 0  ;;  %v1170_v48 = vmul.u32 %v6219_v21, %v1154_v28  ;;  %v1024_v43 = vsel %vm1023_vm7, %v1022_v3, 0  ;;  %v6300_v33 = vshll.u32 %v1020_v7, 8 }
 0x120   : > { %v877_v17 = vsel %vm5040_vm9, 0, %v5039_v1  ;;  %v1174_v26 = vsel %vm1172_vm8, %v1173_v19, %v6263_v11  ;;  %v1026_v29 = vand.u32 31, %v1024_v43  ;;  %v1324_v30 = vand.u32 2139095040, %v6211_v41 }
 0x121   : > { %v882_v8 = vsub.s32 4294967266, %v877_v17  ;;  %v1175_v31 = vadd.s32 %v1174_v26, %v1170_v48  ;;  %v878_v38 = vsub.s32 32, %v877_v17  ;;  %v1025_v42 = vshrl.u32 %v1024_v43, 5 }
 0x122   : > { %v1027_v57 = vsub.s32 32, %v1026_v29  ;;  %v6305_v50 = vand.u32 8388607, %v7978_v49  ;;  %v1029_v63 = vshll.u32 %v7989_v58, %v1026_v29  ;;  %v1032_v37 = vshll.u32 %v7979_v60, %v1026_v29 }
 0x123   : > { %v883_v52 = vadd.s32 127, %v882_v8  ;;  %v1176_v21 = vadd.s32 536870912, %v1175_v31  ;;  %v1035_v20 = vshll.u32 %v7981_v62, %v1026_v29  ;;  %v1038_v7 = vshll.u32 %v7987_v0, %v1026_v29 }
 0x124   : > { %v1030_v11 = vshrl.u32 %v7979_v60, %v1027_v57  ;;  %v1033_v27 = vshrl.u32 %v7981_v62, %v1027_v57  ;;  %v1036_v3 = vshrl.u32 %v7987_v0, %v1027_v57  ;;  %v1039_v19 = vshrl.u32 %v7993_v2, %v1027_v57 }
 0x125   : > { %v884_v28 = vshll.u32 %v883_v52, 23  ;;  %v6313_v1 = vshrl.u32 %v1176_v21, 30  ;;  %v1325_v8 = vshrl.u32 %v1324_v30, 23  ;;  %v879_v49 = vshll.u32 %v6245_v18, %v877_v17 }
 0x126   : > { %v1031_v48 = vor.u32 %v1030_v11, %v1029_v63  ;;  %v1034_v43 = vor.u32 %v1033_v27, %v1032_v37  ;;  %v1037_v26 = vor.u32 %v1036_v3, %v1035_v20  ;;  %v880_v60 = vshrl.u32 %v862_v54, %v878_v38 }
 0x127   : > { %8102 = vst [vmem:[#allocation13_spill] sm:$0xff] %v6313_v1  ;;  %v1178_v59 = vshll.u32 %v6313_v1, 30  ;;  %v1040_v12 = vor.u32 %v1039_v19, %v1038_v7  ;;  %v885_v62 = vor.u32 4788187, %v884_v28  ;;  %v1028_v10 = vshrl.u32 %v7989_v58, %v1027_v57 }
 0x128   : > { %v1041_v52 = vshll.u32 %v7993_v2, %v1026_v29  ;;  %v8103_v21 = vmov 1326507024   ;;  %vm8028_vm10 = vcmp.lt.s32.totalorder %v5999_v61, 0  ;;  %vm1044_vm11 = vcmp.lt.s32.totalorder %v1025_v42, 1 }
 0x129   : > { %v1042_v47 = vshrl.u32 %v8103_v21, %v1027_v57  ;;  %v6322_v0 = vpop.eup %5507  ;;  %v6325_v63 = vsub.s32 %v1175_v31, %v1178_v59  ;;  %vm1046_vm13 = vcmp.lt.s32.totalorder %v1025_v42, 3  ;;  %vm1047_vm14 = vcmp.lt.s32.totalorder %v1025_v42, 4 }
 0x12a   : > { %v1049_v54 = vsel %vm1047_vm14, %v1037_v26, 2102212464  ;;  %v1052_v17 = vsel %vm1044_vm11, %v1031_v48, %v1034_v43  ;;  %v1053_v30 = vsel %vm1047_vm14, %v1040_v12, 920167782  ;;  %v881_v38 = vor.u32 %v880_v60, %v879_v49 }
 0x12b   : > { %v1043_v18 = vor.u32 %v1042_v47, %v1041_v52  ;;  %v1181_v37 = vsub.s32 0, %v6325_v63  ;;  %vm1045_vm0 = vcmp.lt.s32.totalorder %v1025_v42, 2  ;;  %v1054_v29 = vsel %vm1046_vm13, %v1037_v26, %v1053_v30 }
 0x12c   : > { %v886_v57 = vand.u32 2147483647, %v885_v62  ;;  %v1055_v11 = vsel %vm1045_vm0, %v1052_v17, %v1054_v29  ;;  %v1056_v59 = vsel %vm1044_vm11, %v1034_v43, %v1037_v26  ;;  %v1048_v47 = vsel %vm1044_vm11, %v1028_v10, %v1031_v48 }
 0x12d   : > { %v1057_v31 = vsel %vm1047_vm14, %v1043_v18, 1326507024  ;;  %v5050_v27 = vmin.u32 %v1181_v37, %v6325_v63  ;;  %v1050_v20 = vsel %vm1046_vm13, %v1034_v43, %v1049_v54  ;;  %v5057_v62 = vadd.s32 4294967169, %v1325_v8 }
 0x12e   : > { %v1058_v3 = vsel %vm1046_vm13, %v1040_v12, %v1057_v31  ;;  %v6338_v49 = vmul.u32.u64.low %v6300_v33, %v1055_v11  ;;  %v6339_v28 = vmul.u32.u64.high %v6300_v33, %v1055_v11, %v6338_v49  ;;  %v888_v7 = vcvt.s32.f32 %v881_v38 }
 0x12f   : > { %v1059_v60 = vsel %vm1045_vm0, %v1056_v59, %v1058_v3  ;;  %v1183_v19 = vclz %v5050_v27  ;;  %5509 = vsinq.f32 %v6202_v40  ;;  %v8104_v10 = vshll.u32 %v6216_v45, 23 }
 0x130   : > { %v6343_v26 = vmul.u32.u64.low %v6300_v33, %v1059_v60  ;;  %v6344_v52 = vmul.u32.u64.high %v6300_v33, %v1059_v60, %v6343_v26  ;;  %v1051_v12 = vsel %vm1045_vm0, %v1048_v47, %v1050_v20  ;;  %v1331_v43 = vadd.s32 1, %v5057_v62 }
 0x131   : > { %v6349_v48 = vor.u32 4788187, %v8104_v10  ;;  %v6353_v54 = vmul.f32 %v888_v7, %v886_v57  ;;  %v5051_v8 = vadd.s32 4294967294, %v1183_v19  ;;  %v1329_v17 = vor.u32 8388608, %v6305_v50  ;;  %v332_v19 = vpop.permute.xlu1 %331 }
 0x132   : > { %v8105_v30 = vxor.u32 2147483648, %v6276_v5  ;;  %v1070_v45 = vadd.s32 1, %v6339_v28  ;;  %vm1332_vm2 = vcmp.gt.s32.totalorder %v1331_v43, 0  ;;  %v1067_v38 = vmul.u32 %v6300_v33, %v1051_v12 }
 0x133   : > { %vm5052_vm3 = vcmp.lt.s32.totalorder %v5051_v8, 0  ;;  %vm1069_vm4 = vc.u32 %v6344_v52, %v6338_v49  ;;  %v1333_v37 = vsel %vm1332_vm2, %v1331_v43, 0  ;;  %v1171_v50 = vadd.s32 %v6262_v55, %v6259_v39 }
 0x134   : > { %v6361_v40 = vsel %vm8028_vm10, %v8105_v30, %v6276_v5  ;;  %v1186_v29 = vsel %vm5052_vm3, 0, %v5051_v8  ;;  %v1071_v57 = vsel %vm1069_vm4, %v1070_v45, %v6339_v28  ;;  %v1335_v5 = vand.u32 31, %v1333_v37 }
 0x135   : > { %v1191_v59 = vsub.s32 4294967266, %v1186_v29  ;;  %v1072_v31 = vadd.s32 %v1071_v57, %v1067_v38  ;;  %v6372_v27 = vshll.u32 %v1329_v17, 8  ;;  %v1187_v47 = vsub.s32 32, %v1186_v29 }
 0x136   : > { %v1334_v20 = vshrl.u32 %v1333_v37, 5  ;;  %v1336_v33 = vsub.s32 32, %v1335_v5  ;;  %v1221_v3 = vand.u32 2139095040, %v6285_v51  ;;  %v1338_v7 = vshll.u32 %v7989_v58, %v1335_v5 }
 0x137   : > { %v1192_v60 = vadd.s32 127, %v1191_v59  ;;  %v1073_v62 = vadd.s32 536870912, %v1072_v31  ;;  %v8106_v39 = vmov 2475754826   ;;  %v8107_v26 = vmov 2131351028  }
 0x138   : > { %v1341_v55 = vshll.u32 %v8106_v39, %v1335_v5  ;;  %v1339_v28 = vshrl.u32 %v8106_v39, %v1336_v33  ;;  %v1342_v10 = vshrl.u32 %v8107_v26, %v1336_v33  ;;  %v1344_v12 = vshll.u32 %v8107_v26, %v1335_v5 }
 0x139   : > { %v8108_v43 = vmov 2102212464   ;;  %v1193_v17 = vshll.u32 %v1192_v60, 23  ;;  %v6381_v30 = vshrl.u32 %v1073_v62, 30  ;;  %v1348_v38 = vshrl.u32 %v7993_v2, %v1336_v33 }
 0x13a   : > { %v1345_v8 = vshrl.u32 %v8108_v43, %v1336_v33  ;;  %v1347_v45 = vshll.u32 %v8108_v43, %v1335_v5  ;;  %v1340_v37 = vor.u32 %v1339_v28, %v1338_v7  ;;  %v1343_v57 = vor.u32 %v1342_v10, %v1341_v55 }
 0x13b   : > { %8109 = vst [vmem:[#allocation14_spill] sm:$0xff] %v6381_v30  ;;  %v6386_v18 = vmul.f32 %v6282_v9, %v332_v19  ;;  %v1188_v11 = vshll.u32 %v6325_v63, %v1186_v29  ;;  %v1189_v42 = vshrl.u32 %v1171_v50, %v1187_v47  ;;  %v1075_v58 = vshll.u32 %v6381_v30, 30 }
 0x13c   : > { %v1346_v59 = vor.u32 %v1345_v8, %v1344_v12  ;;  %v1349_v1 = vor.u32 %v1348_v38, %v1347_v45  ;;  %v8111_v60 = vand.u32 2147483647, %v5999_v61  ;;  %v8112_v62 = vmov 0  ;;  %v6400_v63 = vpop.eup %5509 }
 0x13d   : > { %8110 = vst [vmem:[#allocation15_spill] sm:$0xff] %v6386_v18  ;;  %vm8038_vm8 = vcmp.lt.s32.totalorder %v6062_v4, 0  ;;  %v1194_v7 = vor.u32 4788187, %v1193_v17  ;;  %v8115_v55 = vmov 683565275   ;;  %v1350_v19 = vshll.u32 %v7993_v2, %v1335_v5 }
 0x13e   : > { %vm6392_vm7 = vcmp.le.f32.partialorder %v8111_v60, 0.7853982  ;;  %v1337_v28 = vshrl.u32 %v8115_v55, %v1336_v33  ;;  %v1351_v10 = vshrl.u32 %v8103_v21, %v1336_v33  ;;  %v6402_v50 = vsub.s32 %v1072_v31, %v1075_v58 }
 0x13f   : > { %v8113_v62 = vsel %vm6392_vm7, 4294967295, %v8112_v62  ;;  %vm1353_vm9 = vcmp.lt.s32.totalorder %v1334_v20, 1  ;;  %vm1355_vm11 = vcmp.lt.s32.totalorder %v1334_v20, 3  ;;  %vm1356_vm13 = vcmp.lt.s32.totalorder %v1334_v20, 4 }
 0x140   : > { %8114 = vst [vmem:[#allocation16_spill] sm:$0xff] %v8113_v62  ;;  %v1352_v29 = vor.u32 %v1351_v10, %v1350_v19  ;;  %v1358_v47 = vsel %vm1356_vm13, %v1346_v59, 2102212464  ;;  %v1361_v12 = vsel %vm1353_vm9, %v1340_v37, %v1343_v57  ;;  %v1362_v8 = vsel %vm1356_vm13, %v1349_v1, 920167782 }
 0x141   : > { %v1190_v45 = vor.u32 %v1189_v42, %v1188_v11  ;;  %v1078_v17 = vsub.s32 0, %v6402_v50  ;;  %vm1354_vm14 = vcmp.lt.s32.totalorder %v1334_v20, 2  ;;  %v1363_v5 = vsel %vm1355_vm11, %v1346_v59, %v1362_v8 }
 0x142   : > { %v1195_v38 = vand.u32 2147483647, %v1194_v7  ;;  %v1364_v33 = vsel %vm1354_vm14, %v1361_v12, %v1363_v5  ;;  %v1365_v58 = vsel %vm1353_vm9, %v1343_v57, %v1346_v59  ;;  %v1366_v31 = vsel %vm1356_vm13, %v1352_v29, 1326507024 }
 0x143   : > { %v5046_v60 = vmin.u32 %v1078_v17, %v6402_v50  ;;  %v1357_v19 = vsel %vm1353_vm9, %v1337_v28, %v1340_v37  ;;  %v1359_v10 = vsel %vm1355_vm11, %v1343_v57, %v1358_v47  ;;  %v1367_v2 = vsel %vm1355_vm11, %v1349_v1, %v1366_v31 }
 0x144   : > { %v1368_v42 = vsel %vm1354_vm14, %v1365_v58, %v1367_v2  ;;  %v6415_v11 = vmul.u32.u64.low %v6372_v27, %v1364_v33  ;;  %v6416_v30 = vmul.u32.u64.high %v6372_v27, %v1364_v33, %v6415_v11  ;;  %v1222_v7 = vshrl.u32 %v1221_v3, 23 }
 0x145   : > { %v8116_v12 = vand.u32 2147483647, %v6062_v4  ;;  %v8117_v59 = vmov 0  ;;  %v1080_v29 = vclz %v5046_v60  ;;  %v8120_v1 = vand.u32 2147483647, %v6285_v51 }
 0x146   : > { %v6426_v37 = vmul.u32.u64.low %v6372_v27, %v1368_v42  ;;  %v6427_v57 = vmul.u32.u64.high %v6372_v27, %v1368_v42, %v6426_v37  ;;  %v577_v28 = vand.u32 2147483647, %v6349_v48  ;;  %v1197_v47 = vcvt.s32.f32 %v1190_v45 }
 0x147   : > { %vm6421_vm0 = vcmp.le.f32.partialorder %v8116_v12, 0.7853982  ;;  %v1225_v2 = vand.u32 8388607, %v8120_v1  ;;  %v1360_v8 = vsel %vm1354_vm14, %v1357_v19, %v1359_v10  ;;  %v5053_v3 = vadd.s32 4294967169, %v1222_v7 }
 0x148   : > { %v8118_v59 = vsel %vm6421_vm0, 4294967295, %v8117_v59  ;;  %v997_v17 = vsel %vm6392_vm7, %v5999_v61, %v6361_v40  ;;  %v8121_v5 = vxor.u32 2147483648, %v6353_v54  ;;  %v5047_v58 = vadd.s32 4294967294, %v1080_v29 }
 0x149   : > { %8119 = vst [vmem:[#allocation17_spill] sm:$0xff] %v8118_v59  ;;  %v1530_v31 = vand.u32 2139095040, %v6386_v18  ;;  %v6443_v60 = vmul.f32 %v1197_v47, %v1195_v38  ;;  %v1068_v48 = vadd.s32 %v6338_v49, %v6344_v52  ;;  %v1379_v20 = vadd.s32 1, %v6416_v30 }
 0x14a   : > { %v891_v33 = vsel %vm8038_vm8, %v8121_v5, %v6353_v54  ;;  %v1228_v45 = vadd.s32 1, %v5053_v3  ;;  %vm5048_vm2 = vcmp.lt.s32.totalorder %v5047_v58, 0  ;;  %v1376_v40 = vmul.u32 %v6372_v27, %v1360_v8 }
 0x14b   : > { %vm1378_vm3 = vc.u32 %v6427_v57, %v6415_v11  ;;  %v1226_v19 = vor.u32 8388608, %v1225_v2  ;;  %v1083_v10 = vsel %vm5048_vm2, 0, %v5047_v58  ;;  %v1531_v42 = vshrl.u32 %v1530_v31, 23 }
 0x14c   : > { %v1380_v54 = vsel %vm1378_vm3, %v1379_v20, %v6416_v30  ;;  %vm1229_vm4 = vcmp.gt.s32.totalorder %v1228_v45, 0  ;;  %v1084_v38 = vsub.s32 32, %v1083_v10  ;;  %v1088_v7 = vsub.s32 4294967266, %v1083_v10 }
 0x14d   : > { %v1381_v12 = vadd.s32 %v1380_v54, %v1376_v40  ;;  %v7997_v49 = vand.u32 2147483647, %v6386_v18  ;;  %v8122_v52 = vcvt.s32.f32 %v6288_v6  ;;  %5511 = vcosq.f32 %v997_v17 }
 0x14e   : > { %v1230_v27 = vsel %vm1229_vm4, %v1228_v45, 0  ;;  %v5065_v37 = vadd.s32 4294967169, %v1531_v42  ;;  %5513 = vsinq.f32 %v997_v17  ;;  %v1086_v1 = vshrl.u32 %v1068_v48, %v1084_v38 }
 0x14f   : > { %v6455_v29 = vmul.f32 %v8122_v52, %v577_v28  ;;  %v1089_v2 = vadd.s32 127, %v1088_v7  ;;  %v1382_v47 = vadd.s32 536870912, %v1381_v12  ;;  %v6460_v30 = vsel %vm6421_vm0, %v6062_v4, %v891_v33 }
 0x150   : > { %v1085_v3 = vshll.u32 %v6402_v50, %v1083_v10  ;;  %v1232_v5 = vand.u32 31, %v1230_v27  ;;  %v6466_v58 = vshll.u32 %v1226_v19, 8  ;;  %v6470_v17 = vand.u32 8388607, %v7997_v49 }
 0x151   : > { %v1090_v6 = vshll.u32 %v1089_v2, 23  ;;  %v6464_v28 = vshrl.u32 %v1382_v47, 30  ;;  %v1231_v48 = vshrl.u32 %v1230_v27, 5  ;;  %v1537_v45 = vadd.s32 1, %v5065_v37 }
 0x152   : > { %v1087_v31 = vor.u32 %v1086_v1, %v1085_v3  ;;  %v1233_v20 = vsub.s32 32, %v1232_v5  ;;  %v1235_v40 = vshll.u32 %v8115_v55, %v1232_v5  ;;  %v1238_v50 = vshll.u32 %v8106_v39, %v1232_v5 }
 0x153   : > { %8123 = vst [vmem:[#allocation18_spill] sm:$0xff] %v6464_v28  ;;  %v1384_v33 = vshll.u32 %v6464_v28, 30  ;;  %v1241_v10 = vshll.u32 %v8107_v26, %v1232_v5  ;;  %v1091_v54 = vor.u32 4788187, %v1090_v6  ;;  %v1244_v52 = vshll.u32 %v8108_v43, %v1232_v5 }
 0x154   : > { %v1236_v19 = vshrl.u32 %v8106_v39, %v1233_v20  ;;  %v1239_v42 = vshrl.u32 %v8107_v26, %v1233_v20  ;;  %v1242_v38 = vshrl.u32 %v8108_v43, %v1233_v20  ;;  %v8124_v27 = vmov 920167782  }
 0x155   : > { %v6479_v7 = vsub.s32 %v1381_v12, %v1384_v33  ;;  %v1245_v37 = vshrl.u32 %v8124_v27, %v1233_v20  ;;  %v1247_v1 = vshll.u32 %v8124_v27, %v1232_v5  ;;  %vm8007_vm9 = vcmp.lt.s32.totalorder %v6078_v15, 0 }
 0x156   : > { %v1237_v2 = vor.u32 %v1236_v19, %v1235_v40  ;;  %v1240_v47 = vor.u32 %v1239_v42, %v1238_v50  ;;  %v1243_v3 = vor.u32 %v1242_v38, %v1241_v10  ;;  %v1248_v6 = vshrl.u32 %v8103_v21, %v1233_v20  ;;  %v327_v50 = vpop.permute.xlu0 %326 }
 0x157   : > { %v1094_v49 = vcvt.s32.f32 %v1087_v31  ;;  %v1387_v8 = vsub.s32 0, %v6479_v7  ;;  %v1246_v28 = vor.u32 %v1245_v37, %v1244_v52  ;;  %vm1250_vm11 = vcmp.lt.s32.totalorder %v1231_v48, 1 }
 0x158   : > { %v1092_v12 = vand.u32 2147483647, %v1091_v54  ;;  %v1234_v33 = vshrl.u32 %v8115_v55, %v1233_v20  ;;  %v1249_v62 = vor.u32 %v1248_v6, %v1247_v1  ;;  %vm1253_vm13 = vcmp.lt.s32.totalorder %v1231_v48, 4 }
 0x159   : > { %v5058_v61 = vmin.u32 %v1387_v8, %v6479_v7  ;;  %vm1251_vm14 = vcmp.lt.s32.totalorder %v1231_v48, 2  ;;  %v1255_v5 = vsel %vm1253_vm13, %v1243_v3, 2102212464  ;;  %v1258_v40 = vsel %vm1250_vm11, %v1237_v2, %v1240_v47 }
 0x15a   : > { %vm1252_vm2 = vcmp.lt.s32.totalorder %v1231_v48, 3  ;;  %v1259_v10 = vsel %vm1253_vm13, %v1246_v28, 920167782  ;;  %v1262_v31 = vsel %vm1250_vm11, %v1240_v47, %v1243_v3  ;;  %v1263_v19 = vsel %vm1253_vm13, %v1249_v62, 1326507024  ;;  %v6491_v42 = vpop.eup %5511 }
 0x15b   : > { %8125 = vst [vmem:[#allocation19_spill] sm:$0xff] %v6491_v42  ;;  %v1389_v38 = vclz %v5058_v61  ;;  %v1254_v54 = vsel %vm1250_vm11, %v1234_v33, %v1237_v2  ;;  %v1256_v20 = vsel %vm1252_vm2, %v1240_v47, %v1255_v5  ;;  %v1260_v52 = vsel %vm1252_vm2, %v1243_v3, %v1259_v10  ;;  %v6494_v37 = vpop.eup %5513 }
 0x15c   : > { %8126 = vst [vmem:[#allocation20_spill] sm:$0xff] %v6494_v37  ;;  %v1261_v8 = vsel %vm1251_vm14, %v1258_v40, %v1260_v52  ;;  %v1264_v1 = vsel %vm1252_vm2, %v1246_v28, %v1263_v19  ;;  %v1535_v6 = vor.u32 8388608, %v6470_v17  ;;  %v6499_v59 = vmul.f32 %v6282_v9, %v327_v50 }
 0x15d   : > { %v6501_v4 = vmul.f32 %v1094_v49, %v1092_v12  ;;  %v5059_v62 = vadd.s32 4294967294, %v1389_v38  ;;  %v1265_v42 = vsel %vm1251_vm14, %v1262_v31, %v1264_v1  ;;  %vm1538_vm3 = vcmp.gt.s32.totalorder %v1537_v45, 0 }
 0x15e   : > { %8127 = vst [vmem:[#allocation21_spill] sm:$0xff] %v6499_v59  ;;  %v1257_v61 = vsel %vm1251_vm14, %v1254_v54, %v1256_v20  ;;  %v6506_v2 = vmul.u32.u64.low %v6466_v58, %v1265_v42  ;;  %v6507_v47 = vmul.u32.u64.high %v6466_v58, %v1265_v42, %v6506_v2  ;;  %v1539_v3 = vsel %vm1538_vm3, %v1537_v45, 0 }
 0x15f   : > { %v8128_v28 = vxor.u32 2147483648, %v6443_v60  ;;  %vm5060_vm4 = vcmp.lt.s32.totalorder %v5059_v62, 0  ;;  %v6517_v49 = vmul.u32.u64.low %v6466_v58, %v1261_v8  ;;  %v6518_v12 = vmul.u32.u64.high %v6466_v58, %v1261_v8, %v6517_v49 }
 0x160   : > { %v1377_v48 = vadd.s32 %v6415_v11, %v6427_v57  ;;  %v1392_v33 = vsel %vm5060_vm4, 0, %v5059_v62  ;;  %v1541_v5 = vand.u32 31, %v1539_v3  ;;  %v6528_v31 = vshrl.u32 %v1539_v3, 5 }
 0x161   : > { %v6514_v17 = vsel %vm8007_vm9, %v8128_v28, %v6443_v60  ;;  %v1393_v50 = vsub.s32 32, %v1392_v33  ;;  %v1397_v10 = vsub.s32 4294967266, %v1392_v33  ;;  %v1273_v60 = vmul.u32 %v6466_v58, %v1257_v61 }
 0x162   : > { %vm1275_vm11 = vc.u32 %v6507_v47, %v6517_v49  ;;  %v1542_v19 = vsub.s32 32, %v1541_v5  ;;  %v6530_v42 = vshll.u32 %v1535_v6, 8  ;;  %v1394_v11 = vshll.u32 %v6479_v7, %v1392_v33 }
 0x163   : > { %v1395_v57 = vshrl.u32 %v1377_v48, %v1393_v50  ;;  %v1398_v38 = vadd.s32 127, %v1397_v10  ;;  %v1276_v54 = vadd.s32 1, %v6518_v12  ;;  %v1544_v20 = vshll.u32 %v8115_v55, %v1541_v5 }
 0x164   : > { %v1545_v52 = vshrl.u32 %v8106_v39, %v1542_v19  ;;  %v1547_v58 = vshll.u32 %v8106_v39, %v1541_v5  ;;  %v1548_v8 = vshrl.u32 %v8107_v26, %v1542_v19  ;;  %v1550_v6 = vshll.u32 %v8107_v26, %v1541_v5 }
 0x165   : > { %v1399_v1 = vshll.u32 %v1398_v38, 23  ;;  %v1277_v62 = vsel %vm1275_vm11, %v1276_v54, %v6518_v12  ;;  %v1551_v61 = vshrl.u32 %v8108_v43, %v1542_v19  ;;  %v1396_v7 = vor.u32 %v1395_v57, %v1394_v11 }
 0x166   : > { %v1278_v2 = vadd.s32 %v1277_v62, %v1273_v60  ;;  %v1546_v3 = vor.u32 %v1545_v52, %v1544_v20  ;;  %v1549_v28 = vor.u32 %v1548_v8, %v1547_v58  ;;  %v8129_v48 = vand.u32 2147483647, %v6078_v15 }
 0x167   : > { %v8130_v33 = vmov 0  ;;  %v1400_v50 = vor.u32 4788187, %v1399_v1  ;;  %v1552_v10 = vor.u32 %v1551_v61, %v1550_v6  ;;  %v1553_v38 = vshll.u32 %v8108_v43, %v1541_v5 }
 0x168   : > { %vm6543_vm13 = vcmp.le.f32.partialorder %v8129_v48, 0.7853982  ;;  %v1554_v12 = vshrl.u32 %v8124_v27, %v1542_v19  ;;  %vm8008_vm14 = vcmp.lt.s32.totalorder %v6206_v16, 0  ;;  %v1279_v54 = vadd.s32 536870912, %v1278_v2 }
 0x169   : > { %v8131_v33 = vsel %vm6543_vm13, 4294967295, %v8130_v33  ;;  %v1556_v11 = vshll.u32 %v8124_v27, %v1541_v5  ;;  %v1557_v60 = vshrl.u32 %v8103_v21, %v1542_v19  ;;  %vm1559_vm2 = vcmp.lt.s32.totalorder %v6528_v31, 1 }
 0x16a   : > { %8132 = vst [vmem:[#allocation22_spill] sm:$0xff] %v8131_v33  ;;  %v1401_v57 = vand.u32 2147483647, %v1400_v50  ;;  %v1543_v20 = vshrl.u32 %v8115_v55, %v1542_v19  ;;  %v1555_v52 = vor.u32 %v1554_v12, %v1553_v38  ;;  %vm1562_vm3 = vcmp.lt.s32.totalorder %v6528_v31, 4 }
 0x16b   : > { %v1403_v58 = vcvt.s32.f32 %v1396_v7  ;;  %v6555_v8 = vshrl.u32 %v1279_v54, 30  ;;  %v1558_v1 = vor.u32 %v1557_v60, %v1556_v11  ;;  %v1564_v62 = vsel %vm1562_vm3, %v1552_v10, 2102212464 }
 0x16c   : > { %vm1560_vm4 = vcmp.lt.s32.totalorder %v6528_v31, 2  ;;  %vm1561_vm11 = vcmp.lt.s32.totalorder %v6528_v31, 3  ;;  %v1567_v5 = vsel %vm1559_vm2, %v1546_v3, %v1549_v28  ;;  %v1568_v19 = vsel %vm1562_vm3, %v1555_v52, 920167782 }
 0x16d   : > { %8133 = vst [vmem:[#allocation23_spill] sm:$0xff] %v6555_v8  ;;  %v1281_v6 = vshll.u32 %v6555_v8, 30  ;;  %v1563_v61 = vsel %vm1559_vm2, %v1543_v20, %v1546_v3  ;;  %v1569_v7 = vsel %vm1561_vm11, %v1552_v10, %v1568_v19  ;;  %v1571_v48 = vsel %vm1559_vm2, %v1549_v28, %v1552_v10 }
 0x16e   : > { %v1404_v50 = vmul.f32 %v1403_v58, %v1401_v57  ;;  %v1565_v38 = vsel %vm1561_vm11, %v1549_v28, %v1564_v62  ;;  %v1570_v12 = vsel %vm1560_vm4, %v1567_v5, %v1569_v7  ;;  %v1572_v54 = vsel %vm1562_vm3, %v1558_v1, 1326507024  ;;  %v342_v58 = vpop.permute.xlu1 %341 }
 0x16f   : > { %v6574_v11 = vsub.s32 %v1278_v2, %v1281_v6  ;;  %v1573_v60 = vsel %vm1561_vm11, %v1555_v52, %v1572_v54  ;;  %v6577_v45 = vmul.u32.u64.low %v6530_v42, %v1570_v12  ;;  %v6578_v40 = vmul.u32.u64.high %v6530_v42, %v1570_v12, %v6577_v45 }
 0x170   : > { %5515 = vcosq.f32 %v6460_v30  ;;  %v1574_v28 = vsel %vm1560_vm4, %v1571_v48, %v1573_v60  ;;  %v1427_v10 = vand.u32 2139095040, %v6499_v59  ;;  %v1203_v2 = vsel %vm6543_vm13, %v6078_v15, %v6514_v17 }
 0x171   : > { %v1284_v57 = vsub.s32 0, %v6574_v11  ;;  %v6592_v20 = vmul.u32.u64.low %v6530_v42, %v1574_v28  ;;  %v6593_v52 = vmul.u32.u64.high %v6530_v42, %v1574_v28, %v6592_v20  ;;  %5517 = vsinq.f32 %v6460_v30 }
 0x172   : > { %v8134_v1 = vxor.u32 2147483648, %v6501_v4  ;;  %v1566_v5 = vsel %vm1560_vm4, %v1563_v61, %v1565_v38  ;;  %v1428_v19 = vshrl.u32 %v1427_v10, 23  ;;  %v1405_v17 = vxor.u32 2147483648, %v1404_v50 }
 0x173   : > { %v5054_v6 = vmin.u32 %v1284_v57, %v6574_v11  ;;  %v1585_v7 = vadd.s32 1, %v6578_v40  ;;  %v8135_v48 = vand.u32 2147483647, %v6499_v59  ;;  %5519 = vcosq.f32 %v1203_v2 }
 0x174   : > { %v1097_v62 = vsel %vm8008_vm14, %v8134_v1, %v6501_v4  ;;  %v8136_v30 = vand.u32 2147483647, %v6206_v16  ;;  %v8137_v54 = vmov 0  ;;  %v5061_v4 = vadd.s32 4294967169, %v1428_v19 }
 0x175   : > { %v1431_v12 = vand.u32 8388607, %v8135_v48  ;;  %v6614_v31 = vmul.f32 %v6282_v9, %v342_v58  ;;  %v1286_v38 = vclz %v5054_v6  ;;  %v1582_v60 = vmul.u32 %v6530_v42, %v1566_v5 }
 0x176   : > { %vm6609_vm2 = vcmp.le.f32.partialorder %v8136_v30, 0.7853982  ;;  %vm1584_vm3 = vc.u32 %v6593_v52, %v6577_v45  ;;  %5521 = vsinq.f32 %v1203_v2  ;;  %vm8025_vm4 = vcmp.lt.s32.totalorder %v6211_v41, 0 }
 0x177   : > { %v8138_v54 = vsel %vm6609_vm2, 4294967295, %v8137_v54  ;;  %8140 = vst [vmem:[#allocation25_spill] sm:$0xff] %v6614_v31  ;;  %v1100_v61 = vsel %vm6609_vm2, %v6206_v16, %v1097_v62  ;;  %v1586_v28 = vsel %vm1584_vm3, %v1585_v7, %v6578_v40  ;;  %v1434_v10 = vadd.s32 1, %v5061_v4 }
 0x178   : > { %8139 = vst [vmem:[#allocation24_spill] sm:$0xff] %v8138_v54  ;;  %v1406_v57 = vsel %vm8025_vm4, %v1405_v17, %v1404_v50  ;;  %v5055_v20 = vadd.s32 4294967294, %v1286_v38  ;;  %v1587_v58 = vadd.s32 %v1586_v28, %v1582_v60  ;;  %v1432_v1 = vor.u32 8388608, %v1431_v12 }
 0x179   : > { %5523 = vcosq.f32 %v1100_v61  ;;  %v8141_v62 = vand.u32 2147483647, %v6211_v41  ;;  %v8142_v42 = vmov 0  ;;  %vm1435_vm9 = vcmp.gt.s32.totalorder %v1434_v10, 0 }
 0x17a   : > { %v1736_v2 = vand.u32 2139095040, %v6614_v31  ;;  %5525 = vsinq.f32 %v1100_v61  ;;  %vm5056_vm14 = vcmp.lt.s32.totalorder %v5055_v20, 0  ;;  %v1588_v40 = vadd.s32 536870912, %v1587_v58 }
 0x17b   : > { %vm6628_vm11 = vcmp.le.f32.partialorder %v8141_v62, 0.7853982  ;;  %v1436_v5 = vsel %vm1435_vm9, %v1434_v10, 0  ;;  %v1274_v19 = vadd.s32 %v6517_v49, %v6507_v47  ;;  %v1289_v17 = vsel %vm5056_vm14, 0, %v5055_v20 }
 0x17c   : > { %v8143_v42 = vsel %vm6628_vm11, 4294967295, %v8142_v42  ;;  %v6636_v50 = vsel %vm6628_vm11, %v6211_v41, %v1406_v57  ;;  %v1438_v6 = vand.u32 31, %v1436_v5  ;;  %v1294_v7 = vsub.s32 4294967266, %v1289_v17 }
 0x17d   : > { %8144 = vst [vmem:[#allocation26_spill] sm:$0xff] %v8143_v42  ;;  %v6640_v48 = vshrl.u32 %v1588_v40, 30  ;;  %v6642_v12 = vshll.u32 %v1432_v1, 8  ;;  %v1290_v4 = vsub.s32 32, %v1289_v17  ;;  %v6645_v61 = vshrl.u32 %v1436_v5, 5  ;;  %v6647_v28 = vpop.eup %5515 }
 0x17e   : > { %v1439_v38 = vsub.s32 32, %v1438_v6  ;;  %v1737_v60 = vshrl.u32 %v1736_v2, 23  ;;  %8146 = vst [vmem:[#allocation28_spill] sm:$0xff] %v6647_v28  ;;  %v1295_v10 = vadd.s32 127, %v1294_v7  ;;  %v1441_v47 = vshll.u32 %v8115_v55, %v1438_v6  ;;  %v6656_v5 = vpop.eup %5517 }
 0x17f   : > { %8145 = vst [vmem:[#allocation27_spill] sm:$0xff] %v6640_v48  ;;  %v1590_v57 = vshll.u32 %v6640_v48, 30  ;;  %v1444_v49 = vshll.u32 %v8106_v39, %v1438_v6  ;;  %v1447_v62 = vshll.u32 %v8107_v26, %v1438_v6  ;;  %8147 = vst [vmem:[#allocation29_spill] sm:$0xff] %v6656_v5  ;;  %v1450_v7 = vshll.u32 %v8108_v43, %v1438_v6 }
 0x180   : > { %v1442_v20 = vshrl.u32 %v8106_v39, %v1439_v38  ;;  %v1445_v1 = vshrl.u32 %v8107_v26, %v1439_v38  ;;  %v1448_v40 = vshrl.u32 %v8108_v43, %v1439_v38  ;;  %v1296_v2 = vshll.u32 %v1295_v10, 23  ;;  %v6662_v33 = vpop.eup %5519 }
 0x181   : > { %v6658_v3 = vsub.s32 %v1587_v58, %v1590_v57  ;;  %v1451_v30 = vshrl.u32 %v8124_v27, %v1439_v38  ;;  %v5073_v8 = vadd.s32 4294967169, %v1737_v60  ;;  %8148 = vst [vmem:[#allocation30_spill] sm:$0xff] %v6662_v33  ;;  %v1291_v15 = vshll.u32 %v6574_v11, %v1289_v17 }
 0x182   : > { %v1443_v48 = vor.u32 %v1442_v20, %v1441_v47  ;;  %v1446_v42 = vor.u32 %v1445_v1, %v1444_v49  ;;  %v1449_v41 = vor.u32 %v1448_v40, %v1447_v62  ;;  %v1292_v54 = vshrl.u32 %v1274_v19, %v1290_v4  ;;  %v337_v40 = vpop.permute.xlu0 %336 }
 0x183   : > { %v1593_v16 = vsub.s32 0, %v6658_v3  ;;  %v1452_v37 = vor.u32 %v1451_v30, %v1450_v7  ;;  %v1297_v28 = vor.u32 4788187, %v1296_v2  ;;  %v1440_v58 = vshrl.u32 %v8115_v55, %v1439_v38  ;;  %v6669_v5 = vpop.eup %5521 }
 0x184   : > { %v1453_v10 = vshll.u32 %v8124_v27, %v1438_v6  ;;  %v1454_v57 = vshrl.u32 %v8103_v21, %v1439_v38  ;;  %8149 = vst [vmem:[#allocation31_spill] sm:$0xff] %v6669_v5  ;;  %vm1456_vm9 = vcmp.lt.s32.totalorder %v6645_v61, 1  ;;  %vm1458_vm14 = vcmp.lt.s32.totalorder %v6645_v61, 3 }
 0x185   : > { %v5066_v47 = vmin.u32 %v1593_v16, %v6658_v3  ;;  %vm1459_vm3 = vcmp.lt.s32.totalorder %v6645_v61, 4  ;;  %v1464_v17 = vsel %vm1456_vm9, %v1443_v48, %v1446_v42  ;;  %v1293_v6 = vor.u32 %v1292_v54, %v1291_v15 }
 0x186   : > { %v1455_v11 = vor.u32 %v1454_v57, %v1453_v10  ;;  %v1461_v19 = vsel %vm1459_vm3, %v1449_v41, 2102212464  ;;  %v1465_v30 = vsel %vm1459_vm3, %v1452_v37, 920167782  ;;  %v6677_v4 = vpop.eup %5523  ;;  %vm1457_vm4 = vcmp.lt.s32.totalorder %v6645_v61, 2 }
 0x187   : > { %8150 = vst [vmem:[#allocation32_spill] sm:$0xff] %v6677_v4  ;;  %v1595_v38 = vclz %v5066_v47  ;;  %v1466_v16 = vsel %vm1458_vm14, %v1449_v41, %v1465_v30  ;;  %v6682_v60 = vpop.eup %5525  ;;  %v1298_v49 = vand.u32 2147483647, %v1297_v28  ;;  %v1468_v1 = vsel %vm1456_vm9, %v1446_v42, %v1449_v41 }
 0x188   : > { %8151 = vst [vmem:[#allocation33_spill] sm:$0xff] %v6682_v60  ;;  %v1467_v20 = vsel %vm1457_vm4, %v1464_v17, %v1466_v16  ;;  %v1469_v62 = vsel %vm1459_vm3, %v1455_v11, 1326507024  ;;  %v1460_v15 = vsel %vm1456_vm9, %v1440_v58, %v1443_v48  ;;  %v1462_v54 = vsel %vm1458_vm14, %v1446_v42, %v1461_v19 }
 0x189   : > { %v5067_v2 = vadd.s32 4294967294, %v1595_v38  ;;  %v1470_v7 = vsel %vm1458_vm14, %v1452_v37, %v1469_v62  ;;  %v6697_v10 = vmul.u32.u64.low %v6642_v12, %v1467_v20  ;;  %v6698_v57 = vmul.u32.u64.high %v6642_v12, %v1467_v20, %v6697_v10 }
 0x18a   : > { %v1471_v28 = vsel %vm1457_vm4, %v1468_v1, %v1470_v7  ;;  %v1743_v41 = vadd.s32 1, %v5073_v8  ;;  %v6706_v48 = vmul.f32 %v6282_v9, %v337_v40  ;;  %v1300_v42 = vcvt.s32.f32 %v1293_v6 }
 0x18b   : > { %vm5068_vm3 = vcmp.lt.s32.totalorder %v5067_v2, 0  ;;  %v6702_v47 = vmul.u32.u64.low %v6642_v12, %v1471_v28  ;;  %v6703_v11 = vmul.u32.u64.high %v6642_v12, %v1471_v28, %v6702_v47  ;;  %v1463_v37 = vsel %vm1457_vm4, %v1460_v15, %v1462_v54 }
 0x18c   : > { %v1598_v58 = vsel %vm5068_vm3, 0, %v5067_v2  ;;  %vm1744_vm9 = vcmp.gt.s32.totalorder %v1743_v41, 0  ;;  %v1583_v19 = vadd.s32 %v6577_v45, %v6593_v52  ;;  %v8152_v8 = vand.u32 2147483647, %v6614_v31 }
 0x18d   : > { %v1599_v17 = vsub.s32 32, %v1598_v58  ;;  %v1603_v30 = vsub.s32 4294967266, %v1598_v58  ;;  %5527 = vcosq.f32 %v6636_v50  ;;  %vm8029_vm14 = vcmp.lt.s32.totalorder %v6285_v51, 0 }
 0x18e   : > { %v1740_v38 = vand.u32 8388607, %v8152_v8  ;;  %v1301_v9 = vmul.f32 %v1300_v42, %v1298_v49  ;;  %v1482_v6 = vadd.s32 1, %v6698_v57  ;;  %v1745_v16 = vsel %vm1744_vm9, %v1743_v41, 0 }
 0x18f   : > { %v1601_v20 = vshrl.u32 %v1583_v19, %v1599_v17  ;;  %v1604_v61 = vadd.s32 127, %v1603_v30  ;;  %v1479_v1 = vmul.u32 %v6642_v12, %v1463_v37  ;;  %vm1481_vm4 = vc.u32 %v6703_v11, %v6697_v10 }
 0x190   : > { %v1600_v45 = vshll.u32 %v6658_v3, %v1598_v58  ;;  %v1483_v52 = vsel %vm1481_vm4, %v1482_v6, %v6698_v57  ;;  %v1747_v62 = vand.u32 31, %v1745_v16  ;;  %v1741_v49 = vor.u32 8388608, %v1740_v38 }
 0x191   : > { %v1605_v2 = vshll.u32 %v1604_v61, 23  ;;  %v1484_v15 = vadd.s32 %v1483_v52, %v1479_v1  ;;  %v1633_v54 = vand.u32 2139095040, %v6706_v48  ;;  %v1302_v7 = vxor.u32 2147483648, %v1301_v9 }
 0x192   : > { %v1602_v28 = vor.u32 %v1601_v20, %v1600_v45  ;;  %v1746_v41 = vshrl.u32 %v1745_v16, 5  ;;  %v1748_v47 = vsub.s32 32, %v1747_v62  ;;  %v1750_v42 = vshll.u32 %v8115_v55, %v1747_v62 }
 0x193   : > { %v1485_v12 = vadd.s32 536870912, %v1484_v15  ;;  %v1753_v37 = vshll.u32 %v8106_v39, %v1747_v62  ;;  %v1756_v3 = vshll.u32 %v8107_v26, %v1747_v62  ;;  %v1606_v57 = vor.u32 4788187, %v1605_v2 }
 0x194   : > { %v1751_v58 = vshrl.u32 %v8106_v39, %v1748_v47  ;;  %v1754_v19 = vshrl.u32 %v8107_v26, %v1748_v47  ;;  %v1757_v17 = vshrl.u32 %v8108_v43, %v1748_v47  ;;  %v1759_v8 = vshll.u32 %v8108_v43, %v1747_v62 }
 0x195   : > { %v6730_v30 = vshrl.u32 %v1485_v12, 30  ;;  %v1760_v38 = vshrl.u32 %v8124_v27, %v1748_v47  ;;  %v1762_v6 = vshll.u32 %v8124_v27, %v1747_v62  ;;  %v1763_v1 = vshrl.u32 %v8103_v21, %v1748_v47 }
 0x196   : > { %v1752_v16 = vor.u32 %v1751_v58, %v1750_v42  ;;  %v1755_v20 = vor.u32 %v1754_v19, %v1753_v37  ;;  %v1758_v61 = vor.u32 %v1757_v17, %v1756_v3  ;;  %vm8057_vm3 = vcmp.lt.s32.totalorder %v5866_v46, 0 }
 0x197   : > { %8153 = vst [vmem:[#allocation34_spill] sm:$0xff] %v6730_v30  ;;  %v1303_v45 = vsel %vm8029_vm14, %v1302_v7, %v1301_v9  ;;  %v1487_v52 = vshll.u32 %v6730_v30, 30  ;;  %v1761_v2 = vor.u32 %v1760_v38, %v1759_v8  ;;  %v6740_v12 = vshll.u32 %v1741_v49, 8 }
 0x198   : > { %v1609_v40 = vcvt.s32.f32 %v1602_v28  ;;  %v1764_v33 = vor.u32 %v1763_v1, %v1762_v6  ;;  %vm1768_vm9 = vcmp.lt.s32.totalorder %v1746_v41, 4  ;;  %v1634_v5 = vshrl.u32 %v1633_v54, 23 }
 0x199   : > { %v1607_v62 = vand.u32 2147483647, %v1606_v57  ;;  %v6742_v42 = vsub.s32 %v1484_v15, %v1487_v52  ;;  %vm1765_vm4 = vcmp.lt.s32.totalorder %v1746_v41, 1  ;;  %v1770_v37 = vsel %vm1768_vm9, %v1758_v61, 2102212464 }
 0x19a   : > { %v1749_v3 = vshrl.u32 %v8115_v55, %v1748_v47  ;;  %vm1767_vm10 = vcmp.lt.s32.totalorder %v1746_v41, 3  ;;  %v1773_v58 = vsel %vm1765_vm4, %v1752_v16, %v1755_v20  ;;  %v1774_v9 = vsel %vm1768_vm9, %v1761_v2, 920167782  ;;  %v6747_v7 = vpop.eup %5527 }
 0x19b   : > { %8154 = vst [vmem:[#allocation35_spill] sm:$0xff] %v6747_v7  ;;  %v1490_v49 = vsub.s32 0, %v6742_v42  ;;  %vm1766_vm14 = vcmp.lt.s32.totalorder %v1746_v41, 2  ;;  %v1775_v28 = vsel %vm1767_vm10, %v1758_v61, %v1774_v9  ;;  %v1777_v19 = vsel %vm1765_vm4, %v1755_v20, %v1758_v61 }
 0x19c   : > { %v1769_v54 = vsel %vm1765_vm4, %v1749_v3, %v1752_v16  ;;  %v1771_v57 = vsel %vm1767_vm10, %v1755_v20, %v1770_v37  ;;  %v1776_v15 = vsel %vm1766_vm14, %v1773_v58, %v1775_v28  ;;  %v1778_v17 = vsel %vm1768_vm9, %v1764_v33, 1326507024  ;;  %v352_v58 = vpop.permute.xlu1 %351 }
 0x19d   : > { %v6751_v8 = vmul.f32 %v1609_v40, %v1607_v62  ;;  %v5062_v47 = vmin.u32 %v1490_v49, %v6742_v42  ;;  %v1779_v38 = vsel %vm1767_vm10, %v1761_v2, %v1778_v17  ;;  %v5069_v6 = vadd.s32 4294967169, %v1634_v5  ;;  %v5479_v5 = vld [vmem:[%s7967_s2 + $0x78] sm:$0xff]   ;;  %v6803_v17 = vld [vmem:[%s7966_s1] ss:$0 sm:$0xff] }
 0x19e   : > { %v1780_v1 = vsel %vm1766_vm14, %v1777_v19, %v1779_v38  ;;  %v6755_v52 = vmul.u32.u64.low %v6740_v12, %v1776_v15  ;;  %v6756_v7 = vmul.u32.u64.high %v6740_v12, %v1776_v15, %v6755_v52  ;;  %v8155_v9 = vand.u32 2147483647, %v6706_v48  ;;  %v5480_v49 = vld [vmem:[%s7967_s2 + $0x38] sm:$0xff]   ;;  %5222 = vmatprep.subr.bf16.mxu0 %v5479_v5 }
 0x19f   : > { %v1492_v16 = vclz %v5062_v47  ;;  %v1772_v20 = vsel %vm1766_vm14, %v1769_v54, %v1771_v57  ;;  %v6764_v33 = vmul.u32.u64.low %v6740_v12, %v1780_v1  ;;  %v6765_v40 = vmul.u32.u64.high %v6740_v12, %v1780_v1, %v6764_v33  ;;  %5223 = vmatpush3.bf16.msra.mxu0 %v5480_v49  ;;  %v5482_v1 = vld [vmem:[%s7967_s2 + $0x30] sm:$0xff]  }
 0x1a0   : > { %v6761_v61 = vand.u32 8388607, %v8155_v9  ;;  %v8156_v41 = vxor.u32 2147483648, %v6455_v29  ;;  %5529 = vsinq.f32 %v6636_v50  ;;  %v8157_v62 = vand.u32 2147483647, %v6285_v51 }
 0x1a1   : > { %v8158_v37 = vmov 0  ;;  %v1640_v3 = vadd.s32 1, %v5069_v6  ;;  %v1480_v50 = vadd.s32 %v6697_v10, %v6703_v11  ;;  %v5063_v19 = vadd.s32 4294967294, %v1492_v16  ;;  %v5481_v11 = vld [vmem:[%s7967_s2 + $0x70] sm:$0xff]  }
 0x1a2   : > { %v6775_v2 = vsel %vm8057_vm3, %v8156_v41, %v6455_v29  ;;  %vm6780_vm10 = vcmp.le.f32.partialorder %v8157_v62, 0.7853982  ;;  %v1788_v54 = vmul.u32 %v6740_v12, %v1772_v20  ;;  %v1791_v57 = vadd.s32 1, %v6756_v7  ;;  %5224 = vmatprep.subr.bf16.mxu0 %v5481_v11 }
 0x1a3   : > { %v8159_v37 = vsel %vm6780_vm10, 4294967295, %v8158_v37  ;;  %v6790_v28 = vsel %vm6780_vm10, %v6285_v51, %v1303_v45  ;;  %vm1641_vm14 = vcmp.gt.s32.totalorder %v1640_v3, 0  ;;  %vm5064_vm9 = vcmp.lt.s32.totalorder %v5063_v19, 0  ;;  %5225 = vmatpush3.bf16.msra.mxu0 %v5482_v1 }
 0x1a4   : > { %8160 = vst [vmem:[#allocation36_spill] sm:$0xff] %v8159_v37  ;;  %vm1790_vm4 = vc.u32 %v6765_v40, %v6755_v52  ;;  %v1642_v45 = vsel %vm1641_vm14, %v1640_v3, 0  ;;  %v6806_v10 = vmul.f32 %v6803_v17, %v352_v58  ;;  %v1495_v12 = vsel %vm5064_vm9, 0, %v5063_v19 }
 0x1a5   : > { %v1792_v47 = vsel %vm1790_vm4, %v1791_v57, %v6756_v7  ;;  %v6812_v38 = vshrl.u32 %v1642_v45, 5  ;;  %v1644_v6 = vand.u32 31, %v1642_v45  ;;  %v1496_v9 = vsub.s32 32, %v1495_v12 }
 0x1a6   : > { %8161 = vst [vmem:[#allocation37_spill] sm:$0xff] %v6806_v10  ;;  %v1497_v16 = vshll.u32 %v6742_v42, %v1495_v12  ;;  %v1500_v20 = vsub.s32 4294967266, %v1495_v12  ;;  %v1793_v33 = vadd.s32 %v1792_v47, %v1788_v54  ;;  %v5483_v42 = vld [vmem:[%s7967_s2 + $0x68] sm:$0xff]   ;;  %vm8040_vm14 = vcmp.lt.s32.totalorder %v6386_v18, 0 }
 0x1a7   : > { %v1645_v5 = vsub.s32 32, %v1644_v6  ;;  %v1647_v41 = vshll.u32 %v8115_v55, %v1644_v6  ;;  %v1650_v62 = vshll.u32 %v8106_v39, %v1644_v6  ;;  %v1653_v7 = vshll.u32 %v8107_v26, %v1644_v6  ;;  %5226 = vmatprep.subr.bf16.mxu0 %v5483_v42 }
 0x1a8   : > { %v1498_v3 = vshrl.u32 %v1480_v50, %v1496_v9  ;;  %v1501_v58 = vadd.s32 127, %v1500_v20  ;;  %v1794_v49 = vadd.s32 536870912, %v1793_v33  ;;  %v1656_v19 = vshll.u32 %v8108_v43, %v1644_v6  ;;  %v5484_v50 = vld [vmem:[%s7967_s2 + $0x28] sm:$0xff]  }
 0x1a9   : > { %v1646_v54 = vshrl.u32 %v8115_v55, %v1645_v5  ;;  %v1648_v57 = vshrl.u32 %v8106_v39, %v1645_v5  ;;  %v1651_v45 = vshrl.u32 %v8107_v26, %v1645_v5  ;;  %v1654_v11 = vshrl.u32 %v8108_v43, %v1645_v5  ;;  %5227 = vmatpush3.bf16.msra.mxu0 %v5484_v50 }
 0x1aa   : > { %v1499_v12 = vor.u32 %v1498_v3, %v1497_v16  ;;  %v1502_v47 = vshll.u32 %v1501_v58, 23  ;;  %v6833_v1 = vshrl.u32 %v1794_v49, 30  ;;  %v1657_v9 = vshrl.u32 %v8124_v27, %v1645_v5  ;;  %v5485_v16 = vld [vmem:[%s7967_s2 + $0x60] sm:$0xff]  }
 0x1ab   : > { %v1649_v20 = vor.u32 %v1648_v57, %v1647_v41  ;;  %v1652_v29 = vor.u32 %v1651_v45, %v1650_v62  ;;  %v1655_v15 = vor.u32 %v1654_v11, %v1653_v7  ;;  %v1659_v30 = vshll.u32 %v8124_v27, %v1644_v6  ;;  %v5486_v6 = vld [vmem:[%s7967_s2 + $0x20] sm:$0xff]   ;;  %5228 = vmatprep.subr.bf16.mxu0 %v5485_v16 }
 0x1ac   : > { %8162 = vst [vmem:[#allocation38_spill] sm:$0xff] %v6833_v1  ;;  %v1503_v37 = vor.u32 4788187, %v1502_v47  ;;  %v1506_v51 = vcvt.s32.f32 %v1499_v12  ;;  %v1796_v4 = vshll.u32 %v6833_v1, 30  ;;  %v1658_v60 = vor.u32 %v1657_v9, %v1656_v19  ;;  %v5488_v12 = vld [vmem:[%s7967_s2 + $0x18] sm:$0xff]  }
 0x1ad   : > { %v1660_v3 = vshrl.u32 %v8103_v21, %v1645_v5  ;;  %vm1662_vm9 = vcmp.lt.s32.totalorder %v6812_v38, 1  ;;  %vm1663_vm4 = vcmp.lt.s32.totalorder %v6812_v38, 2  ;;  %vm1664_vm8 = vcmp.lt.s32.totalorder %v6812_v38, 3  ;;  %v6848_v41 = vpop.eup %5529  ;;  %5229 = vmatpush3.bf16.msra.mxu0 %v5486_v6 }
 0x1ae   : > { %8163 = vst [vmem:[#allocation39_spill] sm:$0xff] %v6848_v41  ;;  %v1504_v62 = vand.u32 2147483647, %v1503_v37  ;;  %v6850_v7 = vsub.s32 %v1793_v33, %v1796_v4  ;;  %vm1665_vm5 = vcmp.lt.s32.totalorder %v6812_v38, 4  ;;  %v1666_v5 = vsel %vm1662_vm9, %v1646_v54, %v1649_v20  ;;  %v5487_v33 = vld [vmem:[%s7967_s2 + $0x58] sm:$0xff]  }
 0x1af   : > { %v1661_v58 = vor.u32 %v1660_v3, %v1659_v30  ;;  %v1667_v49 = vsel %vm1665_vm5, %v1655_v15, 2102212464  ;;  %v1670_v19 = vsel %vm1662_vm9, %v1649_v20, %v1652_v29  ;;  %v1671_v42 = vsel %vm1665_vm5, %v1658_v60, 920167782  ;;  %5230 = vmatprep.subr.bf16.mxu0 %v5487_v33 }
 0x1b0   : > { %v1507_v57 = vmul.f32 %v1506_v51, %v1504_v62  ;;  %v1799_v45 = vsub.s32 0, %v6850_v7  ;;  %v1668_v4 = vsel %vm1664_vm8, %v1652_v29, %v1667_v49  ;;  %v1672_v37 = vsel %vm1664_vm8, %v1655_v15, %v1671_v42 }
 0x1b1   : > { %v1673_v30 = vsel %vm1663_vm4, %v1670_v19, %v1672_v37  ;;  %v1674_v54 = vsel %vm1662_vm9, %v1652_v29, %v1655_v15  ;;  %v1675_v11 = vsel %vm1665_vm5, %v1661_v58, 1326507024  ;;  %v8164_v51 = vor.u32 8388608, %v6761_v61  ;;  %v347_v15 = vpop.permute.xlu0 %346  ;;  %5231 = vmatpush3.bf16.msra.mxu0 %v5488_v12 }
 0x1b2   : > { %v8165_v47 = vxor.u32 2147483648, %v6751_v8  ;;  %v5074_v20 = vmin.u32 %v1799_v45, %v6850_v7  ;;  %v1676_v16 = vsel %vm1664_vm8, %v1658_v60, %v1675_v11  ;;  %v8042_v29 = vand.u32 2147483647, %v6806_v10  ;;  %v5489_v60 = vld [vmem:[%s7967_s2 + $0x50] sm:$0xff]  }
 0x1b3   : > { %v1678_v50 = vshll.u32 %v8164_v51, 8  ;;  %v1669_v61 = vsel %vm1663_vm4, %v1666_v5, %v1668_v4  ;;  %v1677_v3 = vsel %vm1663_vm4, %v1674_v54, %v1676_v16  ;;  %5531 = vcosq.f32 %v6790_v28  ;;  %v5490_v4 = vld [vmem:[%s7967_s2 + $0x10] sm:$0xff]   ;;  %5232 = vmatprep.subr.bf16.mxu0 %v5489_v60 }
 0x1b4   : > { %v1612_v9 = vsel %vm8040_vm14, %v8165_v47, %v6751_v8  ;;  %v1508_v8 = vxor.u32 2147483648, %v1507_v57  ;;  %v1801_v58 = vclz %v5074_v20  ;;  %v8166_v5 = vand.u32 2147483647, %v6386_v18  ;;  %v5491_v20 = vld [vmem:[%s7967_s2 + $0x48] sm:$0xff]  }
 0x1b5   : > { %v6887_v6 = vmul.u32.u64.low %v1678_v50, %v1673_v30  ;;  %v6888_v62 = vmul.u32.u64.high %v1678_v50, %v1673_v30, %v6887_v6  ;;  %v6890_v49 = vmul.u32.u64.low %v1678_v50, %v1677_v3  ;;  %v6891_v19 = vmul.u32.u64.high %v1678_v50, %v1677_v3, %v6890_v49  ;;  %5233 = vmatpush3.bf16.msra.mxu0 %v5490_v4 }
 0x1b6   : > { %vm6899_vm5 = vcmp.le.f32.partialorder %v8166_v5, 0.7853982  ;;  %v8167_v38 = vmov 0  ;;  %v1942_v42 = vand.u32 2139095040, %v6806_v10  ;;  %v6905_v45 = vmul.f32 %v6803_v17, %v347_v15  ;;  %5234 = vmatprep.subr.bf16.mxu0 %v5491_v20  ;;  %v357_v5 = vpop.permute.xlu0 %356 }
 0x1b7   : > { %v8168_v38 = vsel %vm6899_vm5, 4294967295, %v8167_v38  ;;  %5533 = vsinq.f32 %v6790_v28  ;;  %v8170_v37 = vand.u32 2147483647, %v6499_v59  ;;  %v8171_v33 = vmov 0 }
 0x1b8   : > { %8169 = vst [vmem:[#allocation40_spill] sm:$0xff] %v8168_v38  ;;  %vm8055_vm9 = vcmp.lt.s32.totalorder %v6499_v59, 0  ;;  %v5075_v30 = vadd.s32 4294967294, %v1801_v58  ;;  %v1615_v54 = vsel %vm6899_vm5, %v6386_v18, %v1612_v9  ;;  %v1685_v11 = vmul.u32 %v1678_v50, %v1669_v61  ;;  %v362_v58 = vpop.permute.xlu1 %361 }
 0x1b9   : > { %vm6913_vm8 = vcmp.le.f32.partialorder %v8170_v37, 0.7853982  ;;  %v1688_v51 = vadd.s32 1, %v6888_v62  ;;  %v1943_v12 = vshrl.u32 %v1942_v42, 23  ;;  %v1509_v28 = vsel %vm8055_vm9, %v1508_v8, %v1507_v57  ;;  %v5492_v57 = vld [vmem:[%s7967_s2 + $0x8] sm:$0xff]  }
 0x1ba   : > { %v8172_v33 = vsel %vm6913_vm8, 4294967295, %v8171_v33  ;;  %vm5076_vm4 = vcmp.lt.s32.totalorder %v5075_v30, 0  ;;  %vm1687_vm14 = vc.u32 %v6891_v19, %v6887_v6  ;;  %v1946_v47 = vand.u32 8388607, %v8042_v29  ;;  %5235 = vmatpush3.bf16.msra.mxu0 %v5492_v57 }
 0x1bb   : > { %8173 = vst [vmem:[#allocation41_spill] sm:$0xff] %v8172_v33  ;;  %v1804_v16 = vsel %vm5076_vm4, 0, %v5075_v30  ;;  %v1689_v50 = vsel %vm1687_vm14, %v1688_v51, %v6888_v62  ;;  %v5081_v9 = vadd.s32 4294967169, %v1943_v12  ;;  %v1839_v15 = vand.u32 2139095040, %v6905_v45 }
 0x1bc   : > { %5535 = vcosq.f32 %v1615_v54  ;;  %v1805_v61 = vsub.s32 32, %v1804_v16  ;;  %v1809_v3 = vsub.s32 4294967266, %v1804_v16  ;;  %v1690_v8 = vadd.s32 %v1689_v50, %v1685_v11 }
 0x1bd   : > { %5537 = vsinq.f32 %v1615_v54  ;;  %v6938_v49 = vsel %vm6913_vm8, %v6499_v59, %v1509_v28  ;;  %v1789_v62 = vadd.s32 %v6755_v52, %v6765_v40  ;;  %v1949_v60 = vadd.s32 1, %v5081_v9  ;;  %v5493_v54 = vld [vmem:[%s7967_s2 + $0x40] sm:$0xff]  }
 0x1be   : > { %v1810_v42 = vadd.s32 127, %v1809_v3  ;;  %v1691_v4 = vadd.s32 536870912, %v1690_v8  ;;  %v1947_v37 = vor.u32 8388608, %v1946_v47  ;;  %v8041_v30 = vand.u32 2147483647, %v6905_v45  ;;  %v5494_v52 = vld [vmem:[%s7967_s2] sm:$0xff]   ;;  %5236 = vmatprep.subr.bf16.mxu0 %v5493_v54 }
 0x1bf   : > { %v1807_v11 = vshrl.u32 %v1789_v62, %v1805_v61  ;;  %vm1950_vm14 = vcmp.gt.s32.totalorder %v1949_v60, 0  ;;  %v1840_v51 = vshrl.u32 %v1839_v15, 23  ;;  %v6947_v12 = vmul.f32 %v6803_v17, %v362_v58  ;;  %5237 = vmatpush3.bf16.msra.mxu0 %v5494_v52 }
 0x1c0   : > { %v1811_v40 = vshll.u32 %v1810_v42, 23  ;;  %v6952_v28 = vshrl.u32 %v1691_v4, 30  ;;  %v1951_v47 = vsel %vm1950_vm14, %v1949_v60, 0  ;;  %v6955_v20 = vmul.f32 %v6803_v17, %v357_v5  ;;  %v6969_v4 = vpop.eup %5531 }
 0x1c1   : > { %5539 = vcosq.f32 %v6938_v49  ;;  %v1806_v50 = vshll.u32 %v6850_v7, %v1804_v16  ;;  %v6960_v9 = vadd.s32 %v6887_v6, %v6891_v19  ;;  %v1953_v15 = vand.u32 31, %v1951_v47  ;;  %8175 = vst [vmem:[#allocation43_spill] sm:$0xff] %v6969_v4 }
 0x1c2   : > { %8174 = vst [vmem:[#allocation42_spill] sm:$0xff] %v6952_v28  ;;  %v1812_v57 = vor.u32 4788187, %v1811_v40  ;;  %v1693_v61 = vshll.u32 %v6952_v28, 30  ;;  %v6963_v3 = vshll.u32 %v1947_v37, 8  ;;  %v1952_v60 = vshrl.u32 %v1951_v47, 5 }
 0x1c3   : > { %v6967_v58 = vand.u32 8388607, %v8041_v30  ;;  %v1808_v62 = vor.u32 %v1807_v11, %v1806_v50  ;;  %v1954_v5 = vsub.s32 32, %v1953_v15  ;;  %v5077_v42 = vadd.s32 4294967169, %v1840_v51 }
 0x1c4   : > { %v6971_v7 = vsub.s32 %v1690_v8, %v1693_v61  ;;  %v1956_v6 = vshll.u32 %v8115_v55, %v1953_v15  ;;  %v1959_v19 = vshll.u32 %v8106_v39, %v1953_v15  ;;  %v1962_v16 = vshll.u32 %v8107_v26, %v1953_v15  ;;  %v6976_v37 = vpop.eup %5533 }
 0x1c5   : > { %8176 = vst [vmem:[#allocation44_spill] sm:$0xff] %v6976_v37  ;;  %v1813_v54 = vand.u32 2147483647, %v1812_v57  ;;  %v1957_v52 = vshrl.u32 %v8106_v39, %v1954_v5  ;;  %v1960_v11 = vshrl.u32 %v8107_v26, %v1954_v5  ;;  %v1963_v40 = vshrl.u32 %v8108_v43, %v1954_v5 }
 0x1c6   : > { %v1696_v51 = vsub.s32 0, %v6971_v7  ;;  %v1965_v8 = vshll.u32 %v8108_v43, %v1953_v15  ;;  %v1966_v47 = vshrl.u32 %v8124_v27, %v1954_v5  ;;  %v1969_v50 = vshrl.u32 %v8103_v21, %v1954_v5 }
 0x1c7   : > { %v1958_v61 = vor.u32 %v1957_v52, %v1956_v6  ;;  %v1961_v30 = vor.u32 %v1960_v11, %v1959_v19  ;;  %v1964_v29 = vor.u32 %v1963_v40, %v1962_v16  ;;  %v1968_v1 = vshll.u32 %v8124_v27, %v1953_v15 }
 0x1c8   : > { %v5070_v57 = vmin.u32 %v1696_v51, %v6971_v7  ;;  %v1967_v38 = vor.u32 %v1966_v47, %v1965_v8  ;;  %v1844_v28 = vor.u32 8388608, %v6967_v58  ;;  %v1815_v59 = vcvt.s32.f32 %v1808_v62 }
 0x1c9   : > { %v6989_v33 = vpop.eup %5535  ;;  %v1970_v41 = vor.u32 %v1969_v50, %v1968_v1  ;;  %vm1971_vm4 = vcmp.lt.s32.totalorder %v1952_v60, 1  ;;  %vm1974_vm14 = vcmp.lt.s32.totalorder %v1952_v60, 4  ;;  %v1846_v15 = vadd.s32 1, %v5077_v42 }
 0x1ca   : > { %8177 = vst [vmem:[#allocation45_spill] sm:$0xff] %v6989_v33  ;;  %v6991_v4 = vpop.eup %5537  ;;  %v1698_v6 = vclz %v5070_v57  ;;  %v1976_v19 = vsel %vm1974_vm14, %v1964_v29, 2102212464  ;;  %v1979_v16 = vsel %vm1971_vm4, %v1958_v61, %v1961_v30  ;;  %v6994_v52 = vmul.f32 %v1815_v59, %v1813_v54 }
 0x1cb   : > { %8178 = vst [vmem:[#allocation46_spill] sm:$0xff] %v6991_v4  ;;  %v1955_v11 = vshrl.u32 %v8115_v55, %v1954_v5  ;;  %vm1973_vm9 = vcmp.lt.s32.totalorder %v1952_v60, 3  ;;  %v1980_v58 = vsel %vm1974_vm14, %v1967_v38, 920167782  ;;  %vm1972_vm12 = vcmp.lt.s32.totalorder %v1952_v60, 2 }
 0x1cc   : > { %v5071_v40 = vadd.s32 4294967294, %v1698_v6  ;;  %v1981_v62 = vsel %vm1973_vm9, %v1964_v29, %v1980_v58  ;;  %v1983_v1 = vsel %vm1971_vm4, %v1961_v30, %v1964_v29  ;;  %v1977_v8 = vsel %vm1973_vm9, %v1961_v30, %v1976_v19 }
 0x1cd   : > { %v1975_v51 = vsel %vm1971_vm4, %v1955_v11, %v1958_v61  ;;  %v1982_v47 = vsel %vm1972_vm12, %v1979_v16, %v1981_v62  ;;  %v1984_v50 = vsel %vm1974_vm14, %v1970_v41, 1326507024  ;;  %vm1847_vm15 = vcmp.gt.s32.totalorder %v1846_v15, 0 }
 0x1ce   : > { %v7000_v57 = vpop.eup %5539  ;;  %vm5072_vm3 = vcmp.lt.s32.totalorder %v5071_v40, 0  ;;  %v1985_v59 = vsel %vm1973_vm9, %v1967_v38, %v1984_v50  ;;  %v7003_v42 = vmul.u32.u64.low %v6963_v3, %v1982_v47  ;;  %v7004_v5 = vmul.u32.u64.high %v6963_v3, %v1982_v47, %v7003_v42 }
 0x1cf   : > { %8179 = vst [vmem:[#allocation47_spill] sm:$0xff] %v7000_v57  ;;  %v1701_v54 = vsel %vm5072_vm3, 0, %v5071_v40  ;;  %v1986_v6 = vsel %vm1972_vm12, %v1983_v1, %v1985_v59  ;;  %v2148_v29 = vand.u32 2139095040, %v6947_v12  ;;  %v1978_v19 = vsel %vm1972_vm12, %v1975_v51, %v1977_v8 }
 0x1d0   : > { %v1702_v30 = vsub.s32 32, %v1701_v54  ;;  %v1706_v61 = vsub.s32 4294967266, %v1701_v54  ;;  %v1848_v41 = vsel %vm1847_vm15, %v1846_v15, 0  ;;  %v7014_v58 = vshll.u32 %v1844_v28, 8 }
 0x1d1   : > { %v7011_v16 = vmul.u32.u64.low %v6963_v3, %v1986_v6  ;;  %v7012_v11 = vmul.u32.u64.high %v6963_v3, %v1986_v6, %v7011_v16  ;;  %v1850_v38 = vand.u32 31, %v1848_v41  ;;  %v1817_v62 = vxor.u32 2147483648, %v6994_v52 }
 0x1d2   : > { %v1704_v40 = vshrl.u32 %v6960_v9, %v1702_v30  ;;  %v1707_v1 = vadd.s32 127, %v1706_v61  ;;  %v1997_v47 = vadd.s32 1, %v7004_v5  ;;  %v1703_v50 = vshll.u32 %v6971_v7, %v1701_v54 }
 0x1d3   : > { %v1994_v60 = vmul.u32 %v6963_v3, %v1978_v19  ;;  %v1851_v51 = vsub.s32 32, %v1850_v38  ;;  %v2149_v15 = vshrl.u32 %v2148_v29, 23  ;;  %v1849_v59 = vshrl.u32 %v1848_v41, 5 }
 0x1d4   : > { %v1708_v8 = vshll.u32 %v1707_v1, 23  ;;  %v1853_v6 = vshll.u32 %v8115_v55, %v1850_v38  ;;  %v1856_v28 = vshll.u32 %v8106_v39, %v1850_v38  ;;  %v1705_v16 = vor.u32 %v1704_v40, %v1703_v50 }
 0x1d5   : > { %vm1996_vm12 = vc.u32 %v7012_v11, %v7003_v42  ;;  %v1854_v9 = vshrl.u32 %v8106_v39, %v1851_v51  ;;  %v1859_v30 = vshll.u32 %v8107_v26, %v1850_v38  ;;  %v1857_v54 = vshrl.u32 %v8107_v26, %v1851_v51 }
 0x1d6   : > { %v1709_v7 = vor.u32 4788187, %v1708_v8  ;;  %v1998_v3 = vsel %vm1996_vm12, %v1997_v47, %v7004_v5  ;;  %v1862_v29 = vshll.u32 %v8108_v43, %v1850_v38  ;;  %v1860_v41 = vshrl.u32 %v8108_v43, %v1851_v51 }
 0x1d7   : > { %v1999_v61 = vadd.s32 %v1998_v3, %v1994_v60  ;;  %v1855_v19 = vor.u32 %v1854_v9, %v1853_v6  ;;  %v1863_v40 = vshrl.u32 %v8124_v27, %v1851_v51  ;;  %v1858_v50 = vor.u32 %v1857_v54, %v1856_v28 }
 0x1d8   : > { %v1710_v1 = vand.u32 2147483647, %v1709_v7  ;;  %v1865_v18 = vshll.u32 %v8124_v27, %v1850_v38  ;;  %v1866_v33 = vshrl.u32 %v8103_v21, %v1851_v51  ;;  %v1861_v8 = vor.u32 %v1860_v41, %v1859_v30 }
 0x1d9   : > { %v2000_v4 = vadd.s32 536870912, %v1999_v61  ;;  %v1864_v57 = vor.u32 %v1863_v40, %v1862_v29  ;;  %v5089_v5 = vadd.s32 4294967169, %v2149_v15  ;;  %v8180_v47 = vand.u32 2147483647, %v6614_v31 }
 0x1da   : > { %v8181_v37 = vmov 0  ;;  %v1712_v60 = vcvt.s32.f32 %v1705_v16  ;;  %v1867_v6 = vor.u32 %v1866_v33, %v1865_v18  ;;  %vm1868_vm9 = vcmp.lt.s32.totalorder %v1849_v59, 1 }
 0x1db   : > { %vm7037_vm3 = vcmp.le.f32.partialorder %v8180_v47, 0.7853982  ;;  %vm1871_vm4 = vcmp.lt.s32.totalorder %v1849_v59, 4  ;;  %v7042_v28 = vshrl.u32 %v2000_v4, 30  ;;  %v1852_v38 = vshrl.u32 %v8115_v55, %v1851_v51 }
 0x1dc   : > { %v8182_v37 = vsel %vm7037_vm3, 4294967295, %v8181_v37  ;;  %v1873_v9 = vsel %vm1871_vm4, %v1861_v8, 2102212464  ;;  %v1876_v30 = vsel %vm1868_vm9, %v1855_v19, %v1858_v50  ;;  %v1713_v7 = vmul.f32 %v1712_v60, %v1710_v1 }
 0x1dd   : > { %8183 = vst [vmem:[#allocation48_spill] sm:$0xff] %v8182_v37  ;;  %8184 = vst [vmem:[#allocation49_spill] sm:$0xff] %v7042_v28  ;;  %vm1870_vm12 = vcmp.lt.s32.totalorder %v1849_v59, 3  ;;  %v1877_v15 = vsel %vm1871_vm4, %v1864_v57, 920167782  ;;  %v1880_v3 = vsel %vm1868_vm9, %v1858_v50, %v1861_v8  ;;  %v2002_v54 = vshll.u32 %v7042_v28, 30  ;;  %v367_v28 = vpop.permute.xlu0 %366 }
 0x1de   : > { %vm1869_vm15 = vcmp.lt.s32.totalorder %v1849_v59, 2  ;;  %v1878_v29 = vsel %vm1870_vm12, %v1861_v8, %v1877_v15  ;;  %v1881_v16 = vsel %vm1871_vm4, %v1867_v6, 1326507024  ;;  %v1872_v18 = vsel %vm1868_vm9, %v1852_v38, %v1855_v19 }
 0x1df   : > { %v1874_v33 = vsel %vm1870_vm12, %v1858_v50, %v1873_v9  ;;  %v1879_v41 = vsel %vm1869_vm15, %v1876_v30, %v1878_v29  ;;  %v1882_v40 = vsel %vm1870_vm12, %v1864_v57, %v1881_v16  ;;  %vm8185_vm14 = vcmp.lt.s32.totalorder %v6614_v31, 0 }
 0x1e0   : > { %v1818_v4 = vsel %vm8185_vm14, %v1817_v62, %v6994_v52  ;;  %v7050_v51 = vsub.s32 %v1999_v61, %v2002_v54  ;;  %v1883_v1 = vsel %vm1869_vm15, %v1880_v3, %v1882_v40  ;;  %v8186_v47 = vand.u32 2147483647, %v6947_v12 }
 0x1e1   : > { %v1714_v36 = vxor.u32 2147483648, %v1713_v7  ;;  %v7056_v8 = vmul.u32.u64.low %v7014_v58, %v1883_v1  ;;  %v7057_v19 = vmul.u32.u64.high %v7014_v58, %v1883_v1, %v7056_v8  ;;  %v2155_v50 = vadd.s32 1, %v5089_v5 }
 0x1e2   : > { %v2152_v60 = vand.u32 8388607, %v8186_v47  ;;  %v2005_v57 = vsub.s32 0, %v7050_v51  ;;  %v1875_v6 = vsel %vm1869_vm15, %v1872_v18, %v1874_v33  ;;  %5541 = vsinq.f32 %v6938_v49 }
 0x1e3   : > { %v7062_v52 = vmul.u32.u64.low %v7014_v58, %v1879_v41  ;;  %v7063_v62 = vmul.u32.u64.high %v7014_v58, %v1879_v41, %v7062_v52  ;;  %vm2156_vm9 = vcmp.gt.s32.totalorder %v2155_v50, 0  ;;  %v7068_v38 = vmul.f32 %v6803_v17, %v367_v28 }
 0x1e4   : > { %v2153_v61 = vor.u32 8388608, %v2152_v60  ;;  %v7073_v5 = vsel %vm7037_vm3, %v6614_v31, %v1818_v4  ;;  %v1995_v59 = vadd.s32 %v7003_v42, %v7012_v11  ;;  %v5082_v9 = vmin.u32 %v2005_v57, %v7050_v51 }
 0x1e5   : > { %v2157_v30 = vsel %vm2156_vm9, %v2155_v50, 0  ;;  %vm8187_vm15 = vcmp.lt.s32.totalorder %v6706_v48, 0  ;;  %v1891_v49 = vmul.u32 %v7014_v58, %v1875_v6  ;;  %vm1893_vm4 = vc.u32 %v7057_v19, %v7062_v52 }
 0x1e6   : > { %v7080_v15 = vsel %vm8187_vm15, %v1714_v36, %v1713_v7  ;;  %v2159_v17 = vand.u32 31, %v2157_v30  ;;  %v2007_v28 = vclz %v5082_v9  ;;  %v1894_v3 = vadd.s32 1, %v7063_v62 }
 0x1e7   : > { %v2045_v42 = vand.u32 2139095040, %v6955_v20  ;;  %v7088_v11 = vshrl.u32 %v2157_v30, 5  ;;  %v7091_v36 = vshll.u32 %v2153_v61, 8  ;;  %v8188_v61 = vand.u32 2147483647, %v6706_v48 }
 0x1e8   : > { %v2160_v29 = vsub.s32 32, %v2159_v17  ;;  %v2162_v16 = vshll.u32 %v8115_v55, %v2159_v17  ;;  %v5083_v7 = vadd.s32 4294967294, %v2007_v28  ;;  %v1895_v58 = vsel %vm1893_vm4, %v1894_v3, %v7063_v62 }
 0x1e9   : > { %v2165_v18 = vshll.u32 %v8106_v39, %v2159_v17  ;;  %v2168_v33 = vshll.u32 %v8107_v26, %v2159_v17  ;;  %v1896_v41 = vadd.s32 %v1895_v58, %v1891_v49  ;;  %v2171_v1 = vshll.u32 %v8108_v43, %v2159_v17 }
 0x1ea   : > { %v2163_v40 = vshrl.u32 %v8106_v39, %v2160_v29  ;;  %v2166_v4 = vshrl.u32 %v8107_v26, %v2160_v29  ;;  %vm5084_vm14 = vcmp.lt.s32.totalorder %v5083_v7, 0  ;;  %v2169_v47 = vshrl.u32 %v8108_v43, %v2160_v29 }
 0x1eb   : > { %v2172_v60 = vshrl.u32 %v8124_v27, %v2160_v29  ;;  %v2175_v8 = vshrl.u32 %v8103_v21, %v2160_v29  ;;  %v2010_v50 = vsel %vm5084_vm14, 0, %v5083_v7  ;;  %v1897_v57 = vadd.s32 536870912, %v1896_v41 }
 0x1ec   : > { %v2164_v6 = vor.u32 %v2163_v40, %v2162_v16  ;;  %v2167_v62 = vor.u32 %v2166_v4, %v2165_v18  ;;  %vm7104_vm12 = vcmp.le.f32.partialorder %v8188_v61, 0.7853982  ;;  %v8189_v9 = vmov 0 }
 0x1ed   : > { %v8190_v9 = vsel %vm7104_vm12, 4294967295, %v8189_v9  ;;  %v2011_v30 = vsub.s32 32, %v2010_v50  ;;  %v2015_v49 = vsub.s32 4294967266, %v2010_v50  ;;  %v2170_v28 = vor.u32 %v2169_v47, %v2168_v33 }
 0x1ee   : > { %v2174_v3 = vshll.u32 %v8124_v27, %v2159_v17  ;;  %v2012_v58 = vshll.u32 %v7050_v51, %v2010_v50  ;;  %v7110_v54 = vshrl.u32 %v1897_v57, 30  ;;  %v2161_v7 = vshrl.u32 %v8115_v55, %v2160_v29 }
 0x1ef   : > { %v2173_v37 = vor.u32 %v2172_v60, %v2171_v1  ;;  %v2013_v16 = vshrl.u32 %v1995_v59, %v2011_v30  ;;  %v2016_v18 = vadd.s32 127, %v2015_v49  ;;  %vm2177_vm9 = vcmp.lt.s32.totalorder %v7088_v11, 1  ;;  %v7119_v51 = vpop.eup %5541 }
 0x1f0   : > { %8191 = vst [vmem:[#allocation50_spill] sm:$0xff] %v7110_v54  ;;  %v2176_v40 = vor.u32 %v2175_v8, %v2174_v3  ;;  %v1899_v4 = vshll.u32 %v7110_v54, 30  ;;  %vm2179_vm15 = vcmp.lt.s32.totalorder %v7088_v11, 3  ;;  %vm2180_vm4 = vcmp.lt.s32.totalorder %v7088_v11, 4 }
 0x1f1   : > { %v2185_v17 = vsel %vm2177_vm9, %v2164_v6, %v2167_v62  ;;  %v2014_v33 = vor.u32 %v2013_v16, %v2012_v58  ;;  %v2017_v47 = vshll.u32 %v2016_v18, 23  ;;  %v2182_v59 = vsel %vm2180_vm4, %v2170_v28, 2102212464 }
 0x1f2   : > { %v2186_v29 = vsel %vm2180_vm4, %v2173_v37, 920167782  ;;  %v7125_v1 = vsub.s32 %v1896_v41, %v1899_v4  ;;  %vm2178_vm14 = vcmp.lt.s32.totalorder %v7088_v11, 2  ;;  %v2181_v60 = vsel %vm2177_vm9, %v2161_v7, %v2164_v6 }
 0x1f3   : > { %v2187_v8 = vsel %vm2179_vm15, %v2170_v28, %v2186_v29  ;;  %v2018_v50 = vor.u32 4788187, %v2017_v47  ;;  %v2183_v57 = vsel %vm2179_vm15, %v2167_v62, %v2182_v59  ;;  %v2189_v30 = vsel %vm2177_vm9, %v2167_v62, %v2170_v28 }
 0x1f4   : > { %v2188_v61 = vsel %vm2178_vm14, %v2185_v17, %v2187_v8  ;;  %v1902_v41 = vsub.s32 0, %v7125_v1  ;;  %v2190_v49 = vsel %vm2180_vm4, %v2176_v40, 1326507024  ;;  %v2021_v7 = vcvt.s32.f32 %v2014_v33 }
 0x1f5   : > { %v7142_v6 = vmul.u32.u64.low %v7091_v36, %v2188_v61  ;;  %v7143_v3 = vmul.u32.u64.high %v7091_v36, %v2188_v61, %v7142_v6  ;;  %v2019_v58 = vand.u32 2147483647, %v2018_v50  ;;  %v2191_v16 = vsel %vm2179_vm15, %v2173_v37, %v2190_v49 }
 0x1f6   : > { %v2046_v18 = vshrl.u32 %v2045_v42, 23  ;;  %v1718_v62 = vsel %vm7104_vm12, %v6706_v48, %v7080_v15  ;;  %v5078_v28 = vmin.u32 %v1902_v41, %v7125_v1  ;;  %v2192_v40 = vsel %vm2178_vm14, %v2189_v30, %v2191_v16 }
 0x1f7   : > { %v8192_v4 = vand.u32 2147483647, %v6955_v20  ;;  %v2022_v47 = vmul.f32 %v2021_v7, %v2019_v58  ;;  %v7158_v33 = vmul.u32.u64.low %v7091_v36, %v2192_v40  ;;  %v7159_v59 = vmul.u32.u64.high %v7091_v36, %v2192_v40, %v7158_v33 }
 0x1f8   : > { %v5085_v37 = vadd.s32 4294967169, %v2046_v18  ;;  %5543 = vcosq.f32 %v7073_v5  ;;  %v1904_v42 = vclz %v5078_v28  ;;  %v2184_v15 = vsel %vm2178_vm14, %v2181_v60, %v2183_v57 }
 0x1f9   : > { %v2049_v17 = vand.u32 8388607, %v8192_v4  ;;  %v2203_v29 = vadd.s32 1, %v7143_v3  ;;  %5545 = vsinq.f32 %v7073_v5  ;;  %v2023_v8 = vxor.u32 2147483648, %v2022_v47 }
 0x1fa   : > { %v2052_v50 = vadd.s32 1, %v5085_v37  ;;  %5547 = vcosq.f32 %v1718_v62  ;;  %v8193_v61 = vand.u32 2147483647, %v6806_v10  ;;  %v8194_v30 = vmov 0 }
 0x1fb   : > { %v5079_v41 = vadd.s32 4294967294, %v1904_v42  ;;  %v8069_v49 = vand.u32 2147483647, %v7068_v38  ;;  %v2200_v11 = vmul.u32 %v7091_v36, %v2184_v15  ;;  %vm2202_vm4 = vc.u32 %v7159_v59, %v7142_v6 }
 0x1fc   : > { %vm7169_vm15 = vcmp.le.f32.partialorder %v8193_v61, 0.7853982  ;;  %v2050_v5 = vor.u32 8388608, %v2049_v17  ;;  %vm2053_vm14 = vcmp.gt.s32.totalorder %v2052_v50, 0  ;;  %5549 = vsinq.f32 %v1718_v62 }
 0x1fd   : > { %v8195_v30 = vsel %vm7169_vm15, 4294967295, %v8194_v30  ;;  %vm5080_vm9 = vcmp.lt.s32.totalorder %v5079_v41, 0  ;;  %v2204_v60 = vsel %vm2202_vm4, %v2203_v29, %v7143_v3  ;;  %v2054_v57 = vsel %vm2053_vm14, %v2052_v50, 0 }
 0x1fe   : > { %8196 = vst [vmem:[#allocation51_spill] sm:$0xff] %v8195_v30  ;;  %vm8197_vm3 = vcmp.lt.s32.totalorder %v6806_v10, 0  ;;  %v1907_v7 = vsel %vm5080_vm9, 0, %v5079_v41  ;;  %v2205_v16 = vadd.s32 %v2204_v60, %v2200_v11  ;;  %v7180_v18 = vshrl.u32 %v2054_v57, 5 }
 0x1ff   : > { %v2024_v58 = vsel %vm8197_vm3, %v2023_v8, %v2022_v47  ;;  %v1892_v36 = vadd.s32 %v7062_v52, %v7057_v19  ;;  %v1908_v28 = vsub.s32 32, %v1907_v7  ;;  %v1912_v40 = vsub.s32 4294967266, %v1907_v7 }
 0x200   : > { %v2251_v4 = vand.u32 2139095040, %v7068_v38  ;;  %v2206_v17 = vadd.s32 536870912, %v2205_v16  ;;  %v2056_v62 = vand.u32 31, %v2054_v57  ;;  %v7185_v33 = vshll.u32 %v2050_v5, 8 }
 0x201   : > { %v7189_v3 = vand.u32 8388607, %v8069_v49  ;;  %v7194_v47 = vsel %vm7169_vm15, %v6806_v10, %v2024_v58  ;;  %v1909_v37 = vshll.u32 %v7125_v1, %v1907_v7  ;;  %v1913_v19 = vadd.s32 127, %v1912_v40 }
 0x202   : > { %vm2074_vm3 = vcmp.lt.s32.totalorder %v7180_v18, 1  ;;  %v1910_v52 = vshrl.u32 %v1892_v36, %v1908_v28  ;;  %v7198_v42 = vshrl.u32 %v2206_v17, 30  ;;  %v2057_v15 = vsub.s32 32, %v2056_v62 }
 0x203   : > { %vm2075_vm9 = vcmp.lt.s32.totalorder %v7180_v18, 2  ;;  %vm2076_vm4 = vcmp.lt.s32.totalorder %v7180_v18, 3  ;;  %v1914_v29 = vshll.u32 %v1913_v19, 23  ;;  %v2059_v8 = vshll.u32 %v8115_v55, %v2056_v62 }
 0x204   : > { %8198 = vst [vmem:[#allocation52_spill] sm:$0xff] %v7198_v42  ;;  %v2062_v50 = vshll.u32 %v8106_v39, %v2056_v62  ;;  %vm2077_vm14 = vcmp.lt.s32.totalorder %v7180_v18, 4  ;;  %v2208_v1 = vshll.u32 %v7198_v42, 30  ;;  %v2060_v61 = vshrl.u32 %v8106_v39, %v2057_v15 }
 0x205   : > { %v2063_v41 = vshrl.u32 %v8107_v26, %v2057_v15  ;;  %v2065_v11 = vshll.u32 %v8107_v26, %v2056_v62  ;;  %v1915_v5 = vor.u32 4788187, %v1914_v29  ;;  %v2066_v60 = vshrl.u32 %v8108_v43, %v2057_v15  ;;  %v7212_v7 = vpop.eup %5543 }
 0x206   : > { %v2068_v57 = vshll.u32 %v8108_v43, %v2056_v62  ;;  %v2069_v58 = vshrl.u32 %v8124_v27, %v2057_v15  ;;  %8199 = vst [vmem:[#allocation53_spill] sm:$0xff] %v7212_v7  ;;  %v1911_v36 = vor.u32 %v1910_v52, %v1909_v37  ;;  %v7214_v28 = vsub.s32 %v2205_v16, %v2208_v1  ;;  %v7216_v19 = vpop.eup %5545 }
 0x207   : > { %v2061_v40 = vor.u32 %v2060_v61, %v2059_v8  ;;  %v2064_v17 = vor.u32 %v2063_v41, %v2062_v50  ;;  %v2067_v49 = vor.u32 %v2066_v60, %v2065_v11  ;;  %v2071_v30 = vshll.u32 %v8124_v27, %v2056_v62  ;;  %v7220_v10 = vpop.eup %5547 }
 0x208   : > { %v2070_v42 = vor.u32 %v2069_v58, %v2068_v57  ;;  %v2072_v29 = vshrl.u32 %v8103_v21, %v2057_v15  ;;  %v1916_v54 = vand.u32 2147483647, %v1915_v5  ;;  %v2211_v31 = vsub.s32 0, %v7214_v28 }
 0x209   : > { %v2058_v7 = vshrl.u32 %v8115_v55, %v2057_v15  ;;  %v2082_v16 = vsel %vm2074_vm3, %v2061_v40, %v2064_v17  ;;  %v2079_v52 = vsel %vm2077_vm14, %v2067_v49, 2102212464  ;;  %v2252_v62 = vshrl.u32 %v2251_v4, 23  ;;  %v7230_v50 = vpop.eup %5549 }
 0x20a   : > { %v2073_v37 = vor.u32 %v2072_v29, %v2071_v30  ;;  %v2083_v8 = vsel %vm2077_vm14, %v2070_v42, 920167782  ;;  %v1918_v1 = vcvt.s32.f32 %v1911_v36  ;;  %v5090_v61 = vmin.u32 %v2211_v31, %v7214_v28 }
 0x20b   : > { %v2084_v41 = vsel %vm2076_vm4, %v2067_v49, %v2083_v8  ;;  %v2086_v15 = vsel %vm2074_vm3, %v2064_v17, %v2067_v49  ;;  %v2078_v30 = vsel %vm2074_vm3, %v2058_v7, %v2061_v40  ;;  %v2080_v11 = vsel %vm2076_vm4, %v2064_v17, %v2079_v52 }
 0x20c   : > { %v2085_v4 = vsel %vm2075_vm9, %v2082_v16, %v2084_v41  ;;  %v2087_v5 = vsel %vm2077_vm14, %v2073_v37, 1326507024  ;;  %v2213_v31 = vclz %v5090_v61  ;;  %v1919_v58 = vmul.f32 %v1918_v1, %v1916_v54 }
 0x20d   : > { %v2088_v60 = vsel %vm2076_vm4, %v2070_v42, %v2087_v5  ;;  %v7249_v49 = vmul.u32.u64.low %v7185_v33, %v2085_v4  ;;  %v7250_v57 = vmul.u32.u64.high %v7185_v33, %v2085_v4, %v7249_v49  ;;  %v5093_v36 = vadd.s32 4294967169, %v2252_v62 }
 0x20e   : > { %v2089_v7 = vsel %vm2075_vm9, %v2086_v15, %v2088_v60  ;;  %v480_v40 = vsub.s32 4, %v5977_v53  ;;  %v5091_v17 = vadd.s32 4294967294, %v2213_v31  ;;  %v2081_v29 = vsel %vm2075_vm9, %v2078_v30, %v2080_v11 }
 0x20f   : > { %v7259_v16 = vmul.u32.u64.low %v7185_v33, %v2089_v7  ;;  %v7260_v37 = vmul.u32.u64.high %v7185_v33, %v2089_v7, %v7259_v16  ;;  %5551 = vcosq.f32 %v7194_v47  ;;  %v2201_v42 = vadd.s32 %v7142_v6, %v7159_v59 }
 0x210   : > { %v2258_v54 = vadd.s32 1, %v5093_v36  ;;  %v8200_v52 = vand.u32 2147483647, %v5846_v24  ;;  %5553 = vsinq.f32 %v7194_v47  ;;  %vm5092_vm4 = vcmp.lt.s32.totalorder %v5091_v17, 0 }
 0x211   : > { %v2100_v18 = vadd.s32 1, %v7250_v57  ;;  %v1920_v1 = vxor.u32 2147483648, %v1919_v58  ;;  %v2216_v61 = vsel %vm5092_vm4, 0, %v5091_v17  ;;  %v2097_v6 = vmul.u32 %v7185_v33, %v2081_v29 }
 0x212   : > { %vm7267_vm3 = vcmp.le.f32.partialorder %v8200_v52, 0.7853982  ;;  %vm2259_vm9 = vcmp.gt.s32.totalorder %v2258_v54, 0  ;;  %v2217_v59 = vsub.s32 32, %v2216_v61  ;;  %v2221_v41 = vsub.s32 4294967266, %v2216_v61 }
 0x213   : > { %v482_v62 = vsel %vm7267_vm3, %v5846_v24, %v6271_v22  ;;  %v2256_v15 = vor.u32 8388608, %v7189_v3  ;;  %vm8203_vm14 = vcmp.lt.s32.totalorder %v5846_v24, 0  ;;  %v2218_v30 = vshll.u32 %v7214_v28, %v2216_v61 }
 0x214   : > { %v481_v47 = vsel %vm8203_vm14, %v480_v40, %v5977_v53  ;;  %vm2099_vm15 = vc.u32 %v7260_v37, %v7249_v49  ;;  %v2260_v11 = vsel %vm2259_vm9, %v2258_v54, 0  ;;  %5555 = vcosq.f32 %v482_v62 }
 0x215   : > { %v2219_v22 = vshrl.u32 %v2201_v42, %v2217_v59  ;;  %v2222_v4 = vadd.s32 127, %v2221_v41  ;;  %v2101_v33 = vsel %vm2099_vm15, %v2100_v18, %v7250_v57  ;;  %v7286_v5 = vshrl.u32 %v2260_v11, 5 }
 0x216   : > { %vm8204_vm4 = vcmp.lt.s32.totalorder %v6905_v45, 0  ;;  %v2102_v31 = vadd.s32 %v2101_v33, %v2097_v6  ;;  %v2262_v60 = vand.u32 31, %v2260_v11  ;;  %5557 = vsinq.f32 %v482_v62 }
 0x217   : > { %v1921_v3 = vsel %vm8204_vm4, %v1920_v1, %v1919_v58  ;;  %v2220_v53 = vor.u32 %v2219_v22, %v2218_v30  ;;  %v2223_v7 = vshll.u32 %v2222_v4, 23  ;;  %v7290_v28 = vshll.u32 %v2256_v15, 8 }
 0x218   : > { %v7294_v36 = vsel %vm7267_vm3, 0, %v481_v47  ;;  %v2103_v40 = vadd.s32 536870912, %v2102_v31  ;;  %v2263_v17 = vsub.s32 32, %v2262_v60  ;;  %v2265_v57 = vshll.u32 %v8115_v55, %v2262_v60 }
 0x219   : > { %vm2280_vm15 = vcmp.lt.s32.totalorder %v7286_v5, 1  ;;  %v8205_v29 = vand.u32 2147483647, %v6905_v45  ;;  %v8206_v58 = vmov 0  ;;  %v2224_v16 = vor.u32 4788187, %v2223_v7 }
 0x21a   : > { %v2227_v42 = vcvt.s32.f32 %v2220_v53  ;;  %v2268_v54 = vshll.u32 %v8106_v39, %v2262_v60  ;;  %v2271_v52 = vshll.u32 %v8107_v26, %v2262_v60  ;;  %v7307_v8 = vshrl.u32 %v2103_v40, 30 }
 0x21b   : > { %vm7300_vm9 = vcmp.le.f32.partialorder %v8205_v29, 0.7853982  ;;  %v2266_v18 = vshrl.u32 %v8106_v39, %v2263_v17  ;;  %v2269_v62 = vshrl.u32 %v8107_v26, %v2263_v17  ;;  %v2274_v1 = vshll.u32 %v8108_v43, %v2262_v60 }
 0x21c   : > { %v8207_v58 = vsel %vm7300_vm9, 4294967295, %v8206_v58  ;;  %v2225_v61 = vand.u32 2147483647, %v2224_v16  ;;  %v2272_v6 = vshrl.u32 %v8108_v43, %v2263_v17  ;;  %v2275_v59 = vshrl.u32 %v8124_v27, %v2263_v17  ;;  %v7317_v22 = vpop.eup %5551 }
 0x21d   : > { %v2277_v41 = vshll.u32 %v8124_v27, %v2262_v60  ;;  %v2105_v15 = vshll.u32 %v7307_v8, 30  ;;  %v2267_v47 = vor.u32 %v2266_v18, %v2265_v57  ;;  %v2270_v30 = vor.u32 %v2269_v62, %v2268_v54  ;;  %v7320_v53 = vpop.eup %5553 }
 0x21e   : > { %v2278_v11 = vshrl.u32 %v8103_v21, %v2263_v17  ;;  %v2228_v39 = vmul.f32 %v2227_v42, %v2225_v61  ;;  %v2264_v26 = vshrl.u32 %v8115_v55, %v2263_v17  ;;  %v2273_v4 = vor.u32 %v2272_v6, %v2271_v52 }
 0x21f   : > { %v2276_v33 = vor.u32 %v2275_v59, %v2274_v1  ;;  %v7322_v43 = vsub.s32 %v2102_v31, %v2105_v15  ;;  %vm2282_vm14 = vcmp.lt.s32.totalorder %v7286_v5, 3  ;;  %vm2283_vm4 = vcmp.lt.s32.totalorder %v7286_v5, 4 }
 0x220   : > { %v2279_v7 = vor.u32 %v2278_v11, %v2277_v41  ;;  %v2229_v27 = vxor.u32 2147483648, %v2228_v39  ;;  %v2285_v60 = vsel %vm2283_vm4, %v2273_v4, 2102212464  ;;  %v2288_v21 = vsel %vm2280_vm15, %v2267_v47, %v2270_v30 }
 0x221   : > { %v2289_v40 = vsel %vm2283_vm4, %v2276_v33, 920167782  ;;  %v2108_v57 = vsub.s32 0, %v7322_v43  ;;  %vm2281_vm3 = vcmp.lt.s32.totalorder %v7286_v5, 2  ;;  %v2292_v31 = vsel %vm2280_vm15, %v2270_v30, %v2273_v4  ;;  %v7334_v17 = vpop.eup %5555 }
 0x222   : > { %v2290_v55 = vsel %vm2282_vm14, %v2273_v4, %v2289_v40  ;;  %v2284_v29 = vsel %vm2280_vm15, %v2264_v26, %v2267_v47  ;;  %v2286_v16 = vsel %vm2282_vm14, %v2270_v30, %v2285_v60  ;;  %v2293_v54 = vsel %vm2283_vm4, %v2279_v7, 1326507024 }
 0x223   : > { %v2291_v42 = vsel %vm2281_vm3, %v2288_v21, %v2290_v55  ;;  %v1924_v52 = vsel %vm7300_vm9, %v6905_v45, %v1921_v3  ;;  %v5086_v18 = vmin.u32 %v2108_v57, %v7322_v43  ;;  %v2294_v62 = vsel %vm2282_vm14, %v2276_v33, %v2293_v54  ;;  %v7349_v61 = vpop.eup %5557 }
 0x224   : > { %v487_v1 = vand.u32 3, %v7294_v36  ;;  %vm8208_vm15 = vcmp.lt.s32.totalorder %v6947_v12, 0  ;;  %v2295_v59 = vsel %vm2281_vm3, %v2292_v31, %v2294_v62  ;;  %v2287_v47 = vsel %vm2281_vm3, %v2284_v29, %v2286_v16 }
 0x225   : > { %v2230_v6 = vsel %vm8208_vm15, %v2229_v27, %v2228_v39  ;;  %v7356_v41 = vmul.u32.u64.low %v7290_v28, %v2291_v42  ;;  %v7357_v15 = vmul.u32.u64.high %v7290_v28, %v2291_v42, %v7356_v41  ;;  %v2110_v3 = vclz %v5086_v18 }
 0x226   : > { %v7363_v30 = vmul.u32.u64.low %v7290_v28, %v2295_v59  ;;  %v7364_v11 = vmul.u32.u64.high %v7290_v28, %v2295_v59, %v7363_v30  ;;  %5559 = vcosq.f32 %v1924_v52  ;;  %v8209_v26 = vand.u32 2147483647, %v6947_v12 }
 0x227   : > { %v8210_v39 = vmov 0  ;;  %v2098_v4 = vadd.s32 %v7249_v49, %v7260_v37  ;;  %v490_v33 = vxor.u32 2147483648, %v7349_v61  ;;  %v5087_v7 = vadd.s32 4294967294, %v2110_v3 }
 0x228   : > { %vm7368_vm14 = vcmp.le.f32.partialorder %v8209_v26, 0.7853982  ;;  %v493_v27 = vxor.u32 2147483648, %v7334_v17  ;;  %v583_v60 = vsub.s32 4, %v6081_v14  ;;  %v2303_v21 = vmul.u32 %v7290_v28, %v2287_v47 }
 0x229   : > { %v8211_v39 = vsel %vm7368_vm14, 4294967295, %v8210_v39  ;;  %v7378_v5 = vsel %vm7368_vm14, %v6947_v12, %v2230_v6  ;;  %v2306_v40 = vadd.s32 1, %v7357_v15  ;;  %vm489_vm3 = vcmp.eq.s32.totalorder %v487_v1, 0 }
 0x22a   : > { %v8212_v57 = vand.u32 2147483647, %v5866_v46  ;;  %vm5088_vm15 = vcmp.lt.s32.totalorder %v5087_v7, 0  ;;  %vm2305_vm9 = vc.u32 %v7364_v11, %v7356_v41  ;;  %vm492_vm12 = vcmp.eq.s32.totalorder %v487_v1, 2 }
 0x22b   : > { %v2113_v37 = vsel %vm5088_vm15, 0, %v5087_v7  ;;  %v2307_v55 = vsel %vm2305_vm9, %v2306_v40, %v7357_v15  ;;  %v491_v31 = vsel %vm489_vm3, %v7334_v17, %v490_v33  ;;  %vm8213_vm14 = vcmp.lt.s32.totalorder %v5866_v46, 0 }
 0x22c   : > { %vm498_vm4 = vcmp.le.f32.partialorder %v8212_v57, 0.7853982  ;;  %v584_v28 = vsel %vm8213_vm14, %v583_v60, %v6081_v14  ;;  %v2114_v29 = vsub.s32 32, %v2113_v37  ;;  %v2118_v16 = vsub.s32 4294967266, %v2113_v37 }
 0x22d   : > { %v585_v49 = vsel %vm498_vm4, %v5866_v46, %v6775_v2  ;;  %v2308_v42 = vadd.s32 %v2307_v55, %v2303_v21  ;;  %v494_v54 = vsel %vm492_vm12, %v493_v27, %v7349_v61  ;;  %v2115_v18 = vshll.u32 %v7322_v43, %v2113_v37 }
 0x22e   : > { %v586_v62 = vsel %vm498_vm4, 0, %v584_v28  ;;  %5561 = vcosq.f32 %v585_v49  ;;  %v2444_v2 = vadd.s32 3, %v7294_v36  ;;  %v2116_v6 = vshrl.u32 %v2098_v4, %v2114_v29 }
 0x22f   : > { %v2119_v59 = vadd.s32 127, %v2118_v16  ;;  %v2309_v15 = vadd.s32 536870912, %v2308_v42  ;;  %5563 = vsinq.f32 %v585_v49  ;;  %v2548_v47 = vadd.s32 3, %v586_v62 }
 0x230   : > { %5565 = vsinq.f32 %v1924_v52  ;;  %v2445_v3 = vand.u32 3, %v2444_v2  ;;  %v686_v14 = vsub.s32 4, %v5946_v34  ;;  %v2117_v30 = vor.u32 %v2116_v6, %v2115_v18 }
 0x231   : > { %v2120_v26 = vshll.u32 %v2119_v59, 23  ;;  %v7399_v7 = vshrl.u32 %v2309_v15, 30  ;;  %vm488_vm12 = vcmp.lt.s32.totalorder %v487_v1, 2  ;;  %5567 = vcosq.f32 %v7378_v5 }
 0x232   : > { %vm486_vm14 = vweird.f32 %v5846_v24  ;;  %v495_v36 = vsel %vm488_vm12, %v491_v31, %v494_v54  ;;  %v7404_v43 = vand.u32 3, %v586_v62  ;;  %vm2446_vm3 = vcmp.lt.s32.totalorder %v2445_v3, 2 }
 0x233   : > { %v2121_v4 = vor.u32 4788187, %v2120_v26  ;;  %v2311_v52 = vshll.u32 %v7399_v7, 30  ;;  %vm2447_vm4 = vcmp.eq.s32.totalorder %v2445_v3, 0  ;;  %v8214_v60 = vand.u32 2147483647, %v6955_v20  ;;  %v7417_v49 = vpop.eup %5559 }
 0x234   : > { %v2449_v1 = vsel %vm2447_vm4, %v7334_v17, %v490_v33  ;;  %vm2450_vm5 = vcmp.eq.s32.totalorder %v2445_v3, 2  ;;  %v2549_v40 = vand.u32 3, %v2548_v47  ;;  %vm8217_vm12 = vcmp.lt.s32.totalorder %v5843_v23, 0 }
 0x235   : > { %vm7409_vm15 = vcmp.le.f32.partialorder %v8214_v60, 0.7853982  ;;  %v687_v57 = vsel %vm8217_vm12, %v686_v14, %v5946_v34  ;;  %v2122_v37 = vand.u32 2147483647, %v2121_v4  ;;  %v2124_v55 = vcvt.s32.f32 %v2117_v30 }
 0x236   : > { %v7419_v31 = vsub.s32 %v2308_v42, %v2311_v52  ;;  %v2452_v28 = vsel %vm2450_vm5, %v493_v27, %v7349_v61  ;;  %v2304_v29 = vadd.s32 %v7356_v41, %v7364_v11  ;;  %v7426_v17 = vsel %vm486_vm14, nan, %v495_v36  ;;  %v8220_v36 = vld [vmem:[#allocation11_spill] sm:$0xff] }
 0x237   : > { %v2453_v33 = vsel %vm2446_vm3, %v2449_v1, %v2452_v28  ;;  %v689_v16 = vsel %vm6114_vm1, 0, %v687_v57  ;;  %v2125_v34 = vmul.f32 %v2124_v55, %v2122_v37  ;;  %vm591_vm4 = vcmp.lt.s32.totalorder %v7404_v43, 2 }
 0x238   : > { %v2314_v54 = vsub.s32 0, %v7419_v31  ;;  %vm592_vm12 = vcmp.eq.s32.totalorder %v7404_v43, 0  ;;  %vm595_vm5 = vcmp.eq.s32.totalorder %v7404_v43, 2  ;;  %vm2550_vm8 = vcmp.lt.s32.totalorder %v2549_v40, 2 }
 0x239   : > { %vm2551_vm11 = vcmp.eq.s32.totalorder %v2549_v40, 0  ;;  %vm2554_vm10 = vcmp.eq.s32.totalorder %v2549_v40, 2  ;;  %v789_v61 = vsub.s32 4, %v6015_v44  ;;  %v2126_v41 = vxor.u32 2147483648, %v2125_v34 }
 0x23a   : > { %v5094_v13 = vmin.u32 %v2314_v54, %v7419_v31  ;;  %v2454_v11 = vsel %vm486_vm14, nan, %v2453_v33  ;;  %v2652_v27 = vadd.s32 3, %v689_v16  ;;  %v696_v42 = vxor.u32 2147483648, %v6186_v56 }
 0x23b   : > { %v699_v18 = vxor.u32 2147483648, %v6181_v35  ;;  %vm8218_vm1 = vcmp.lt.s32.totalorder %v5855_v32, 0  ;;  %v799_v2 = vxor.u32 2147483648, %v6400_v63  ;;  %v5562_v6 = vpop.eup %5561  ;;  %vm8219_vm3 = vcmp.lt.s32.totalorder %v6955_v20, 0 }
 0x23c   : > { %v790_v62 = vsel %vm8218_vm1, %v789_v61, %v6015_v44  ;;  %v2127_v59 = vsel %vm8219_vm3, %v2126_v41, %v2125_v34  ;;  %v2316_v15 = vclz %v5094_v13  ;;  %v2653_v3 = vand.u32 3, %v2652_v27  ;;  %v5564_v47 = vpop.eup %5563 }
 0x23d   : > { %v792_v24 = vsel %vm6170_vm6, 0, %v790_v62  ;;  %v596_v14 = vxor.u32 2147483648, %v5562_v6  ;;  %v802_v30 = vxor.u32 2147483648, %v6322_v0  ;;  %v693_v26 = vand.u32 3, %v689_v16  ;;  %v7451_v52 = vpop.eup %5565 }
 0x23e   : > { %v892_v4 = vsub.s32 4, %v8220_v36  ;;  %v7456_v44 = vsel %vm7409_vm15, %v6955_v20, %v2127_v59  ;;  %v5095_v60 = vadd.s32 4294967294, %v2316_v15  ;;  %v593_v1 = vxor.u32 2147483648, %v5564_v47  ;;  %v7463_v55 = vpop.eup %5567 }
 0x23f   : > { %vm692_vm14 = vweird.f32 %v5843_v23  ;;  %v2756_v25 = vadd.s32 3, %v792_v24  ;;  %v597_v57 = vsel %vm595_vm5, %v596_v14, %v5564_v47  ;;  %v2556_v37 = vsel %vm2554_vm10, %v596_v14, %v5564_v47 }
 0x240   : > { %vm795_vm6 = vweird.f32 %v5855_v32  ;;  %vm2654_vm1 = vcmp.lt.s32.totalorder %v2653_v3, 2  ;;  %vm2655_vm3 = vcmp.eq.s32.totalorder %v2653_v3, 0  ;;  %vm5096_vm9 = vcmp.lt.s32.totalorder %v5095_v60, 0 }
 0x241   : > { %v594_v28 = vsel %vm592_vm12, %v5562_v6, %v593_v1  ;;  %v2553_v33 = vsel %vm2551_vm11, %v5562_v6, %v593_v1  ;;  %v2657_v16 = vsel %vm2655_vm3, %v6181_v35, %v696_v42  ;;  %v2319_v34 = vsel %vm5096_vm9, 0, %v5095_v60 }
 0x242   : > { %v598_v54 = vsel %vm591_vm4, %v594_v28, %v597_v57  ;;  %v2557_v61 = vsel %vm2550_vm8, %v2553_v33, %v2556_v37  ;;  %vm2658_vm10 = vcmp.eq.s32.totalorder %v2653_v3, 2  ;;  %v2320_v41 = vsub.s32 32, %v2319_v34 }
 0x243   : > { %v2321_v13 = vshll.u32 %v7419_v31, %v2319_v34  ;;  %v2324_v27 = vsub.s32 4294967266, %v2319_v34  ;;  %vm8221_vm5 = vweird.f32 %v5866_v46  ;;  %v2660_v43 = vsel %vm2658_vm10, %v699_v18, %v6186_v56 }
 0x244   : > { %v599_v62 = vsel %vm8221_vm5, nan, %v598_v54  ;;  %vm8222_vm11 = vmmov %vm8221_vm5  ;;  %v2757_v15 = vand.u32 3, %v2756_v25  ;;  %v2322_v40 = vshrl.u32 %v2304_v29, %v2320_v41  ;;  %v2661_v60 = vsel %vm2654_vm1, %v2657_v16, %v2660_v43 }
 0x245   : > { %v2558_v6 = vsel %vm8222_vm11, nan, %v2557_v61  ;;  %v4327_v59 = vpack.c.bf16 %v599_v62, %v7426_v17  ;;  %v2325_v47 = vadd.s32 127, %v2324_v27  ;;  %vm694_vm12 = vcmp.lt.s32.totalorder %v693_v26, 2  ;;  %v8228_v62 = vld [vmem:[#allocation28_spill] sm:$0xff] }
 0x246   : > { %v4328_v14 = vpack.c.bf16 %v2558_v6, %v2454_v11  ;;  %vm2758_vm8 = vcmp.lt.s32.totalorder %v2757_v15, 2  ;;  %vm2759_vm9 = vcmp.eq.s32.totalorder %v2757_v15, 0  ;;  %vm2762_vm4 = vcmp.eq.s32.totalorder %v2757_v15, 2 }
 0x247   : > { %v2323_v31 = vor.u32 %v2322_v40, %v2321_v13  ;;  %v2326_v1 = vshll.u32 %v2325_v47, 23  ;;  %v2761_v46 = vsel %vm2759_vm9, %v6322_v0, %v799_v2  ;;  %v2764_v17 = vsel %vm2762_vm4, %v802_v30, %v6400_v63  ;;  %v8227_v13 = vld [vmem:[#allocation29_spill] sm:$0xff]  ;;  %v8232_v40 = vld [vmem:[#allocation20_spill] sm:$0xff] }
 0x248   : > { %4514 = vmatprep.mubr.bf16.mxu0 %v4328_v14  ;;  %v2662_v29 = vsel %vm692_vm14, nan, %v2661_v60  ;;  %v2765_v11 = vsel %vm2758_vm8, %v2761_v46, %v2764_v17  ;;  %vm695_vm1 = vcmp.eq.s32.totalorder %v693_v26, 0  ;;  %v796_v3 = vand.u32 3, %v792_v24  ;;  %v8233_v60 = vld [vmem:[#allocation19_spill] sm:$0xff]  ;;  %v8234_v46 = vld [vmem:[#allocation14_spill] sm:$0xff] }
 0x249   : > { %4515 = vmatmul.mubr.bf16.vlgmr.msra.gmra.mxu0 %v4327_v59  ;;  %vm2250_vm3 = vcmp.lt.s32.totalorder %v7068_v38, 0  ;;  %v2327_v25 = vor.u32 4788187, %v2326_v1  ;;  %v2766_v57 = vsel %vm795_vm6, nan, %v2765_v11  ;;  %v697_v37 = vsel %vm695_vm1, %v6181_v35, %v696_v42  ;;  %v8223_v35 = vld [vmem:[#allocation6_spill] sm:$0xff]  ;;  %v8229_v59 = vld [vmem:[#allocation5_spill] sm:$0xff] }
 0x24a   : > { %vm698_vm10 = vcmp.eq.s32.totalorder %v693_v26, 2  ;;  %v2330_v28 = vcvt.s32.f32 %v2323_v31  ;;  %v4330_v33 = vpack.c.bf16 %v2766_v57, %v2662_v29  ;;  %vm798_vm5 = vcmp.eq.s32.totalorder %v796_v3, 0 }
 0x24b   : > { %v700_v16 = vsel %vm698_vm10, %v699_v18, %v6186_v56  ;;  %v2328_v34 = vand.u32 2147483647, %v2327_v25  ;;  %v800_v54 = vsel %vm798_vm5, %v6322_v0, %v799_v2  ;;  %vm801_vm11 = vcmp.eq.s32.totalorder %v796_v3, 2 }
 0x24c   : > { %v701_v24 = vsel %vm694_vm12, %v697_v37, %v700_v16  ;;  %5569 = vsinq.f32 %v7378_v5  ;;  %4522 = vmatprep.mubr.bf16.mxu0 %v4330_v33  ;;  %vm797_vm8 = vcmp.lt.s32.totalorder %v796_v3, 2  ;;  %v803_v42 = vsel %vm801_vm11, %v802_v30, %v6400_v63  ;;  %v8226_v63 = vld [vmem:[#allocation8_spill] sm:$0xff] }
 0x24d   : > { %vm8224_vm9 = vcmp.lt.s32.totalorder %v8223_v35, 0  ;;  %v2331_v18 = vmul.f32 %v2330_v28, %v2328_v34  ;;  %v804_v26 = vsel %vm797_vm8, %v800_v54, %v803_v42  ;;  %vm898_vm4 = vweird.f32 %v8223_v35 }
 0x24e   : > { %v893_v56 = vsel %vm8224_vm9, %v892_v4, %v8220_v36  ;;  %5571 = vcosq.f32 %v7456_v44  ;;  %v702_v5 = vsel %vm692_vm14, nan, %v701_v24  ;;  %v805_v0 = vsel %vm795_vm6, nan, %v804_v26 }
 0x24f   : > { %v895_v2 = vsel %vm6421_vm0, 0, %v893_v56  ;;  %v995_v30 = vsub.s32 4, %v8226_v63  ;;  %5573 = vsinq.f32 %v7456_v44  ;;  %v2332_v36 = vxor.u32 2147483648, %v2331_v18 }
 0x250   : > { %v4329_v4 = vpack.c.bf16 %v805_v0, %v702_v5  ;;  %v2860_v41 = vadd.s32 3, %v895_v2  ;;  %v902_v27 = vxor.u32 2147483648, %v8227_v13  ;;  %v905_v6 = vxor.u32 2147483648, %v8228_v62 }
 0x251   : > { %vm8230_vm0 = vcmp.lt.s32.totalorder %v8229_v59, 0  ;;  %v899_v23 = vand.u32 3, %v895_v2  ;;  %vm1001_vm14 = vweird.f32 %v8229_v59  ;;  %v1005_v44 = vxor.u32 2147483648, %v8232_v40 }
 0x252   : > { %v996_v43 = vsel %vm8230_vm0, %v995_v30, %v8226_v63  ;;  %4523 = vmatmul.mubr.bf16.gmra.mxu0 %v4329_v4  ;;  %v2861_v47 = vand.u32 3, %v2860_v41  ;;  %v2333_v14 = vsel %vm2250_vm3, %v2332_v36, %v2331_v18  ;;  %v1008_v31 = vxor.u32 2147483648, %v8233_v60  ;;  %v8238_v30 = vld [vmem:[#allocation9_spill] sm:$0xff] }
 0x253   : > { %v998_v32 = vsel %vm6392_vm7, 0, %v996_v43  ;;  %v1098_v17 = vsub.s32 4, %v8234_v46  ;;  %v8235_v29 = vand.u32 2147483647, %v7068_v38  ;;  %vm900_vm1 = vcmp.lt.s32.totalorder %v899_v23, 2 }
 0x254   : > { %v2964_v1 = vadd.s32 3, %v998_v32  ;;  %vm2863_vm7 = vcmp.eq.s32.totalorder %v2861_v47, 0  ;;  %vm2866_vm12 = vcmp.eq.s32.totalorder %v2861_v47, 2  ;;  %vm901_vm10 = vcmp.eq.s32.totalorder %v899_v23, 0 }
 0x255   : > { %vm7539_vm6 = vcmp.le.f32.partialorder %v8235_v29, 0.7853982  ;;  %vm2862_vm5 = vcmp.lt.s32.totalorder %v2861_v47, 2  ;;  %v2865_v3 = vsel %vm2863_vm7, %v8228_v62, %v902_v27  ;;  %v2868_v25 = vsel %vm2866_vm12, %v905_v6, %v8227_v13  ;;  %v8244_v47 = vld [vmem:[#allocation7_spill] sm:$0xff] }
 0x256   : > { %v2965_v57 = vand.u32 3, %v2964_v1  ;;  %v2869_v37 = vsel %vm2862_vm5, %v2865_v3, %v2868_v25  ;;  %v903_v28 = vsel %vm901_vm10, %v8228_v62, %v902_v27  ;;  %vm904_vm11 = vcmp.eq.s32.totalorder %v899_v23, 2  ;;  %v8241_v27 = vld [vmem:[#allocation33_spill] sm:$0xff] }
 0x257   : > { %v1002_v33 = vand.u32 3, %v998_v32  ;;  %v2870_v16 = vsel %vm898_vm4, nan, %v2869_v37  ;;  %v906_v54 = vsel %vm904_vm11, %v905_v6, %v8227_v13  ;;  %vm8239_vm5 = vcmp.lt.s32.totalorder %v8238_v30, 0  ;;  %v8242_v6 = vld [vmem:[#allocation13_spill] sm:$0xff]  ;;  %v8252_v13 = vld [vmem:[#allocation36_spill] sm:$0xff] }
 0x258   : > { %vm2966_vm8 = vcmp.lt.s32.totalorder %v2965_v57, 2  ;;  %vm2967_vm9 = vcmp.eq.s32.totalorder %v2965_v57, 0  ;;  %vm2970_vm0 = vcmp.eq.s32.totalorder %v2965_v57, 2  ;;  %v907_v56 = vsel %vm900_vm1, %v903_v28, %v906_v54  ;;  %v8249_v57 = vld [vmem:[#allocation23_spill] sm:$0xff] }
 0x259   : > { %v2969_v34 = vsel %vm2967_vm9, %v8233_v60, %v1005_v44  ;;  %v2972_v24 = vsel %vm2970_vm0, %v1008_v31, %v8232_v40  ;;  %vm1003_vm7 = vcmp.lt.s32.totalorder %v1002_v33, 2  ;;  %vm1004_vm12 = vcmp.eq.s32.totalorder %v1002_v33, 0  ;;  %v7552_v18 = vpop.eup %5569 }
 0x25a   : > { %v2973_v42 = vsel %vm2966_vm8, %v2969_v34, %v2972_v24  ;;  %vm1007_vm10 = vcmp.eq.s32.totalorder %v1002_v33, 2  ;;  %v908_v61 = vsel %vm898_vm4, nan, %v907_v56  ;;  %v1006_v2 = vsel %vm1004_vm12, %v8233_v60, %v1005_v44 }
 0x25b   : > { %v2974_v26 = vsel %vm1001_vm14, nan, %v2973_v42  ;;  %v1009_v5 = vsel %vm1007_vm10, %v1008_v31, %v8232_v40  ;;  %v1099_v36 = vsel %vm8239_vm5, %v1098_v17, %v8234_v46  ;;  %vm1104_vm1 = vweird.f32 %v8238_v30  ;;  %v7564_v4 = vpop.eup %5571  ;;  %v8243_v40 = vld [vmem:[#allocation32_spill] sm:$0xff]  ;;  %v8246_v31 = vld [vmem:[#allocation31_spill] sm:$0xff] }
 0x25c   : > { %v4332_v0 = vpack.c.bf16 %v2974_v26, %v2870_v16  ;;  %v1010_v63 = vsel %vm1003_vm7, %v1006_v2, %v1009_v5  ;;  %v1101_v35 = vsel %vm6609_vm2, 0, %v1099_v36  ;;  %v1108_v62 = vxor.u32 2147483648, %v8241_v27  ;;  %v7572_v23 = vpop.eup %5573 }
 0x25d   : > { %v1011_v41 = vsel %vm1001_vm14, nan, %v1010_v63  ;;  %v1201_v43 = vsub.s32 4, %v8242_v6  ;;  %v7577_v15 = vsel %vm7539_vm6, %v7068_v38, %v2333_v14  ;;  %v1111_v44 = vxor.u32 2147483648, %v8243_v40  ;;  %v8248_v14 = vld [vmem:[#allocation30_spill] sm:$0xff] }
 0x25e   : > { %4530 = vmatprep.mubr.bf16.mxu0 %v4332_v0  ;;  %v4331_v32 = vpack.c.bf16 %v1011_v41, %v908_v61  ;;  %v3068_v59 = vadd.s32 3, %v1101_v35  ;;  %vm8245_vm4 = vcmp.lt.s32.totalorder %v8244_v47, 0  ;;  %vm1207_vm2 = vweird.f32 %v8244_v47  ;;  %v8250_v61 = vld [vmem:[#allocation12_spill] sm:$0xff] }
 0x25f   : > { %v1202_v60 = vsel %vm8245_vm4, %v1201_v43, %v8242_v6  ;;  %v1211_v1 = vxor.u32 2147483648, %v8246_v31  ;;  %v1105_v46 = vand.u32 3, %v1101_v35  ;;  %v1214_v3 = vxor.u32 2147483648, %v8248_v14  ;;  %v8254_v43 = vld [vmem:[#allocation18_spill] sm:$0xff] }
 0x260   : > { %4531 = vmatmul.mubr.bf16.gmra.mxu0 %v4331_v32  ;;  %v1204_v29 = vsel %vm6543_vm13, 0, %v1202_v60  ;;  %v3069_v25 = vand.u32 3, %v3068_v59  ;;  %v1304_v37 = vsub.s32 4, %v8249_v57  ;;  %vm8251_vm13 = vcmp.lt.s32.totalorder %v8250_v61, 0  ;;  %v8256_v60 = vld [vmem:[#allocation43_spill] sm:$0xff] }
 0x261   : > { %v3172_v28 = vadd.s32 3, %v1204_v29  ;;  %vm1106_vm14 = vcmp.lt.s32.totalorder %v1105_v46, 2  ;;  %vm1107_vm11 = vcmp.eq.s32.totalorder %v1105_v46, 0  ;;  %vm1110_vm8 = vcmp.eq.s32.totalorder %v1105_v46, 2 }
 0x262   : > { %vm3070_vm9 = vcmp.lt.s32.totalorder %v3069_v25, 2  ;;  %vm3071_vm0 = vcmp.eq.s32.totalorder %v3069_v25, 0  ;;  %vm3074_vm7 = vcmp.eq.s32.totalorder %v3069_v25, 2  ;;  %v1109_v33 = vsel %vm1107_vm11, %v8243_v40, %v1108_v62 }
 0x263   : > { %v3073_v16 = vsel %vm3071_vm0, %v8243_v40, %v1108_v62  ;;  %v3076_v34 = vsel %vm3074_vm7, %v1111_v44, %v8241_v27  ;;  %v3173_v24 = vand.u32 3, %v3172_v28  ;;  %v1112_v54 = vsel %vm1110_vm8, %v1111_v44, %v8241_v27  ;;  %v8255_v44 = vld [vmem:[#allocation44_spill] sm:$0xff] }
 0x264   : > { %v3077_v42 = vsel %vm3070_vm9, %v3073_v16, %v3076_v34  ;;  %v1113_v56 = vsel %vm1106_vm14, %v1109_v33, %v1112_v54  ;;  %v1208_v26 = vand.u32 3, %v1204_v29  ;;  %v1305_v2 = vsel %vm8251_vm13, %v1304_v37, %v8249_v57  ;;  %v8257_v29 = vld [vmem:[#allocation10_spill] sm:$0xff]  ;;  %v8263_v34 = vld [vmem:[#allocation35_spill] sm:$0xff] }
 0x265   : > { %v3078_v5 = vsel %vm1104_vm1, nan, %v3077_v42  ;;  %vm3174_vm12 = vcmp.lt.s32.totalorder %v3173_v24, 2  ;;  %vm3175_vm10 = vcmp.eq.s32.totalorder %v3173_v24, 0  ;;  %vm3178_vm5 = vcmp.eq.s32.totalorder %v3173_v24, 2  ;;  %v8260_v57 = vld [vmem:[#allocation26_spill] sm:$0xff] }
 0x266   : > { %v3177_v0 = vsel %vm3175_vm10, %v8248_v14, %v1211_v1  ;;  %v3180_v63 = vsel %vm3178_vm5, %v1214_v3, %v8246_v31  ;;  %v1114_v36 = vsel %vm1104_vm1, nan, %v1113_v56  ;;  %vm1209_vm4 = vcmp.lt.s32.totalorder %v1208_v26, 2  ;;  %v8262_v33 = vld [vmem:[#allocation34_spill] sm:$0xff]  ;;  %v8264_v56 = vld [vmem:[#allocation21_spill] sm:$0xff] }
 0x267   : > { %v3181_v41 = vsel %vm3174_vm12, %v3177_v0, %v3180_v63  ;;  %vm1210_vm14 = vcmp.eq.s32.totalorder %v1208_v26, 0  ;;  %vm1213_vm11 = vcmp.eq.s32.totalorder %v1208_v26, 2  ;;  %vm8253_vm8 = vnez %v8252_v13 }
 0x268   : > { %v1307_v35 = vsel %vm8253_vm8, 0, %v1305_v2  ;;  %v3182_v27 = vsel %vm1207_vm2, nan, %v3181_v41  ;;  %v1212_v62 = vsel %vm1210_vm14, %v8248_v14, %v1211_v1  ;;  %v1215_v6 = vsel %vm1213_vm11, %v1214_v3, %v8246_v31  ;;  %v8259_v1 = vld [vmem:[#allocation39_spill] sm:$0xff] }
 0x269   : > { %vm1310_vm9 = vweird.f32 %v8250_v61  ;;  %v1407_v32 = vsub.s32 4, %v8254_v43  ;;  %v4334_v30 = vpack.c.bf16 %v3182_v27, %v3078_v5  ;;  %v1216_v40 = vsel %vm1209_vm4, %v1212_v62, %v1215_v6 }
 0x26a   : > { %v1314_v59 = vxor.u32 2147483648, %v8255_v44  ;;  %v1317_v46 = vxor.u32 2147483648, %v8256_v60  ;;  %v1217_v17 = vsel %vm1207_vm2, nan, %v1216_v40  ;;  %vm8258_vm1 = vcmp.lt.s32.totalorder %v8257_v29, 0 }
 0x26b   : > { %v1408_v25 = vsel %vm8258_vm1, %v1407_v32, %v8254_v43  ;;  %v1417_v14 = vxor.u32 2147483648, %v8259_v1  ;;  %v3276_v31 = vadd.s32 3, %v1307_v35  ;;  %4538 = vmatprep.mubr.bf16.mxu0 %v4334_v30  ;;  %v4333_v3 = vpack.c.bf16 %v1217_v17, %v1114_v36  ;;  %v8266_v30 = vld [vmem:[#allocation41_spill] sm:$0xff] }
 0x26c   : > { %vm8261_vm0 = vnez %v8260_v57  ;;  %v1311_v28 = vand.u32 3, %v1307_v35  ;;  %v1510_v16 = vsub.s32 4, %v8262_v33  ;;  %v1420_v24 = vxor.u32 2147483648, %v8263_v34 }
 0x26d   : > { %v1410_v37 = vsel %vm8261_vm0, 0, %v1408_v25  ;;  %v3277_v54 = vand.u32 3, %v3276_v31  ;;  %4539 = vmatmul.mubr.bf16.gmra.mxu0 %v4333_v3  ;;  %vm8265_vm12 = vcmp.lt.s32.totalorder %v8264_v56, 0  ;;  %5575 = vcosq.f32 %v7577_v15  ;;  %v8268_v25 = vld [vmem:[#allocation47_spill] sm:$0xff] }
 0x26e   : > { %v3380_v47 = vadd.s32 3, %v1410_v37  ;;  %v1414_v42 = vand.u32 3, %v1410_v37  ;;  %vm1312_vm2 = vcmp.lt.s32.totalorder %v1311_v28, 2  ;;  %vm1313_vm7 = vcmp.eq.s32.totalorder %v1311_v28, 0  ;;  %v8269_v3 = vld [vmem:[#allocation27_spill] sm:$0xff]  ;;  %v8270_v37 = vld [vmem:[#allocation46_spill] sm:$0xff] }
 0x26f   : > { %vm1316_vm13 = vcmp.eq.s32.totalorder %v1311_v28, 2  ;;  %v1511_v26 = vsel %vm8265_vm12, %v1510_v16, %v8262_v33  ;;  %vm3278_vm10 = vcmp.lt.s32.totalorder %v3277_v54, 2  ;;  %vm3279_vm5 = vcmp.eq.s32.totalorder %v3277_v54, 0 }
 0x270   : > { %vm3282_vm4 = vcmp.eq.s32.totalorder %v3277_v54, 2  ;;  %v3381_v2 = vand.u32 3, %v3380_v47  ;;  %v3281_v5 = vsel %vm3279_vm5, %v8256_v60, %v1314_v59  ;;  %v1315_v63 = vsel %vm1313_vm7, %v8256_v60, %v1314_v59  ;;  %v8274_v47 = vld [vmem:[#allocation42_spill] sm:$0xff] }
 0x271   : > { %v3284_v0 = vsel %vm3282_vm4, %v1317_v46, %v8255_v44  ;;  %v1318_v36 = vsel %vm1316_vm13, %v1317_v46, %v8255_v44  ;;  %vm1413_vm1 = vweird.f32 %v8257_v29  ;;  %vm1416_vm0 = vcmp.eq.s32.totalorder %v1414_v42, 0 }
 0x272   : > { %v3285_v41 = vsel %vm3278_vm10, %v3281_v5, %v3284_v0  ;;  %vm3382_vm14 = vcmp.lt.s32.totalorder %v3381_v2, 2  ;;  %vm3383_vm11 = vcmp.eq.s32.totalorder %v3381_v2, 0  ;;  %vm3386_vm8 = vcmp.eq.s32.totalorder %v3381_v2, 2 }
 0x273   : > { %v3286_v13 = vsel %vm1310_vm9, nan, %v3285_v41  ;;  %v3385_v35 = vsel %vm3383_vm11, %v8263_v34, %v1417_v14  ;;  %v3388_v27 = vsel %vm3386_vm8, %v1420_v24, %v8259_v1  ;;  %v1319_v62 = vsel %vm1312_vm2, %v1315_v63, %v1318_v36 }
 0x274   : > { %v3389_v6 = vsel %vm3382_vm14, %v3385_v35, %v3388_v27  ;;  %v1418_v32 = vsel %vm1416_vm0, %v8263_v34, %v1417_v14  ;;  %vm1419_vm7 = vcmp.eq.s32.totalorder %v1414_v42, 2  ;;  %vm8267_vm13 = vnez %v8266_v30  ;;  %v8271_v34 = vld [vmem:[#allocation15_spill] sm:$0xff] }
 0x275   : > { %v3390_v43 = vsel %vm1413_vm1, nan, %v3389_v6  ;;  %v1513_v40 = vsel %vm8267_vm13, 0, %v1511_v26  ;;  %vm1516_vm12 = vweird.f32 %v8264_v56  ;;  %v1320_v59 = vsel %vm1310_vm9, nan, %v1319_v62  ;;  %v8275_v26 = vld [vmem:[#allocation40_spill] sm:$0xff] }
 0x276   : > { %v4336_v44 = vpack.c.bf16 %v3390_v43, %v3286_v13  ;;  %vm1415_vm2 = vcmp.lt.s32.totalorder %v1414_v42, 2  ;;  %v1421_v60 = vsel %vm1419_vm7, %v1420_v24, %v8259_v1  ;;  %v1520_v17 = vxor.u32 2147483648, %v7119_v51  ;;  %v8273_v24 = vld [vmem:[#allocation45_spill] sm:$0xff] }
 0x277   : > { %v1422_v46 = vsel %vm1415_vm2, %v1418_v32, %v1421_v60  ;;  %v1523_v31 = vxor.u32 2147483648, %v8268_v25  ;;  %v1613_v14 = vsub.s32 4, %v8269_v3  ;;  %v1623_v28 = vxor.u32 2147483648, %v8270_v37 }
 0x278   : > { %4546 = vmatprep.mubr.bf16.mxu0 %v4336_v44  ;;  %v1423_v57 = vsel %vm1413_vm1, nan, %v1422_v46  ;;  %v3484_v33 = vadd.s32 3, %v1513_v40  ;;  %v1517_v16 = vand.u32 3, %v1513_v40  ;;  %vm8272_vm9 = vcmp.lt.s32.totalorder %v8271_v34, 0 }
 0x279   : > { %v4335_v61 = vpack.c.bf16 %v1423_v57, %v1320_v59  ;;  %v1614_v1 = vsel %vm8272_vm9, %v1613_v14, %v8269_v3  ;;  %v1626_v54 = vxor.u32 2147483648, %v8273_v24  ;;  %v1716_v42 = vsub.s32 4, %v8274_v47  ;;  %v8279_v3 = vld [vmem:[#allocation38_spill] sm:$0xff] }
 0x27a   : > { %vm8276_vm10 = vnez %v8275_v26  ;;  %v3485_v5 = vand.u32 3, %v3484_v33  ;;  %vm1518_vm5 = vcmp.lt.s32.totalorder %v1517_v16, 2  ;;  %vm1519_vm4 = vcmp.eq.s32.totalorder %v1517_v16, 0  ;;  %v7670_v40 = vpop.eup %5575  ;;  %v8280_v33 = vld [vmem:[#allocation25_spill] sm:$0xff] }
 0x27b   : > { %v1616_v2 = vsel %vm8276_vm10, 0, %v1614_v1  ;;  %4547 = vmatmul.mubr.bf16.gmra.mxu0 %v4335_v61  ;;  %v1521_v0 = vsel %vm1519_vm4, %v8268_v25, %v1520_v17  ;;  %vm1522_vm14 = vcmp.eq.s32.totalorder %v1517_v16, 2  ;;  %vm1619_vm0 = vweird.f32 %v8271_v34  ;;  %v8282_v34 = vld [vmem:[#allocation48_spill] sm:$0xff] }
 0x27c   : > { %v3588_v29 = vadd.s32 3, %v1616_v2  ;;  %v1620_v63 = vand.u32 3, %v1616_v2  ;;  %vm3486_vm11 = vcmp.lt.s32.totalorder %v3485_v5, 2  ;;  %vm3487_vm8 = vcmp.eq.s32.totalorder %v3485_v5, 0 }
 0x27d   : > { %vm3490_vm1 = vcmp.eq.s32.totalorder %v3485_v5, 2  ;;  %v1524_v36 = vsel %vm1522_vm14, %v1523_v31, %v7119_v51  ;;  %v3489_v41 = vsel %vm3487_vm8, %v8268_v25, %v1520_v17  ;;  %vm8277_vm4 = vcmp.lt.s32.totalorder %v6706_v48, 0 }
 0x27e   : > { %v3492_v13 = vsel %vm3490_vm1, %v1523_v31, %v7119_v51  ;;  %v3589_v35 = vand.u32 3, %v3588_v29  ;;  %v1525_v27 = vsel %vm1518_vm5, %v1521_v0, %v1524_v36  ;;  %vm1622_vm7 = vcmp.eq.s32.totalorder %v1620_v63, 0 }
 0x27f   : > { %v3493_v62 = vsel %vm3486_vm11, %v3489_v41, %v3492_v13  ;;  %v1526_v6 = vsel %vm1516_vm12, nan, %v1525_v27  ;;  %v1624_v51 = vsel %vm1622_vm7, %v8273_v24, %v1623_v28  ;;  %vm1625_vm10 = vcmp.eq.s32.totalorder %v1620_v63, 2 }
 0x280   : > { %v3494_v43 = vsel %vm1516_vm12, nan, %v3493_v62  ;;  %vm3590_vm13 = vcmp.lt.s32.totalorder %v3589_v35, 2  ;;  %vm3591_vm2 = vcmp.eq.s32.totalorder %v3589_v35, 0  ;;  %vm3594_vm9 = vcmp.eq.s32.totalorder %v3589_v35, 2 }
 0x281   : > { %v3593_v32 = vsel %vm3591_vm2, %v8273_v24, %v1623_v28  ;;  %v3596_v30 = vsel %vm3594_vm9, %v1626_v54, %v8270_v37  ;;  %vm1621_vm5 = vcmp.lt.s32.totalorder %v1620_v63, 2  ;;  %v1627_v59 = vsel %vm1625_vm10, %v1626_v54, %v8270_v37  ;;  %v8284_v24 = vld [vmem:[#allocation53_spill] sm:$0xff] }
 0x282   : > { %v3597_v44 = vsel %vm3590_vm13, %v3593_v32, %v3596_v30  ;;  %v1717_v56 = vsel %vm8277_vm4, %v1716_v42, %v8274_v47  ;;  %5577 = vsinq.f32 %v7577_v15  ;;  %v1628_v46 = vsel %vm1621_vm5, %v1624_v51, %v1627_v59  ;;  %v8285_v42 = vld [vmem:[#allocation50_spill] sm:$0xff]  ;;  %v8288_v59 = vld [vmem:[#allocation49_spill] sm:$0xff] }
 0x283   : > { %v3598_v60 = vsel %vm1619_vm0, nan, %v3597_v44  ;;  %vm8278_vm12 = vnez %v8190_v9  ;;  %v1629_v31 = vsel %vm1619_vm0, nan, %v1628_v46  ;;  %vm1722_vm14 = vweird.f32 %v6706_v48 }
 0x284   : > { %v1719_v17 = vsel %vm8278_vm12, 0, %v1717_v56  ;;  %v4338_v25 = vpack.c.bf16 %v3598_v60, %v3494_v43  ;;  %v1819_v14 = vsub.s32 4, %v8279_v3  ;;  %v4337_v57 = vpack.c.bf16 %v1629_v31, %v1526_v6  ;;  %v8289_v31 = vld [vmem:[#allocation37_spill] sm:$0xff] }
 0x285   : > { %v1726_v37 = vxor.u32 2147483648, %v7230_v50  ;;  %v1729_v15 = vxor.u32 2147483648, %v7220_v10  ;;  %v3692_v28 = vadd.s32 3, %v1719_v17  ;;  %vm8281_vm11 = vcmp.lt.s32.totalorder %v8280_v33, 0 }
 0x286   : > { %4554 = vmatprep.mubr.bf16.mxu0 %v4338_v25  ;;  %v1820_v9 = vsel %vm8281_vm11, %v1819_v14, %v8279_v3  ;;  %vm1825_vm8 = vweird.f32 %v8280_v33  ;;  %v1829_v16 = vxor.u32 2147483648, %v7216_v19  ;;  %v1723_v61 = vand.u32 3, %v1719_v17 }
 0x287   : > { %4555 = vmatmul.mubr.bf16.gmra.mxu0 %v4337_v57  ;;  %vm8283_vm1 = vnez %v8282_v34  ;;  %v1832_v54 = vxor.u32 2147483648, %v8284_v24  ;;  %v3693_v47 = vand.u32 3, %v3692_v28  ;;  %v1922_v26 = vsub.s32 4, %v8285_v42 }
 0x288   : > { %v1822_v1 = vsel %vm8283_vm1, 0, %v1820_v9  ;;  %vm1724_vm0 = vcmp.lt.s32.totalorder %v1723_v61, 2  ;;  %vm1725_vm7 = vcmp.eq.s32.totalorder %v1723_v61, 0  ;;  %vm1728_vm13 = vcmp.eq.s32.totalorder %v1723_v61, 2 }
 0x289   : > { %v3796_v2 = vadd.s32 3, %v1822_v1  ;;  %vm3694_vm2 = vcmp.lt.s32.totalorder %v3693_v47, 2  ;;  %vm3695_vm9 = vcmp.eq.s32.totalorder %v3693_v47, 0  ;;  %vm3698_vm10 = vcmp.eq.s32.totalorder %v3693_v47, 2 }
 0x28a   : > { %v1727_v5 = vsel %vm1725_vm7, %v7220_v10, %v1726_v37  ;;  %v3697_v29 = vsel %vm3695_vm9, %v7220_v10, %v1726_v37  ;;  %v3700_v0 = vsel %vm3698_vm10, %v1729_v15, %v7230_v50  ;;  %v1730_v36 = vsel %vm1728_vm13, %v1729_v15, %v7230_v50  ;;  %v8291_v37 = vld [vmem:[#allocation51_spill] sm:$0xff] }
 0x28b   : > { %v3797_v63 = vand.u32 3, %v3796_v2  ;;  %v3701_v41 = vsel %vm3694_vm2, %v3697_v29, %v3700_v0  ;;  %v1731_v13 = vsel %vm1724_vm0, %v1727_v5, %v1730_v36  ;;  %v1826_v35 = vand.u32 3, %v1822_v1 }
 0x28c   : > { %vm8286_vm5 = vcmp.lt.s32.totalorder %v6905_v45, 0  ;;  %v3702_v62 = vsel %vm1722_vm14, nan, %v3701_v41  ;;  %v1732_v50 = vsel %vm1722_vm14, nan, %v1731_v13  ;;  %vm8287_vm13 = vnez %v8207_v58 }
 0x28d   : > { %v1923_v27 = vsel %vm8286_vm5, %v1922_v26, %v8285_v42  ;;  %vm3798_vm4 = vcmp.lt.s32.totalorder %v3797_v63, 2  ;;  %vm3799_vm12 = vcmp.eq.s32.totalorder %v3797_v63, 0  ;;  %vm3802_vm11 = vcmp.eq.s32.totalorder %v3797_v63, 2 }
 0x28e   : > { %v3801_v10 = vsel %vm3799_vm12, %v8284_v24, %v1829_v16  ;;  %v3804_v6 = vsel %vm3802_vm11, %v1832_v54, %v7216_v19  ;;  %vm1827_vm1 = vcmp.lt.s32.totalorder %v1826_v35, 2  ;;  %vm1828_vm0 = vcmp.eq.s32.totalorder %v1826_v35, 0 }
 0x28f   : > { %v3805_v43 = vsel %vm3798_vm4, %v3801_v10, %v3804_v6  ;;  %vm1831_vm7 = vcmp.eq.s32.totalorder %v1826_v35, 2  ;;  %v1925_v32 = vsel %vm8287_vm13, 0, %v1923_v27  ;;  %v1830_v51 = vsel %vm1828_vm0, %v8284_v24, %v1829_v16  ;;  %v7717_v48 = vpop.eup %5577  ;;  %v8294_v6 = vld [vmem:[#allocation52_spill] sm:$0xff] }
 0x290   : > { %v3806_v30 = vsel %vm1825_vm8, nan, %v3805_v43  ;;  %v1833_v44 = vsel %vm1831_vm7, %v1832_v54, %v7216_v19  ;;  %vm1928_vm2 = vweird.f32 %v6905_v45  ;;  %v2025_v56 = vsub.s32 4, %v8288_v59 }
 0x291   : > { %v4340_v60 = vpack.c.bf16 %v3806_v30, %v3702_v62  ;;  %v1834_v46 = vsel %vm1827_vm1, %v1830_v51, %v1833_v44  ;;  %v1932_v17 = vxor.u32 2147483648, %v7451_v52  ;;  %v1935_v58 = vxor.u32 2147483648, %v7417_v49 }
 0x292   : > { %v1835_v25 = vsel %vm1825_vm8, nan, %v1834_v46  ;;  %vm8290_vm14 = vcmp.lt.s32.totalorder %v8289_v31, 0  ;;  %v2035_v19 = vxor.u32 2147483648, %v7320_v53  ;;  %v3900_v14 = vadd.s32 3, %v1925_v32 }
 0x293   : > { %v2026_v3 = vsel %vm8290_vm14, %v2025_v56, %v8288_v59  ;;  %4562 = vmatprep.mubr.bf16.mxu0 %v4340_v60  ;;  %v4339_v57 = vpack.c.bf16 %v1835_v25, %v1732_v50  ;;  %vm8292_vm9 = vnez %v8291_v37  ;;  %v1929_v28 = vand.u32 3, %v1925_v32 }
 0x294   : > { %v2028_v15 = vsel %vm8292_vm9, 0, %v2026_v3  ;;  %v2128_v9 = vsub.s32 4, %v7307_v8  ;;  %v2038_v16 = vxor.u32 2147483648, %v7317_v22  ;;  %v3901_v61 = vand.u32 3, %v3900_v14 }
 0x295   : > { %v4004_v33 = vadd.s32 3, %v2028_v15  ;;  %v2032_v34 = vand.u32 3, %v2028_v15  ;;  %4563 = vmatmul.mubr.bf16.gmra.mxu0 %v4339_v57  ;;  %vm1930_vm8 = vcmp.lt.s32.totalorder %v1929_v28, 2  ;;  %vm1931_vm10 = vcmp.eq.s32.totalorder %v1929_v28, 0 }
 0x296   : > { %vm1934_vm5 = vcmp.eq.s32.totalorder %v1929_v28, 2  ;;  %vm8293_vm4 = vcmp.lt.s32.totalorder %v6955_v20, 0  ;;  %vm3902_vm12 = vcmp.lt.s32.totalorder %v3901_v61, 2  ;;  %vm3903_vm11 = vcmp.eq.s32.totalorder %v3901_v61, 0 }
 0x297   : > { %v2129_v1 = vsel %vm8293_vm4, %v2128_v9, %v7307_v8  ;;  %vm3906_vm1 = vcmp.eq.s32.totalorder %v3901_v61, 2  ;;  %v4005_v24 = vand.u32 3, %v4004_v33  ;;  %v3905_v54 = vsel %vm3903_vm11, %v7417_v49, %v1932_v17 }
 0x298   : > { %v3908_v47 = vsel %vm3906_vm1, %v1935_v58, %v7451_v52  ;;  %v1933_v42 = vsel %vm1931_vm10, %v7417_v49, %v1932_v17  ;;  %v1936_v26 = vsel %vm1934_vm5, %v1935_v58, %v7451_v52  ;;  %vm2031_vm14 = vweird.f32 %v8289_v31 }
 0x299   : > { %v3909_v2 = vsel %vm3902_vm12, %v3905_v54, %v3908_v47  ;;  %vm4006_vm0 = vcmp.lt.s32.totalorder %v4005_v24, 2  ;;  %vm4007_vm7 = vcmp.eq.s32.totalorder %v4005_v24, 0  ;;  %vm4010_vm13 = vcmp.eq.s32.totalorder %v4005_v24, 2 }
 0x29a   : > { %v3910_v5 = vsel %vm1928_vm2, nan, %v3909_v2  ;;  %v4009_v8 = vsel %vm4007_vm7, %v7317_v22, %v2035_v19  ;;  %v4012_v29 = vsel %vm4010_vm13, %v2038_v16, %v7320_v53  ;;  %v1937_v0 = vsel %vm1930_vm8, %v1933_v42, %v1936_v26 }
 0x29b   : > { %v4013_v63 = vsel %vm4006_vm0, %v4009_v8, %v4012_v29  ;;  %vm2034_vm9 = vcmp.eq.s32.totalorder %v2032_v34, 0  ;;  %vm2037_vm10 = vcmp.eq.s32.totalorder %v2032_v34, 2  ;;  %v2131_v36 = vsel %vm7409_vm15, 0, %v2129_v1 }
 0x29c   : > { %v4014_v49 = vsel %vm2031_vm14, nan, %v4013_v63  ;;  %v2036_v52 = vsel %vm2034_vm9, %v7317_v22, %v2035_v19  ;;  %vm2134_vm5 = vweird.f32 %v6955_v20  ;;  %v1938_v13 = vsel %vm1928_vm2, nan, %v1937_v0  ;;  %v5495_v0 = vld [vmem:[%s7969_s4 + $0x38] sm:$0xff]  }
 0x29d   : > { %v4342_v41 = vpack.c.bf16 %v4014_v49, %v3910_v5  ;;  %vm2033_vm8 = vcmp.lt.s32.totalorder %v2032_v34, 2  ;;  %v2039_v35 = vsel %vm2037_vm10, %v2038_v16, %v7320_v53  ;;  %v2138_v62 = vxor.u32 2147483648, %v7572_v23  ;;  %5316 = vmatprep.subr.bf16.mxu1 %v5495_v0  ;;  %v5499_v63 = vld [vmem:[%s7969_s4 + $0x18] sm:$0xff]   ;;  %v5500_v49 = vld [vmem:[%s7969_s4 + $0x10] sm:$0xff]  }
 0x29e   : > { %v2040_v27 = vsel %vm2033_vm8, %v2036_v52, %v2039_v35  ;;  %v2141_v10 = vxor.u32 2147483648, %v7564_v4  ;;  %v2231_v22 = vsub.s32 4, %v8294_v6  ;;  %v2241_v50 = vxor.u32 2147483648, %v7552_v18  ;;  %5317 = vmatpush3.bf16.msra.mxu1 %v5495_v0  ;;  %v5501_v52 = vld [vmem:[%s7969_s4 + $0x8] sm:$0xff]  }
 0x29f   : > { %4570 = vmatprep.mubr.bf16.mxu0 %v4342_v41  ;;  %v2041_v21 = vsel %vm2031_vm14, nan, %v2040_v27  ;;  %v4108_v43 = vadd.s32 3, %v2131_v36  ;;  %v2135_v32 = vand.u32 3, %v2131_v36  ;;  %vm8295_vm15 = vcmp.lt.s32.totalorder %v6947_v12, 0  ;;  %v5502_v36 = vld [vmem:[%s7969_s4] sm:$0xff]  }
 0x2a0   : > { %v4341_v45 = vpack.c.bf16 %v2041_v21, %v1938_v13  ;;  %v2232_v53 = vsel %vm8295_vm15, %v2231_v22, %v8294_v6  ;;  %vm2237_vm2 = vweird.f32 %v6947_v12  ;;  %v2244_v30 = vxor.u32 2147483648, %v7463_v55  ;;  %v7822_v13 = vld [vmem:[%s7968_s3] ss:$0 sm:$0xff] }
 0x2a1   : > { %v2334_v51 = vsub.s32 4, %v7399_v7  ;;  %vm8296_vm4 = vnez %v8211_v39  ;;  %v4109_v59 = vand.u32 3, %v4108_v43  ;;  %vm2136_vm12 = vcmp.lt.s32.totalorder %v2135_v32, 2 }
 0x2a2   : > { %v2234_v44 = vsel %vm8296_vm4, 0, %v2232_v53  ;;  %vm2137_vm11 = vcmp.eq.s32.totalorder %v2135_v32, 0  ;;  %4571 = vmatmul.mubr.bf16.gmra.mxu0 %v4341_v45  ;;  %vm2140_vm1 = vcmp.eq.s32.totalorder %v2135_v32, 2  ;;  %v2344_v20 = vxor.u32 2147483648, %v7717_v48 }
 0x2a3   : > { %v4212_v56 = vadd.s32 3, %v2234_v44  ;;  %v2139_v60 = vsel %vm2137_vm11, %v7564_v4, %v2138_v62  ;;  %v2238_v46 = vand.u32 3, %v2234_v44  ;;  %vm4110_vm0 = vcmp.lt.s32.totalorder %v4109_v59, 2 }
 0x2a4   : > { %vm4111_vm7 = vcmp.eq.s32.totalorder %v4109_v59, 0  ;;  %vm4114_vm13 = vcmp.eq.s32.totalorder %v4109_v59, 2  ;;  %v2142_v17 = vsel %vm2140_vm1, %v2141_v10, %v7572_v23  ;;  %v2335_v28 = vsel %vm2250_vm3, %v2334_v51, %v7399_v7 }
 0x2a5   : > { %v4113_v58 = vsel %vm4111_vm7, %v7564_v4, %v2138_v62  ;;  %v4116_v25 = vsel %vm4114_vm13, %v2141_v10, %v7572_v23  ;;  %v4213_v39 = vand.u32 3, %v4212_v56  ;;  %v2143_v31 = vsel %vm2136_vm12, %v2139_v60, %v2142_v17 }
 0x2a6   : > { %v4117_v3 = vsel %vm4110_vm0, %v4113_v58, %v4116_v25  ;;  %v2144_v19 = vsel %vm2134_vm5, nan, %v2143_v31  ;;  %vm2239_vm14 = vcmp.lt.s32.totalorder %v2238_v46, 2  ;;  %vm2240_vm9 = vcmp.eq.s32.totalorder %v2238_v46, 0 }
 0x2a7   : > { %v4118_v14 = vsel %vm2134_vm5, nan, %v4117_v3  ;;  %vm4214_vm10 = vcmp.lt.s32.totalorder %v4213_v39, 2  ;;  %vm4215_vm8 = vcmp.eq.s32.totalorder %v4213_v39, 0  ;;  %vm4218_vm15 = vcmp.eq.s32.totalorder %v4213_v39, 2 }
 0x2a8   : > { %v4217_v57 = vsel %vm4215_vm8, %v7463_v55, %v2241_v50  ;;  %v4220_v4 = vsel %vm4218_vm15, %v2244_v30, %v7552_v18  ;;  %v2242_v23 = vsel %vm2240_vm9, %v7463_v55, %v2241_v50  ;;  %vm2243_vm4 = vcmp.eq.s32.totalorder %v2238_v46, 2 }
 0x2a9   : > { %v4221_v37 = vsel %vm4214_vm10, %v4217_v57, %v4220_v4  ;;  %v2245_v15 = vsel %vm2243_vm4, %v2244_v30, %v7552_v18  ;;  %v2337_v61 = vsel %vm7539_vm6, 0, %v2335_v28  ;;  %v2347_v33 = vxor.u32 2147483648, %v7670_v40 }
 0x2aa   : > { %v4222_v9 = vsel %vm2237_vm2, nan, %v4221_v37  ;;  %v2246_v16 = vsel %vm2239_vm14, %v2242_v23, %v2245_v15  ;;  %v4316_v18 = vadd.s32 3, %v2337_v61  ;;  %v2341_v1 = vand.u32 3, %v2337_v61 }
 0x2ab   : > { %v4344_v55 = vpack.c.bf16 %v4222_v9, %v4118_v14  ;;  %v2247_v34 = vsel %vm2237_vm2, nan, %v2246_v16  ;;  %vm2340_vm1 = vweird.f32 %v7068_v38  ;;  %v5496_v38 = vld [vmem:[%s7969_s4 + $0x30] sm:$0xff]  }
 0x2ac   : > { %v4343_v24 = vpack.c.bf16 %v2247_v34, %v2144_v19  ;;  %v4317_v7 = vand.u32 3, %v4316_v18  ;;  %vm2343_vm3 = vcmp.eq.s32.totalorder %v2341_v1, 0  ;;  %vm2346_vm5 = vcmp.eq.s32.totalorder %v2341_v1, 2  ;;  %5318 = vmatprep.subr.bf16.mxu1 %v5496_v38 }
 0x2ad   : > { %4578 = vmatprep.mubr.bf16.mxu0 %v4344_v55  ;;  %vm2342_vm12 = vcmp.lt.s32.totalorder %v2341_v1, 2  ;;  %v2345_v54 = vsel %vm2343_vm3, %v7670_v40, %v2344_v20  ;;  %v2348_v11 = vsel %vm2346_vm5, %v2347_v33, %v7717_v48  ;;  %5319 = vmatpush3.bf16.msra.mxu1 %v5496_v38 }
 0x2ae   : > { %4579 = vmatmul.mubr.bf16.gmra.mxu0 %v4343_v24  ;;  %vm4319_vm6 = vcmp.eq.s32.totalorder %v4317_v7, 0  ;;  %vm4322_vm11 = vcmp.eq.s32.totalorder %v4317_v7, 2  ;;  %v2349_v47 = vsel %vm2342_vm12, %v2345_v54, %v2348_v11  ;;  %vm4318_vm0 = vcmp.lt.s32.totalorder %v4317_v7, 2 }
 0x2af   : > { %v4321_v12 = vsel %vm4319_vm6, %v7670_v40, %v2344_v20  ;;  %v4324_v42 = vsel %vm4322_vm11, %v2347_v33, %v7717_v48  ;;  %v2350_v2 = vsel %vm2340_vm1, nan, %v2349_v47  ;;  %v5497_v40 = vld [vmem:[%s7969_s4 + $0x28] sm:$0xff]   ;;  %v5498_v48 = vld [vmem:[%s7969_s4 + $0x20] sm:$0xff]  }
 0x2b0   : > { %v4325_v26 = vsel %vm4318_vm0, %v4321_v12, %v4324_v42  ;;  %v4345_v29 = vpack.c.bf16 %v2350_v2, %v2350_v2  ;;  %5320 = vmatprep.subr.bf16.mxu1 %v5497_v40 }
 0x2b1   : > { %v4326_v5 = vsel %vm2340_vm1, nan, %v4325_v26  ;;  %5321 = vmatpush3.bf16.msra.mxu1 %v5497_v40 }
 0x2b2   : > { %v4346_v8 = vpack.c.bf16 %v4326_v5, %v4326_v5  ;;  %5322 = vmatprep.subr.bf16.mxu1 %v5498_v48 }
 0x2b4   : > { %4586 = vmatprep.mubr.bf16.mxu0 %v4346_v8 }
 0x2b5   : > { %5323 = vmatpush3.bf16.msra.mxu1 %v5498_v48 }
 0x2b6   : > { %4587 = vmatmul.mubr.bf16.gmra.mxu0 %v4345_v29  ;;  %5324 = vmatprep.subr.bf16.mxu1 %v5499_v63 }
 0x2b9   : > { %5325 = vmatpush3.bf16.msra.mxu1 %v5499_v63 }
 0x2ba   : > { %5326 = vmatprep.subr.bf16.mxu1 %v5500_v49 }
 0x2bd   : > { %5327 = vmatpush3.bf16.msra.mxu1 %v5500_v49 }
 0x2be   : > { %5328 = vmatprep.subr.bf16.mxu1 %v5501_v52 }
 0x2c1   : > { %5329 = vmatpush3.bf16.msra.mxu1 %v5501_v52 }
 0x2c2   : > { %5330 = vmatprep.subr.bf16.mxu1 %v5502_v36 }
 0x2c5   : > { %5331 = vmatpush3.bf16.msra.mxu1 %v5502_v36 }
 0x309   : > { %v5238_v41 = vpop.f32.mrf.mxu0 }
 0x30b   : > { %v5239_v35 = vpop.f32.mrf.mxu0 }
 0x30c   : > { %v5240_v27 = vadd.f32 %v5239_v35, %v5238_v41 }
 0x30d   : > { %v5241_v62 = vpop.f32.mrf.mxu0 }
 0x30e   : > { %v4517_v10 = vadd.f32 %v5240_v27, %v7822_v13 }
 0x30f   : > { %v5242_v6 = vpop.f32.mrf.mxu0 }
 0x310   : > { %v5190_v22 = vmul.f32 -1.442695, %v4517_v10  ;;  %v5243_v21 = vadd.f32 %v5242_v6, %v5241_v62 }
 0x312   : > { %5579 = vpow2.f32 %v5190_v22  ;;  %v4520_v50 = vadd.f32 %v5243_v21, %v7822_v13  ;;  %v5244_v43 = vpop.f32.mrf.mxu0 }
 0x314   : > { %v5191_v32 = vmul.f32 -1.442695, %v4520_v50  ;;  %v5245_v45 = vpop.f32.mrf.mxu0 }
 0x315   : > { %v5246_v53 = vadd.f32 %v5245_v45, %v5244_v43 }
 0x316   : > { %5581 = vpow2.f32 %v5191_v32  ;;  %v5247_v30 = vpop.f32.mrf.mxu0 }
 0x317   : > { %v4525_v51 = vadd.f32 %v5246_v53, %v7822_v13 }
 0x318   : > { %v5248_v44 = vpop.f32.mrf.mxu0 }
 0x319   : > { %v5192_v59 = vmul.f32 -1.442695, %v4525_v51  ;;  %v5249_v56 = vadd.f32 %v5248_v44, %v5247_v30 }
 0x31b   : > { %5583 = vpow2.f32 %v5192_v59  ;;  %v4528_v60 = vadd.f32 %v5249_v56, %v7822_v13 }
 0x31d   : > { %v5193_v46 = vmul.f32 -1.442695, %v4528_v60 }
 0x31f   : > { %v5580_v17 = vpop.eup %5579  ;;  %5585 = vpow2.f32 %v5193_v46 }
 0x320   : > { %v5250_v58 = vpop.f32.mrf.mxu0  ;;  %v4651_v25 = vadd.f32 1.0, %v5580_v17 }
 0x322   : > { %v5251_v39 = vpop.f32.mrf.mxu0  ;;  %5587 = vrcp.f32 %v4651_v25 }
 0x323   : > { %v5252_v31 = vadd.f32 %v5251_v39, %v5250_v58  ;;  %v5582_v3 = vpop.eup %5581 }
 0x324   : > { %v5253_v19 = vpop.f32.mrf.mxu0  ;;  %v4652_v14 = vadd.f32 1.0, %v5582_v3 }
 0x325   : > { %v7829_v57 = vadd.f32 %v5252_v31, %v7822_v13 }
 0x326   : > { %v5254_v4 = vpop.f32.mrf.mxu0  ;;  %5589 = vrcp.f32 %v4652_v14 }
 0x327   : > { %v5194_v23 = vmul.f32 -1.442695, %v7829_v57  ;;  %v5255_v37 = vadd.f32 %v5254_v4, %v5253_v19 }
 0x328   : > { %v5584_v15 = vpop.eup %5583 }
 0x329   : > { %5591 = vpow2.f32 %v5194_v23  ;;  %v7833_v28 = vadd.f32 %v5255_v37, %v7822_v13  ;;  %v4653_v20 = vadd.f32 1.0, %v5584_v15 }
 0x32b   : > { %v5195_v9 = vmul.f32 -1.442695, %v7833_v28 }
 0x32c   : > { %v5586_v16 = vpop.eup %5585 }
 0x32d   : > { %5593 = vpow2.f32 %v5195_v9  ;;  %v5256_v61 = vpop.f32.mrf.mxu0  ;;  %v4654_v33 = vadd.f32 1.0, %v5586_v16 }
 0x32e   : > { %5595 = vrcp.f32 %v4653_v20 }
 0x32f   : > { %v5257_v55 = vpop.f32.mrf.mxu0  ;;  %5597 = vrcp.f32 %v4654_v33  ;;  %v5588_v1 = vpop.eup %5587 }
 0x330   : > { %v5258_v34 = vadd.f32 %v5257_v55, %v5256_v61  ;;  %v4708_v12 = vmul.f32 %v5588_v1, %v4517_v10 }
 0x331   : > { %v5259_v18 = vpop.f32.mrf.mxu0 }
 0x332   : > { %v7837_v24 = vadd.f32 %v5258_v34, %v7822_v13 }
 0x333   : > { %v5260_v7 = vpop.f32.mrf.mxu0  ;;  %v5590_v54 = vpop.eup %5589 }
 0x334   : > { %v5196_v11 = vmul.f32 -1.442695, %v7837_v24  ;;  %v5261_v47 = vadd.f32 %v5260_v7, %v5259_v18  ;;  %v4709_v42 = vmul.f32 %v5590_v54, %v4520_v50 }
 0x336   : > { %v5592_v26 = vpop.eup %5591  ;;  %5599 = vpow2.f32 %v5196_v11  ;;  %v7841_v2 = vadd.f32 %v5261_v47, %v7822_v13  ;;  %v4727_v8 = vpack.c.bf16 %v4709_v42, %v4708_v12 }
 0x337   : > { %v4655_v5 = vadd.f32 1.0, %v5592_v26 }
 0x338   : > { %v5197_v29 = vmul.f32 -1.442695, %v7841_v2  ;;  %5332 = vmatprep.mubr.bf16.mxu1 %v4727_v8 }
 0x33a   : > { %v5594_v38 = vpop.eup %5593  ;;  %5601 = vpow2.f32 %v5197_v29 }
 0x33b   : > { %v5262_v0 = vpop.f32.mrf.mxu0  ;;  %v5596_v40 = vpop.eup %5595  ;;  %5603 = vrcp.f32 %v4655_v5  ;;  %v4656_v48 = vadd.f32 1.0, %v5594_v38 }
 0x33c   : > { %v5598_v52 = vpop.eup %5597  ;;  %v4710_v41 = vmul.f32 %v5596_v40, %v4525_v51 }
 0x33d   : > { %v5263_v63 = vpop.f32.mrf.mxu0  ;;  %5605 = vrcp.f32 %v4656_v48  ;;  %v4711_v35 = vmul.f32 %v5598_v52, %v4528_v60 }
 0x33e   : > { %v5264_v49 = vadd.f32 %v5263_v63, %v5262_v0 }
 0x33f   : > { %v5265_v36 = vpop.f32.mrf.mxu0  ;;  %v4728_v22 = vpack.c.bf16 %v4711_v35, %v4710_v41 }
 0x340   : > { %v7845_v27 = vadd.f32 %v5264_v49, %v7822_v13 }
 0x341   : > { %v5266_v62 = vpop.f32.mrf.mxu0  ;;  %5333 = vmatmul.mubr.bf16.vlgmr.msra.gmra.mxu1 %v4728_v22 }
 0x342   : > { %v5198_v10 = vmul.f32 -1.442695, %v7845_v27  ;;  %v5267_v6 = vadd.f32 %v5266_v62, %v5265_v36 }
 0x343   : > { %v5600_v50 = vpop.eup %5599 }
 0x344   : > { %5607 = vpow2.f32 %v5198_v10  ;;  %v7849_v21 = vadd.f32 %v5267_v6, %v7822_v13  ;;  %v4657_v43 = vadd.f32 1.0, %v5600_v50 }
 0x346   : > { %v5199_v32 = vmul.f32 -1.442695, %v7849_v21 }
 0x347   : > { %v5268_v45 = vpop.f32.mrf.mxu0  ;;  %v5602_v30 = vpop.eup %5601 }
 0x348   : > { %5609 = vpow2.f32 %v5199_v32  ;;  %v5604_v44 = vpop.eup %5603  ;;  %v4658_v59 = vadd.f32 1.0, %v5602_v30 }
 0x349   : > { %v5269_v53 = vpop.f32.mrf.mxu0  ;;  %5611 = vrcp.f32 %v4657_v43  ;;  %v4712_v58 = vmul.f32 %v5604_v44, %v7829_v57 }
 0x34a   : > { %v5270_v51 = vadd.f32 %v5269_v53, %v5268_v45  ;;  %v5606_v46 = vpop.eup %5605  ;;  %5613 = vrcp.f32 %v4658_v59 }
 0x34b   : > { %v5271_v56 = vpop.f32.mrf.mxu0  ;;  %v4713_v25 = vmul.f32 %v5606_v46, %v7833_v28 }
 0x34c   : > { %v7853_v60 = vadd.f32 %v5270_v51, %v7822_v13 }
 0x34d   : > { %v5272_v17 = vpop.f32.mrf.mxu0  ;;  %v4729_v19 = vpack.c.bf16 %v4713_v25, %v4712_v58 }
 0x34e   : > { %v5200_v39 = vmul.f32 -1.442695, %v7853_v60  ;;  %v5273_v31 = vadd.f32 %v5272_v17, %v5271_v56 }
 0x34f   : > { %5336 = vmatprep.mubr.bf16.mxu1 %v4729_v19 }
 0x350   : > { %5615 = vpow2.f32 %v5200_v39  ;;  %v7859_v3 = vadd.f32 %v5273_v31, %v7822_v13 }
 0x351   : > { %v5608_v14 = vpop.eup %5607 }
 0x352   : > { %v5201_v4 = vmul.f32 -1.442695, %v7859_v3  ;;  %v4659_v23 = vadd.f32 1.0, %v5608_v14 }
 0x354   : > { %5617 = vpow2.f32 %v5201_v4 }
 0x355   : > { %v5274_v37 = vpop.f32.mrf.mxu0  ;;  %v5610_v20 = vpop.eup %5609  ;;  %5619 = vrcp.f32 %v4659_v23 }
 0x356   : > { %v5612_v9 = vpop.eup %5611  ;;  %v4660_v28 = vadd.f32 1.0, %v5610_v20 }
 0x357   : > { %v5275_v15 = vpop.f32.mrf.mxu0  ;;  %v5614_v33 = vpop.eup %5613  ;;  %v4714_v34 = vmul.f32 %v5612_v9, %v7837_v24 }
 0x358   : > { %v5276_v57 = vadd.f32 %v5275_v15, %v5274_v37  ;;  %5621 = vrcp.f32 %v4660_v28  ;;  %v4715_v18 = vmul.f32 %v5614_v33, %v7841_v2 }
 0x359   : > { %v5277_v16 = vpop.f32.mrf.mxu0 }
 0x35a   : > { %v7863_v61 = vadd.f32 %v5276_v57, %v7822_v13  ;;  %v4730_v47 = vpack.c.bf16 %v4715_v18, %v4714_v34 }
 0x35b   : > { %v5278_v55 = vpop.f32.mrf.mxu0 }
 0x35c   : > { %v5202_v1 = vmul.f32 -1.442695, %v7863_v61  ;;  %v5279_v7 = vadd.f32 %v5278_v55, %v5277_v16  ;;  %5337 = vmatmul.mubr.bf16.gmra.mxu1 %v4730_v47 }
 0x35d   : > { %v5616_v54 = vpop.eup %5615 }
 0x35e   : > { %5623 = vpow2.f32 %v5202_v1  ;;  %v7869_v11 = vadd.f32 %v5279_v7, %v7822_v13  ;;  %v4661_v12 = vadd.f32 1.0, %v5616_v54 }
 0x360   : > { %v5203_v42 = vmul.f32 -1.442695, %v7869_v11 }
 0x361   : > { %v5618_v5 = vpop.eup %5617 }
 0x362   : > { %v5280_v26 = vpop.f32.mrf.mxu0  ;;  %5625 = vpow2.f32 %v5203_v42  ;;  %v4662_v24 = vadd.f32 1.0, %v5618_v5  ;;  %v5620_v0 = vpop.eup %5619 }
 0x363   : > { %5627 = vrcp.f32 %v4661_v12  ;;  %v4716_v52 = vmul.f32 %v5620_v0, %v7845_v27 }
 0x364   : > { %v5281_v8 = vpop.f32.mrf.mxu0  ;;  %5629 = vrcp.f32 %v4662_v24 }
 0x365   : > { %v5282_v2 = vadd.f32 %v5281_v8, %v5280_v26  ;;  %v5622_v48 = vpop.eup %5621 }
 0x366   : > { %v5283_v29 = vpop.f32.mrf.mxu0  ;;  %v4717_v36 = vmul.f32 %v5622_v48, %v7849_v21 }
 0x367   : > { %v7873_v38 = vadd.f32 %v5282_v2, %v7822_v13 }
 0x368   : > { %v5284_v40 = vpop.f32.mrf.mxu0  ;;  %v4731_v62 = vpack.c.bf16 %v4717_v36, %v4716_v52 }
 0x369   : > { %v5204_v63 = vmul.f32 -1.442695, %v7873_v38  ;;  %v5285_v49 = vadd.f32 %v5284_v40, %v5283_v29 }
 0x36a   : > { %5340 = vmatprep.mubr.bf16.mxu1 %v4731_v62 }
 0x36b   : > { %5631 = vpow2.f32 %v5204_v63  ;;  %v4576_v41 = vadd.f32 %v5285_v49, %v7822_v13  ;;  %v5624_v35 = vpop.eup %5623 }
 0x36c   : > { %v4663_v10 = vadd.f32 1.0, %v5624_v35 }
 0x36d   : > { %v5205_v6 = vmul.f32 -1.442695, %v4576_v41 }
 0x36e   : > { %v5286_v22 = vpop.f32.mrf.mxu0 }
 0x36f   : > { %v5626_v43 = vpop.eup %5625  ;;  %5633 = vpow2.f32 %v5205_v6 }
 0x370   : > { %v5287_v50 = vpop.f32.mrf.mxu0  ;;  %v5628_v45 = vpop.eup %5627  ;;  %5635 = vrcp.f32 %v4663_v10  ;;  %v4664_v53 = vadd.f32 1.0, %v5626_v43 }
 0x371   : > { %v5288_v32 = vadd.f32 %v5287_v50, %v5286_v22  ;;  %v5630_v21 = vpop.eup %5629  ;;  %v4718_v44 = vmul.f32 %v5628_v45, %v7853_v60 }
 0x372   : > { %v5289_v30 = vpop.f32.mrf.mxu0  ;;  %5637 = vrcp.f32 %v4664_v53  ;;  %v4719_v59 = vmul.f32 %v5630_v21, %v7859_v3 }
 0x373   : > { %v4581_v27 = vadd.f32 %v5288_v32, %v7822_v13 }
 0x374   : > { %v5290_v51 = vpop.f32.mrf.mxu0  ;;  %v4732_v25 = vpack.c.bf16 %v4719_v59, %v4718_v44 }
 0x375   : > { %v5206_v56 = vmul.f32 -1.442695, %v4581_v27  ;;  %v5291_v46 = vadd.f32 %v5290_v51, %v5289_v30 }
 0x376   : > { %v5292_v17 = vpop.f32.mrf.mxu0  ;;  %5341 = vmatmul.mubr.bf16.gmra.mxu1 %v4732_v25 }
 0x377   : > { %5639 = vpow2.f32 %v5206_v56  ;;  %v4584_v58 = vadd.f32 %v5291_v46, %v7822_v13 }
 0x378   : > { %v5293_v39 = vpop.f32.mrf.mxu0  ;;  %v5632_v31 = vpop.eup %5631 }
 0x379   : > { %v5207_v19 = vmul.f32 -1.442695, %v4584_v58  ;;  %v5294_v14 = vadd.f32 %v5293_v39, %v5292_v17  ;;  %v4665_v4 = vadd.f32 1.0, %v5632_v31 }
 0x37a   : > { %v5295_v23 = vpop.f32.mrf.mxu0 }
 0x37b   : > { %5641 = vpow2.f32 %v5207_v19  ;;  %v4589_v37 = vadd.f32 %v5294_v14, %v7822_v13 }
 0x37c   : > { %v5296_v60 = vpop.f32.mrf.mxu0  ;;  %v5634_v3 = vpop.eup %5633  ;;  %5643 = vrcp.f32 %v4665_v4 }
 0x37d   : > { %v5208_v15 = vmul.f32 -1.442695, %v4589_v37  ;;  %v5636_v20 = vpop.eup %5635  ;;  %v4666_v57 = vadd.f32 1.0, %v5634_v3 }
 0x37e   : > { %v4720_v28 = vmul.f32 %v5636_v20, %v7863_v61 }
 0x37f   : > { %5645 = vpow2.f32 %v5208_v15  ;;  %v5638_v9 = vpop.eup %5637 }
 0x380   : > { %5647 = vrcp.f32 %v4666_v57  ;;  %v4721_v16 = vmul.f32 %v5638_v9, %v7869_v11 }
 0x382   : > { %v4733_v55 = vpack.c.bf16 %v4721_v16, %v4720_v28 }
 0x384   : > { %v5640_v33 = vpop.eup %5639  ;;  %5344 = vmatprep.mubr.bf16.mxu1 %v4733_v55 }
 0x385   : > { %v4667_v34 = vadd.f32 1.0, %v5640_v33 }
 0x387   : > { %5649 = vrcp.f32 %v4667_v34 }
 0x388   : > { %v5642_v18 = vpop.eup %5641 }
 0x389   : > { %v4668_v13 = vadd.f32 1.0, %v5642_v18  ;;  %v5644_v1 = vpop.eup %5643 }
 0x38a   : > { %v4722_v12 = vmul.f32 %v5644_v1, %v7873_v38  ;;  %v5209_v38 = vld [vmem:[%s7970_s5] ss:$0 sm:$0xff] }
 0x38b   : > { %5651 = vrcp.f32 %v4668_v13 }
 0x38c   : > { %v5646_v7 = vpop.eup %5645 }
 0x38d   : > { %v4669_v54 = vadd.f32 1.0, %v5646_v7  ;;  %v5648_v47 = vpop.eup %5647 }
 0x38e   : > { %v4723_v42 = vmul.f32 %v5648_v47, %v4576_v41 }
 0x38f   : > { %5653 = vrcp.f32 %v4669_v54 }
 0x390   : > { %v4734_v61 = vpack.c.bf16 %v4723_v42, %v4722_v12 }
 0x392   : > { %5345 = vmatmul.mubr.bf16.gmra.mxu1 %v4734_v61 }
 0x394   : > { %v5650_v11 = vpop.eup %5649 }
 0x395   : > { %v4724_v5 = vmul.f32 %v5650_v11, %v4581_v27 }
 0x398   : > { %v5652_v26 = vpop.eup %5651 }
 0x399   : > { %v4725_v24 = vmul.f32 %v5652_v26, %v4584_v58 }
 0x39b   : > { %v4735_v8 = vpack.c.bf16 %v4725_v24, %v4724_v5 }
 0x39c   : > { %v5654_v2 = vpop.eup %5653 }
 0x39d   : > { %5348 = vmatprep.mubr.bf16.mxu1 %v4735_v8  ;;  %v4726_v29 = vmul.f32 %v5654_v2, %v4589_v37 }
 0x39f   : > { %v4736_v0 = vpack.c.bf16 %v4726_v29, %v4726_v29 }
 0x3a1   : > { %5349 = vmatmul.mubr.bf16.gmra.mxu1 %v4736_v0 }
 0x401   : > { %v5334_v40 = vpop.f32.mrf.mxu1 }
 0x402   : > { %v4851_v48 = vadd.f32 %v5334_v40, %v5209_v38 }
 0x403   : > { %v4842_v63 = vpop.f32.mrf.mxu1 }
 0x404   : > { %4922 = vst [vmem:[%s7893_s14 + $0x10] sm:$0xff] %v4851_v48  ;;  %v4843_v49 = vadd.f32 %v5209_v38, %v4842_v63 }
 0x405   : > { %v5335_v52 = vpop.f32.mrf.mxu1 }
 0x406   : > { %4920 = vst [vmem:[%s7893_s14] sm:$0xff] %v4843_v49  ;;  %v4854_v36 = vadd.f32 %v5335_v52, %v5209_v38 }
 0x407   : > { %v4845_v41 = vpop.f32.mrf.mxu1 }
 0x408   : > { %4923 = vst [vmem:[%s7893_s14 + $0x18] sm:$0xff] %v4854_v36  ;;  %v4846_v35 = vadd.f32 %v5209_v38, %v4845_v41 }
 0x40a   : > { %4921 = vst [vmem:[%s7893_s14 + $0x8] sm:$0xff] %v4846_v35 }
 0x41c   : > { %v5338_v62 = vpop.f32.mrf.mxu1 }
 0x41d   : > { %v4867_v10 = vadd.f32 %v5338_v62, %v5209_v38 }
 0x41e   : > { %v4858_v6 = vpop.f32.mrf.mxu1 }
 0x41f   : > { %4926 = vst [vmem:[%s7893_s14 + $0x30] sm:$0xff] %v4867_v10  ;;  %v4859_v22 = vadd.f32 %v5209_v38, %v4858_v6 }
 0x420   : > { %v5339_v50 = vpop.f32.mrf.mxu1 }
 0x421   : > { %4924 = vst [vmem:[%s7893_s14 + $0x20] sm:$0xff] %v4859_v22  ;;  %v4870_v43 = vadd.f32 %v5339_v50, %v5209_v38 }
 0x422   : > { %v4861_v32 = vpop.f32.mrf.mxu1 }
 0x423   : > { %4927 = vst [vmem:[%s7893_s14 + $0x38] sm:$0xff] %v4870_v43  ;;  %v4862_v45 = vadd.f32 %v5209_v38, %v4861_v32 }
 0x425   : > { %4925 = vst [vmem:[%s7893_s14 + $0x28] sm:$0xff] %v4862_v45 }
 0x436   : > { %v5342_v53 = vpop.f32.mrf.mxu1 }
 0x437   : > { %v4883_v30 = vadd.f32 %v5342_v53, %v5209_v38 }
 0x438   : > { %v4874_v27 = vpop.f32.mrf.mxu1 }
 0x439   : > { %4930 = vst [vmem:[%s7893_s14 + $0x50] sm:$0xff] %v4883_v30  ;;  %v4875_v21 = vadd.f32 %v5209_v38, %v4874_v27 }
 0x43a   : > { %v5343_v51 = vpop.f32.mrf.mxu1 }
 0x43b   : > { %4928 = vst [vmem:[%s7893_s14 + $0x40] sm:$0xff] %v4875_v21  ;;  %v4886_v44 = vadd.f32 %v5343_v51, %v5209_v38 }
 0x43c   : > { %v4877_v59 = vpop.f32.mrf.mxu1 }
 0x43d   : > { %4931 = vst [vmem:[%s7893_s14 + $0x58] sm:$0xff] %v4886_v44  ;;  %v4878_v56 = vadd.f32 %v5209_v38, %v4877_v59 }
 0x43f   : > { %4929 = vst [vmem:[%s7893_s14 + $0x48] sm:$0xff] %v4878_v56 }
 0x452   : > { %v5346_v46 = vpop.f32.mrf.mxu1 }
 0x453   : > { %v4899_v17 = vadd.f32 %v5346_v46, %v5209_v38 }
 0x454   : > { %v4890_v58 = vpop.f32.mrf.mxu1 }
 0x455   : > { %4934 = vst [vmem:[%s7893_s14 + $0x70] sm:$0xff] %v4899_v17  ;;  %v4891_v25 = vadd.f32 %v5209_v38, %v4890_v58 }
 0x456   : > { %v5347_v39 = vpop.f32.mrf.mxu1 }
 0x457   : > { %4932 = vst [vmem:[%s7893_s14 + $0x60] sm:$0xff] %v4891_v25  ;;  %v4902_v31 = vadd.f32 %v5347_v39, %v5209_v38 }
 0x458   : > { %v4893_v19 = vpop.f32.mrf.mxu1 }
 0x459   : > { %4935 = vst [vmem:[%s7893_s14 + $0x78] sm:$0xff] %v4902_v31  ;;  %v4894_v14 = vadd.f32 %v5209_v38, %v4893_v19 }
 0x45b   : > { %4933 = vst [vmem:[%s7893_s14 + $0x68] sm:$0xff] %v4894_v14 }
 0x461   : > { %v5350_v4 = vpop.f32.mrf.mxu1 }
 0x462   : > { %v4915_v23 = vadd.f32 %v5350_v4, %v5209_v38 }
 0x463   : > { %v4906_v37 = vpop.f32.mrf.mxu1 }
 0x464   : > { %4938 = vst [vmem:[%s7893_s14 + $0x90] sm:$0xff] %v4915_v23  ;;  %v4907_v60 = vadd.f32 %v5209_v38, %v4906_v37 }
 0x465   : > { %v5351_v15 = vpop.f32.mrf.mxu1 }
 0x466   : > { %4936 = vst [vmem:[%s7893_s14 + $0x80] sm:$0xff] %v4907_v60 }
 0x467   : > { %v4909_v3 = vpop.f32.mrf.mxu1 }
 0x468   : > { %v4910_v20 = vadd.f32 %v5209_v38, %v4909_v3 }
 0x46a   : > { %4937 = vst [vmem:[%s7893_s14 + $0x88] sm:$0xff] %v4910_v20 }
 0x46b   : > { %5670 = shalt.err (!%p5667_p3)
}
 0x46c   : > { %s5671_s9 = scalar_lea.hbm %s7920_s19, 2432  ;;  %s5675_s12 = scalar_lea.hbm %s7971_s6, 4864 }
 0x46d   : > { %p5672_p4 = scmp.ne.s32.totalorder %s7920_s19, %s5671_s9  ;;  %p5676_p9 = scmp.lt.s32.totalorder %s7920_s19, %s7971_s6 }
 0x46e   : > { %p5677_p10 = scmp.lt.s32.totalorder %s5675_s12, %s5671_s9 }
 0x46f   : > { %p5673_p7 = pnand %p5672_p4, %p5802_p5 }
 0x470   : > { %p5678_p11 = por %p5677_p10, %p5676_p9 }
 0x471   : > { %p5674_p8 = pneg %p5673_p7 }
 0x473   : > { %p5679_p12 = pnand %p5678_p11, %p5674_p8 }
 0x475   : > { %5682 = shalt.err (!%p5679_p12)
}
 0x476   : > { %s5727_s15 = smov 128   ;;  %s5728_s17 = smov 8  }
 0x477   : > { %5429 = dma.vmem_to_hbm [thread:$0]  (%p5802_p5), %s7915_s16, 2432, %s7920_s19, %s7925_s20, %s5727_s15, %s5727_s15, %s5728_s17  }
 0x478 PF: > { %p5435_p13 = scmp.ge.s32.totalorder %s5717_s24, 2  ;;  %s4968_s18 = sand.u32 1, %s5705_s21  }
 0x479   : > { %s4969_s25 = scalar_lea.sflag [#allocation3], %s4968_s18 }
 0x47a   : > { %p5432_p0 = pnand %p5435_p13, %p5806_p6 }
 0x47c   : > { %p5433_p1 = pneg %p5432_p0 }
 0x47e   : > { %5700 = dma.done.wait (%p5433_p1), %s4969_s25, 2432  }
 0x47f   : > { %5702 = vsyncadd (%p5433_p1), %s4969_s25, 4294964864  ;;  %p16_p2 = scmp.ge.s32.totalorder %s5789_s27, 4   ;;  %s8297_s21 = smov %s5709_s22 }
 0x480   : > { %s8298_s22 = smov %s5713_s23  ;;  %s8299_s23 = smov %s5800_s30 }
 0x481   : > { %s8300_s24 = smov %s5789_s27  ;;  %18 = sbr.rel (!%p16_p2) target bundleno = 3 (0x3), region = 79 }
 0x486   :  { %4974 = vsyncpa [#allocation3], 1 }
 0x487   :  { %4976 = vsyncpa [#allocation3 + $0x1], 1 }

</bundles_post_ra>
